<compile_context>
chip_gen: v7x
topology: tpu7x:2x2x1
jax: 0.10.0
libtpu: 0.0.40
codegen_flags: <defaults>
</compile_context>

<pallas_src>
import jax
import jax.numpy as jnp
from jax import lax
from jax.experimental import pallas as pl
from jax.experimental.pallas import tpu as pltpu


def _round_up(x, m):
    return ((x + m - 1) // m) * m


def _make_residual_kernel(TH, Wpp, C, C2, cdt):
    """TH = image rows per tile, Wpp = padded row stride (multiple of 8)."""
    RB = TH * Wpp  # output rows per tile (flat)

    def kernel(x_ref, htop_ref, hbot_ref, m_ref, mtop_ref, mbot_ref,
               w1_ref, b1_ref, w2_ref, b2_ref,
               o_ref, y1_ref, acc_ref):
        # x_ref    : [RB, C]   f32 body rows of this tile (padded image rows h0..h0+TH-1)
        # htop/bot : [Wpp, C]  f32 one-row halos (padded rows h0-1 and h0+TH)
        # m*       : masks (1 at real pixels, 0 at conv/extra padding)
        # w1       : [C, C2]   BN1-folded 1x1 weight (compute dtype)
        # b1       : [1, C2]   f32
        # w2       : [3, 3*C2, C] BN2-folded 3x3 taps, dx fused along K (compute dtype)
        # b2       : [1, C]    f32
        # o_ref    : [RB, C]   f32 output rows
        # y1_ref   : [(TH+4)*Wpp, C2] VMEM scratch for the conv1 activation (+ guards)
        # acc_ref  : [RB, C]   f32 VMEM accumulator
        w1 = w1_ref[...]
        b1 = b1_ref[...]

        def conv1(x, m):
            # 1x1 conv (BN1 folded) + LeakyReLU(0.1); padding mask fused into the
            # select instead of a separate multiply pass.
            z = jnp.dot(x.astype(cdt), w1, preferred_element_type=jnp.float32) + b1
            z = jnp.where(m > 0.0, jnp.where(z > 0.0, z, 0.1 * z), 0.0)
            return z.astype(cdt)

        # Guard row-blocks touched only by the dx = +-1 shifts at the tile edges;
        # their true (zero-padding) value is 0.  Aligned, full-lane stores.
        zblk = jnp.zeros((Wpp, C2), cdt)
        y1_ref[0:Wpp, :] = zblk
        y1_ref[(TH + 3) * Wpp:(TH + 4) * Wpp, :] = zblk

        # conv1 for the tile body plus the recomputed one-row halos, written at
        # Wpp-aligned (multiple-of-8) offsets.
        y1_ref[Wpp:2 * Wpp, :] = conv1(htop_ref[...], mtop_ref[...])
        y1_ref[2 * Wpp:(TH + 2) * Wpp, :] = conv1(x_ref[...], m_ref[...])
        y1_ref[(TH + 2) * Wpp:(TH + 3) * Wpp, :] = conv1(hbot_ref[...], mbot_ref[...])

        # 3x3 conv (BN2 folded): 3 MXU matmuls with K = 3*C2 (dx taps fused along the
        # contraction dim); f32 VMEM accumulator seeded with the folded bias.
        acc_ref[...] = jnp.broadcast_to(b2_ref[...], (RB, C))
        for dy in range(3):
            s = (dy + 1) * Wpp                      # sublane-aligned (Wpp % 8 == 0)
            patch = jnp.concatenate(
                [y1_ref[s - 1:s - 1 + RB, :],       # dx = 0
                 y1_ref[s:s + RB, :],               # dx = 1
                 y1_ref[s + 1:s + 1 + RB, :]],      # dx = 2
                axis=1)                             # [RB, 3*C2]
            acc_ref[...] += jnp.dot(patch, w2_ref[dy],
                                    preferred_element_type=jnp.float32)

        # LeakyReLU(0.1) + residual add, all in f32.
        y2 = acc_ref[...]
        o_ref[...] = x_ref[...] + jnp.where(y2 > 0.0, y2, 0.1 * y2)

    return kernel


def residual_layer_pallas(x_nchw, w1, b1, w2, b2, *, tile_h=None,
                          compute_dtype=jnp.bfloat16, target_block_rows=1024):
    """x_nchw: [N, C, H, W] float32; w1:[C,C2], b1:[1,C2], w2:[9,C2,C], b2:[1,C]."""
    N, C, H, W = x_nchw.shape
    C2 = w1.shape[1]

    # Sublane-aligned padded row stride.
    Wpp = _round_up(W + 2, 8)

    # Row tile size (in image rows); sized so a tile is ~target_block_rows flat rows.
    if tile_h is None:
        tile_h = max(1, min(H, target_block_rows // Wpp))
    TH = int(tile_h)
    nT = int(pl.cdiv(H, TH))
    Ht = nT * TH                 # H rounded up to a multiple of TH (extra rows = zeros)
    Hpp = Ht + 2                 # + top/bottom conv-padding rows
    RB = TH * Wpp

    # --- wrapper glue: NCHW -> zero-padded NHWC -> flat rows ---
    # TODO(synk): in an NHWC pipeline these transpose/pad/slice HBM passes go away.
    x_nhwc = jnp.transpose(x_nchw, (0, 2, 3, 1)).astype(jnp.float32)
    xp = jnp.pad(x_nhwc, ((0, 0), (1, Ht - H + 1), (1, Wpp - W - 1), (0, 0)))  # [N,Hpp,Wpp,C]

    x_body = xp[:, 1:Ht + 1].reshape(N, Ht * Wpp, C)       # padded rows 1..Ht
    halo_top = xp[:, 0:Ht:TH]                              # padded row t*TH       [N,nT,Wpp,C]
    halo_bot = xp[:, TH + 1:Hpp:TH]                        # padded row 1+(t+1)*TH [N,nT,Wpp,C]

    # Interior masks (1 at real pixels, 0 at padding).
    col_in = (jnp.arange(Wpp) >= 1) & (jnp.arange(Wpp) <= W)
    row_in = (jnp.arange(Hpp) >= 1) & (jnp.arange(Hpp) <= H)
    mask_full = (row_in[:, None] & col_in[None, :]).astype(jnp.float32)   # [Hpp, Wpp]
    mask_body = mask_full[1:Ht + 1].reshape(Ht * Wpp, 1)
    mask_top = mask_full[0:Ht:TH][:, :, None]              # [nT, Wpp, 1]
    mask_bot = mask_full[TH + 1:Hpp:TH][:, :, None]        # [nT, Wpp, 1]

    # BN-folded weights: matmul operands in compute dtype, biases in f32.
    w1c = w1.astype(compute_dtype)                                       # [C, C2]
    w2p = w2.reshape(3, 3, C2, C).reshape(3, 3 * C2, C).astype(compute_dtype)
    b1f = b1.astype(jnp.float32)
    b2f = b2.astype(jnp.float32)

    kernel = _make_residual_kernel(TH, Wpp, C, C2, compute_dtype)

    out_flat = pl.pallas_call(
        kernel,
        out_shape=jax.ShapeDtypeStruct((N, Ht * Wpp, C), jnp.float32),
        grid=(N, nT),
        in_specs=[
            pl.BlockSpec((None, RB, C), lambda n, t: (n, t, 0)),            # x body tile
            pl.BlockSpec((None, None, Wpp, C), lambda n, t: (n, t, 0, 0)),  # top halo
            pl.BlockSpec((None, None, Wpp, C), lambda n, t: (n, t, 0, 0)),  # bottom halo
            pl.BlockSpec((RB, 1), lambda n, t: (t, 0)),                     # body mask
            pl.BlockSpec((None, Wpp, 1), lambda n, t: (t, 0, 0)),           # top halo mask
            pl.BlockSpec((None, Wpp, 1), lambda n, t: (t, 0, 0)),           # bottom halo mask
            pl.BlockSpec((C, C2), lambda n, t: (0, 0)),                     # w1 (pinned)
            pl.BlockSpec((1, C2), lambda n, t: (0, 0)),                     # b1 (pinned)
            pl.BlockSpec((3, 3 * C2, C), lambda n, t: (0, 0, 0)),           # w2 (pinned)
            pl.BlockSpec((1, C), lambda n, t: (0, 0)),                      # b2 (pinned)
        ],
        out_specs=pl.BlockSpec((None, RB, C), lambda n, t: (n, t, 0)),
        scratch_shapes=[
            pltpu.VMEM(((TH + 4) * Wpp, C2), compute_dtype),   # conv1 activation tile
            pltpu.VMEM((RB, C), jnp.float32),                  # conv2 f32 accumulator
        ],
        compiler_params=pltpu.CompilerParams(
            dimension_semantics=("parallel", "parallel"),
            vmem_limit_bytes=64 * 1024 * 1024,
        ),
    )(x_body, halo_top, halo_bot, mask_body, mask_top, mask_bot, w1c, b1f, w2p, b2f)

    # flat rows -> NHWC interior -> NCHW
    out = out_flat.reshape(N, Ht, Wpp, C)[:, :H, 1:W + 1, :]
    return jnp.transpose(out, (0, 3, 1, 2))


def make_params(key, C):
    """Deterministic synthetic parameters (conv weights + BN params), BN folded."""
    C2 = C // 2
    ks = jax.random.split(key, 10)
    eps = 1e-5
    # PyTorch conv weight layouts: [out, in, kh, kw]
    Wc1 = jax.random.normal(ks[0], (C2, C, 1, 1), jnp.float32) * 0.5
    Wc2 = jax.random.normal(ks[1], (C, C2, 3, 3), jnp.float32) * 0.5
    gamma1 = jax.random.uniform(ks[2], (C2,), jnp.float32, 0.5, 1.5)
    beta1 = jax.random.normal(ks[3], (C2,), jnp.float32) * 0.1
    mean1 = jax.random.normal(ks[4], (C2,), jnp.float32) * 0.1
    var1 = jax.random.uniform(ks[5], (C2,), jnp.float32, 0.5, 1.5)
    gamma2 = jax.random.uniform(ks[6], (C,), jnp.float32, 0.5, 1.5)
    beta2 = jax.random.normal(ks[7], (C,), jnp.float32) * 0.1
    mean2 = jax.random.normal(ks[8], (C,), jnp.float32) * 0.1
    var2 = jax.random.uniform(ks[9], (C,), jnp.float32, 0.5, 1.5)

    scale1 = gamma1 / jnp.sqrt(var1 + eps)
    scale2 = gamma2 / jnp.sqrt(var2 + eps)

    # Folded kernel-side params
    w1 = Wc1[:, :, 0, 0].T * scale1[None, :]                         # [C, C2]
    b1 = (beta1 - mean1 * scale1)[None, :]                           # [1, C2]
    # taps: w2[dy*3+dx, c2, c] = Wc2[c, c2, dy, dx] * scale2[c]
    w2 = jnp.transpose(Wc2, (2, 3, 1, 0)).reshape(9, C2, C) * scale2[None, None, :]
    b2 = (beta2 - mean2 * scale2)[None, :]                           # [1, C]

    raw = dict(Wc1=Wc1, Wc2=Wc2, scale1=scale1, beta1=beta1, mean1=mean1,
               scale2=scale2, beta2=beta2, mean2=mean2)
    return (w1, b1, w2, b2), raw


def reference_forward(x_nchw, raw):
    """Pure-JAX reference matching the PyTorch module (eval-mode BN)."""
    dn = ('NCHW', 'OIHW', 'NCHW')
    z = lax.conv_general_dilated(x_nchw, raw['Wc1'], (1, 1),
                                 ((0, 0), (0, 0)), dimension_numbers=dn)
    z = (z - raw['mean1'][None, :, None, None]) * raw['scale1'][None, :, None, None] \
        + raw['beta1'][None, :, None, None]
    z = jnp.where(z > 0, z, 0.1 * z)
    z = lax.conv_general_dilated(z, raw['Wc2'], (1, 1),
                                 ((1, 1), (1, 1)), dimension_numbers=dn)
    z = (z - raw['mean2'][None, :, None, None]) * raw['scale2'][None, :, None, None] \
        + raw['beta2'][None, :, None, None]
    z = jnp.where(z > 0, z, 0.1 * z)
    return x_nchw + z


if __name__ == "__main__":
    N, C, H, W = 2, 4, 16, 16
    key = jax.random.PRNGKey(0)
    kx, kp = jax.random.split(key)
    x = jax.random.normal(kx, (N, C, H, W), jnp.float32)

    (w1, b1, w2, b2), raw = make_params(kp, C)
    ref = jax.block_until_ready(reference_forward(x, raw))

    # 1) f32 compute path, forced multi-tile grid (exercises the halo machinery).
    out_f32 = jax.block_until_ready(
        residual_layer_pallas(x, w1, b1, w2, b2, tile_h=8,
                              compute_dtype=jnp.float32))
    assert out_f32.shape == (N, C, H, W)
    err32 = float(jnp.max(jnp.abs(out_f32 - ref)))
    assert jnp.allclose(out_f32, ref, rtol=1e-4, atol=1e-4), \
        f"f32 path max abs err = {err32}"

    # 2) default bf16 compute path (f32 accumulation / residual), auto tile size.
    out_bf16 = jax.block_until_ready(residual_layer_pallas(x, w1, b1, w2, b2))
    assert out_bf16.shape == (N, C, H, W)
    errbf = float(jnp.max(jnp.abs(out_bf16 - ref)))
    assert jnp.allclose(out_bf16, ref, rtol=5e-2, atol=2.5e-1), \
        f"bf16 path max abs err = {errbf}"

    print("KERNEL_OK")
</pallas_src>

<mosaic_0001>
module attributes {stable_mosaic.version = 11 : i64} {
  func.func @kernel(%arg0: i32, %arg1: i32, %arg2: memref<1x192x4xf32, #tpu.memory_space<vmem>>, %arg3: memref<1x1x24x4xf32, #tpu.memory_space<vmem>>, %arg4: memref<1x1x24x4xf32, #tpu.memory_space<vmem>>, %arg5: memref<192x1xf32, #tpu.memory_space<vmem>>, %arg6: memref<1x24x1xf32, #tpu.memory_space<vmem>>, %arg7: memref<1x24x1xf32, #tpu.memory_space<vmem>>, %arg8: memref<4x2xf32, #tpu.memory_space<vmem>>, %arg9: memref<1x2xf32, #tpu.memory_space<vmem>>, %arg10: memref<3x6x4xf32, #tpu.memory_space<vmem>>, %arg11: memref<1x4xf32, #tpu.memory_space<vmem>>, %arg12: memref<1x192x4xf32, #tpu.memory_space<vmem>>, %arg13: memref<288x2xf32, #tpu.memory_space<vmem>>, %arg14: memref<192x4xf32, #tpu.memory_space<vmem>>) attributes {dimension_semantics = [#tpu.dimension_semantics<parallel>, #tpu.dimension_semantics<parallel>], iteration_bounds = array<i64: 2, 2>, scalar_prefetch = 0 : i64, scratch_operands = 2 : i64, tpu.core_type = #tpu.core_type<tc>, window_params = [{transform_indices = @transform_0, window_bounds = array<i64: 1, 192, 4>}, {transform_indices = @transform_1, window_bounds = array<i64: 1, 1, 24, 4>}, {transform_indices = @transform_2, window_bounds = array<i64: 1, 1, 24, 4>}, {transform_indices = @transform_3, window_bounds = array<i64: 192, 1>}, {transform_indices = @transform_4, window_bounds = array<i64: 1, 24, 1>}, {transform_indices = @transform_5, window_bounds = array<i64: 1, 24, 1>}, {pipeline_mode = #tpu.pipeline_mode<synchronous>, transform_indices = @transform_6, window_bounds = array<i64: 4, 2>}, {pipeline_mode = #tpu.pipeline_mode<synchronous>, transform_indices = @transform_7, window_bounds = array<i64: 1, 2>}, {pipeline_mode = #tpu.pipeline_mode<synchronous>, transform_indices = @transform_8, window_bounds = array<i64: 3, 6, 4>}, {pipeline_mode = #tpu.pipeline_mode<synchronous>, transform_indices = @transform_9, window_bounds = array<i64: 1, 4>}, {transform_indices = @transform_10, window_bounds = array<i64: 1, 192, 4>}]} {
    %c0 = arith.constant 0 : index
    %c0_0 = arith.constant 0 : index
    %0 = vector.load %arg8[%c0, %c0_0] : memref<4x2xf32, #tpu.memory_space<vmem>>, vector<4x2xf32>
    %c0_1 = arith.constant 0 : index
    %c0_2 = arith.constant 0 : index
    %1 = vector.load %arg9[%c0_1, %c0_2] : memref<1x2xf32, #tpu.memory_space<vmem>>, vector<1x2xf32>
    %cst = arith.constant 0.000000e+00 : f32
    %2 = vector.broadcast %cst : f32 to vector<24x2xf32>
    %c0_3 = arith.constant 0 : index
    %c0_4 = arith.constant 0 : index
    %3 = vector.load %arg13[%c0_3, %c0_4] : memref<288x2xf32, #tpu.memory_space<vmem>>, vector<24x2xf32>
    tpu.vector_store %arg13[%c0_3, %c0_4], %2 {strides = array<i32>} : memref<288x2xf32, #tpu.memory_space<vmem>>, vector<24x2xf32>,
    %c264 = arith.constant 264 : index
    %c0_5 = arith.constant 0 : index
    %4 = vector.load %arg13[%c264, %c0_5] : memref<288x2xf32, #tpu.memory_space<vmem>>, vector<24x2xf32>
    tpu.vector_store %arg13[%c264, %c0_5], %2 {strides = array<i32>} : memref<288x2xf32, #tpu.memory_space<vmem>>, vector<24x2xf32>,
    %c0_6 = arith.constant 0 : index
    %c0_7 = arith.constant 0 : index
    %c0_8 = arith.constant 0 : index
    %c0_9 = arith.constant 0 : index
    %5 = vector.load %arg3[%c0_6, %c0_7, %c0_8, %c0_9] : memref<1x1x24x4xf32, #tpu.memory_space<vmem>>, vector<1x1x24x4xf32>
    %6 = vector.shape_cast %5 : vector<1x1x24x4xf32> to vector<24x4xf32>
    %c0_10 = arith.constant 0 : index
    %c0_11 = arith.constant 0 : index
    %c0_12 = arith.constant 0 : index
    %7 = vector.load %arg6[%c0_10, %c0_11, %c0_12] : memref<1x24x1xf32, #tpu.memory_space<vmem>>, vector<1x24x1xf32>
    %8 = vector.shape_cast %7 : vector<1x24x1xf32> to vector<24x1xf32>
    %cst_13 = arith.constant dense<0.000000e+00> : vector<24x2xf32>
    %9 = tpu.matmul %6, %0, %cst_13 {dimension_numbers = #tpu.dot_dimension_numbers<[1], [0], [0], [1], [0, 0, 1, 1], [], []>} : vector<24x4xf32>, vector<4x2xf32>, vector<24x2xf32> -> vector<24x2xf32>
    %10 = vector.broadcast %1 : vector<1x2xf32> to vector<24x2xf32>
    %11 = arith.addf %9, %10 : vector<24x2xf32>
    %cst_14 = arith.constant 0.000000e+00 : f32
    %12 = vector.broadcast %cst_14 : f32 to vector<24x1xf32>
    %13 = arith.cmpf ogt, %8, %12 : vector<24x1xf32>
    %cst_15 = arith.constant 0.000000e+00 : f32
    %14 = vector.broadcast %cst_15 : f32 to vector<24x2xf32>
    %15 = arith.cmpf ogt, %11, %14 : vector<24x2xf32>
    %cst_16 = arith.constant 1.000000e-01 : f32
    %16 = vector.broadcast %cst_16 : f32 to vector<24x2xf32>
    %17 = arith.mulf %16, %11 : vector<24x2xf32>
    %18 = arith.select %15, %11, %17 : vector<24x2xi1>, vector<24x2xf32>
    %cst_17 = arith.constant 0.000000e+00 : f32
    %19 = vector.shape_cast %13 : vector<24x1xi1> to vector<24x1xi1>
    %20 = vector.broadcast %19 : vector<24x1xi1> to vector<24x2xi1>
    %21 = vector.broadcast %cst_17 : f32 to vector<24x2xf32>
    %22 = arith.select %20, %18, %21 : vector<24x2xi1>, vector<24x2xf32>
    %c24 = arith.constant 24 : index
    %c0_18 = arith.constant 0 : index
    %23 = vector.load %arg13[%c24, %c0_18] : memref<288x2xf32, #tpu.memory_space<vmem>>, vector<24x2xf32>
    tpu.vector_store %arg13[%c24, %c0_18], %22 {strides = array<i32>} : memref<288x2xf32, #tpu.memory_space<vmem>>, vector<24x2xf32>,
    %c0_19 = arith.constant 0 : index
    %c0_20 = arith.constant 0 : index
    %c0_21 = arith.constant 0 : index
    %24 = vector.load %arg2[%c0_19, %c0_20, %c0_21] : memref<1x192x4xf32, #tpu.memory_space<vmem>>, vector<1x192x4xf32>
    %25 = vector.shape_cast %24 : vector<1x192x4xf32> to vector<192x4xf32>
    %c0_22 = arith.constant 0 : index
    %c0_23 = arith.constant 0 : index
    %26 = vector.load %arg5[%c0_22, %c0_23] : memref<192x1xf32, #tpu.memory_space<vmem>>, vector<192x1xf32>
    %cst_24 = arith.constant dense<0.000000e+00> : vector<192x2xf32>
    %27 = tpu.matmul %25, %0, %cst_24 {dimension_numbers = #tpu.dot_dimension_numbers<[1], [0], [0], [1], [0, 0, 1, 1], [], []>} : vector<192x4xf32>, vector<4x2xf32>, vector<192x2xf32> -> vector<192x2xf32>
    %28 = vector.broadcast %1 : vector<1x2xf32> to vector<192x2xf32>
    %29 = arith.addf %27, %28 : vector<192x2xf32>
    %cst_25 = arith.constant 0.000000e+00 : f32
    %30 = vector.broadcast %cst_25 : f32 to vector<192x1xf32>
    %31 = arith.cmpf ogt, %26, %30 : vector<192x1xf32>
    %cst_26 = arith.constant 0.000000e+00 : f32
    %32 = vector.broadcast %cst_26 : f32 to vector<192x2xf32>
    %33 = arith.cmpf ogt, %29, %32 : vector<192x2xf32>
    %cst_27 = arith.constant 1.000000e-01 : f32
    %34 = vector.broadcast %cst_27 : f32 to vector<192x2xf32>
    %35 = arith.mulf %34, %29 : vector<192x2xf32>
    %36 = arith.select %33, %29, %35 : vector<192x2xi1>, vector<192x2xf32>
    %cst_28 = arith.constant 0.000000e+00 : f32
    %37 = vector.shape_cast %31 : vector<192x1xi1> to vector<192x1xi1>
    %38 = vector.broadcast %37 : vector<192x1xi1> to vector<192x2xi1>
    %39 = vector.broadcast %cst_28 : f32 to vector<192x2xf32>
    %40 = arith.select %38, %36, %39 : vector<192x2xi1>, vector<192x2xf32>
    %c48 = arith.constant 48 : index
    %c0_29 = arith.constant 0 : index
    %41 = vector.load %arg13[%c48, %c0_29] : memref<288x2xf32, #tpu.memory_space<vmem>>, vector<192x2xf32>
    tpu.vector_store %arg13[%c48, %c0_29], %40 {strides = array<i32>} : memref<288x2xf32, #tpu.memory_space<vmem>>, vector<192x2xf32>,
    %c0_30 = arith.constant 0 : index
    %c0_31 = arith.constant 0 : index
    %c0_32 = arith.constant 0 : index
    %c0_33 = arith.constant 0 : index
    %42 = vector.load %arg4[%c0_30, %c0_31, %c0_32, %c0_33] : memref<1x1x24x4xf32, #tpu.memory_space<vmem>>, vector<1x1x24x4xf32>
    %43 = vector.shape_cast %42 : vector<1x1x24x4xf32> to vector<24x4xf32>
    %c0_34 = arith.constant 0 : index
    %c0_35 = arith.constant 0 : index
    %c0_36 = arith.constant 0 : index
    %44 = vector.load %arg7[%c0_34, %c0_35, %c0_36] : memref<1x24x1xf32, #tpu.memory_space<vmem>>, vector<1x24x1xf32>
    %45 = vector.shape_cast %44 : vector<1x24x1xf32> to vector<24x1xf32>
    %cst_37 = arith.constant dense<0.000000e+00> : vector<24x2xf32>
    %46 = tpu.matmul %43, %0, %cst_37 {dimension_numbers = #tpu.dot_dimension_numbers<[1], [0], [0], [1], [0, 0, 1, 1], [], []>} : vector<24x4xf32>, vector<4x2xf32>, vector<24x2xf32> -> vector<24x2xf32>
    %47 = vector.broadcast %1 : vector<1x2xf32> to vector<24x2xf32>
    %48 = arith.addf %46, %47 : vector<24x2xf32>
    %cst_38 = arith.constant 0.000000e+00 : f32
    %49 = vector.broadcast %cst_38 : f32 to vector<24x1xf32>
    %50 = arith.cmpf ogt, %45, %49 : vector<24x1xf32>
    %cst_39 = arith.constant 0.000000e+00 : f32
    %51 = vector.broadcast %cst_39 : f32 to vector<24x2xf32>
    %52 = arith.cmpf ogt, %48, %51 : vector<24x2xf32>
    %cst_40 = arith.constant 1.000000e-01 : f32
    %53 = vector.broadcast %cst_40 : f32 to vector<24x2xf32>
    %54 = arith.mulf %53, %48 : vector<24x2xf32>
    %55 = arith.select %52, %48, %54 : vector<24x2xi1>, vector<24x2xf32>
    %cst_41 = arith.constant 0.000000e+00 : f32
    %56 = vector.shape_cast %50 : vector<24x1xi1> to vector<24x1xi1>
    %57 = vector.broadcast %56 : vector<24x1xi1> to vector<24x2xi1>
    %58 = vector.broadcast %cst_41 : f32 to vector<24x2xf32>
    %59 = arith.select %57, %55, %58 : vector<24x2xi1>, vector<24x2xf32>
    %c240 = arith.constant 240 : index
    %c0_42 = arith.constant 0 : index
    %60 = vector.load %arg13[%c240, %c0_42] : memref<288x2xf32, #tpu.memory_space<vmem>>, vector<24x2xf32>
    tpu.vector_store %arg13[%c240, %c0_42], %59 {strides = array<i32>} : memref<288x2xf32, #tpu.memory_space<vmem>>, vector<24x2xf32>,
    %c0_43 = arith.constant 0 : index
    %c0_44 = arith.constant 0 : index
    %61 = vector.load %arg11[%c0_43, %c0_44] : memref<1x4xf32, #tpu.memory_space<vmem>>, vector<1x4xf32>
    %62 = vector.shape_cast %61 : vector<1x4xf32> to vector<1x4xf32>
    %63 = vector.broadcast %62 : vector<1x4xf32> to vector<192x4xf32>
    %c0_45 = arith.constant 0 : index
    %c0_46 = arith.constant 0 : index
    %64 = vector.load %arg14[%c0_45, %c0_46] : memref<192x4xf32, #tpu.memory_space<vmem>>, vector<192x4xf32>
    tpu.vector_store %arg14[%c0_45, %c0_46], %63 {strides = array<i32>} : memref<192x4xf32, #tpu.memory_space<vmem>>, vector<192x4xf32>,
    %c23 = arith.constant 23 : index
    %c0_47 = arith.constant 0 : index
    %65 = vector.load %arg13[%c23, %c0_47] : memref<288x2xf32, #tpu.memory_space<vmem>>, vector<192x2xf32>
    %c24_48 = arith.constant 24 : index
    %c0_49 = arith.constant 0 : index
    %66 = vector.load %arg13[%c24_48, %c0_49] : memref<288x2xf32, #tpu.memory_space<vmem>>, vector<192x2xf32>
    %c25 = arith.constant 25 : index
    %c0_50 = arith.constant 0 : index
    %67 = vector.load %arg13[%c25, %c0_50] : memref<288x2xf32, #tpu.memory_space<vmem>>, vector<192x2xf32>
    %68 = tpu.concatenate %65, %66, %67 in 1 : vector<192x2xf32>, vector<192x2xf32>, vector<192x2xf32> -> vector<192x6xf32>
    %c0_51 = arith.constant 0 : index
    %c0_52 = arith.constant 0 : index
    %69 = vector.load %arg14[%c0_51, %c0_52] : memref<192x4xf32, #tpu.memory_space<vmem>>, vector<192x4xf32>
    %c0_53 = arith.constant 0 : index
    %c0_54 = arith.constant 0 : index
    %c0_55 = arith.constant 0 : index
    %70 = vector.load %arg10[%c0_53, %c0_54, %c0_55] : memref<3x6x4xf32, #tpu.memory_space<vmem>>, vector<1x6x4xf32>
    %71 = vector.shape_cast %70 : vector<1x6x4xf32> to vector<6x4xf32>
    %cst_56 = arith.constant dense<0.000000e+00> : vector<192x4xf32>
    %72 = tpu.matmul %68, %71, %cst_56 {dimension_numbers = #tpu.dot_dimension_numbers<[1], [0], [0], [1], [0, 0, 1, 1], [], []>} : vector<192x6xf32>, vector<6x4xf32>, vector<192x4xf32> -> vector<192x4xf32>
    %73 = arith.addf %69, %72 : vector<192x4xf32>
    %c0_57 = arith.constant 0 : index
    %c0_58 = arith.constant 0 : index
    %74 = vector.load %arg14[%c0_57, %c0_58] : memref<192x4xf32, #tpu.memory_space<vmem>>, vector<192x4xf32>
    tpu.vector_store %arg14[%c0_57, %c0_58], %73 {strides = array<i32>} : memref<192x4xf32, #tpu.memory_space<vmem>>, vector<192x4xf32>,
    %c47 = arith.constant 47 : index
    %c0_59 = arith.constant 0 : index
    %75 = vector.load %arg13[%c47, %c0_59] : memref<288x2xf32, #tpu.memory_space<vmem>>, vector<192x2xf32>
    %c48_60 = arith.constant 48 : index
    %c0_61 = arith.constant 0 : index
    %76 = vector.load %arg13[%c48_60, %c0_61] : memref<288x2xf32, #tpu.memory_space<vmem>>, vector<192x2xf32>
    %c49 = arith.constant 49 : index
    %c0_62 = arith.constant 0 : index
    %77 = vector.load %arg13[%c49, %c0_62] : memref<288x2xf32, #tpu.memory_space<vmem>>, vector<192x2xf32>
    %78 = tpu.concatenate %75, %76, %77 in 1 : vector<192x2xf32>, vector<192x2xf32>, vector<192x2xf32> -> vector<192x6xf32>
    %c0_63 = arith.constant 0 : index
    %c0_64 = arith.constant 0 : index
    %79 = vector.load %arg14[%c0_63, %c0_64] : memref<192x4xf32, #tpu.memory_space<vmem>>, vector<192x4xf32>
    %c1 = arith.constant 1 : index
    %c0_65 = arith.constant 0 : index
    %c0_66 = arith.constant 0 : index
    %80 = vector.load %arg10[%c1, %c0_65, %c0_66] : memref<3x6x4xf32, #tpu.memory_space<vmem>>, vector<1x6x4xf32>
    %81 = vector.shape_cast %80 : vector<1x6x4xf32> to vector<6x4xf32>
    %cst_67 = arith.constant dense<0.000000e+00> : vector<192x4xf32>
    %82 = tpu.matmul %78, %81, %cst_67 {dimension_numbers = #tpu.dot_dimension_numbers<[1], [0], [0], [1], [0, 0, 1, 1], [], []>} : vector<192x6xf32>, vector<6x4xf32>, vector<192x4xf32> -> vector<192x4xf32>
    %83 = arith.addf %79, %82 : vector<192x4xf32>
    %c0_68 = arith.constant 0 : index
    %c0_69 = arith.constant 0 : index
    %84 = vector.load %arg14[%c0_68, %c0_69] : memref<192x4xf32, #tpu.memory_space<vmem>>, vector<192x4xf32>
    tpu.vector_store %arg14[%c0_68, %c0_69], %83 {strides = array<i32>} : memref<192x4xf32, #tpu.memory_space<vmem>>, vector<192x4xf32>,
    %c71 = arith.constant 71 : index
    %c0_70 = arith.constant 0 : index
    %85 = vector.load %arg13[%c71, %c0_70] : memref<288x2xf32, #tpu.memory_space<vmem>>, vector<192x2xf32>
    %c72 = arith.constant 72 : index
    %c0_71 = arith.constant 0 : index
    %86 = vector.load %arg13[%c72, %c0_71] : memref<288x2xf32, #tpu.memory_space<vmem>>, vector<192x2xf32>
    %c73 = arith.constant 73 : index
    %c0_72 = arith.constant 0 : index
    %87 = vector.load %arg13[%c73, %c0_72] : memref<288x2xf32, #tpu.memory_space<vmem>>, vector<192x2xf32>
    %88 = tpu.concatenate %85, %86, %87 in 1 : vector<192x2xf32>, vector<192x2xf32>, vector<192x2xf32> -> vector<192x6xf32>
    %c0_73 = arith.constant 0 : index
    %c0_74 = arith.constant 0 : index
    %89 = vector.load %arg14[%c0_73, %c0_74] : memref<192x4xf32, #tpu.memory_space<vmem>>, vector<192x4xf32>
    %c2 = arith.constant 2 : index
    %c0_75 = arith.constant 0 : index
    %c0_76 = arith.constant 0 : index
    %90 = vector.load %arg10[%c2, %c0_75, %c0_76] : memref<3x6x4xf32, #tpu.memory_space<vmem>>, vector<1x6x4xf32>
    %91 = vector.shape_cast %90 : vector<1x6x4xf32> to vector<6x4xf32>
    %cst_77 = arith.constant dense<0.000000e+00> : vector<192x4xf32>
    %92 = tpu.matmul %88, %91, %cst_77 {dimension_numbers = #tpu.dot_dimension_numbers<[1], [0], [0], [1], [0, 0, 1, 1], [], []>} : vector<192x6xf32>, vector<6x4xf32>, vector<192x4xf32> -> vector<192x4xf32>
    %93 = arith.addf %89, %92 : vector<192x4xf32>
    %c0_78 = arith.constant 0 : index
    %c0_79 = arith.constant 0 : index
    %94 = vector.load %arg14[%c0_78, %c0_79] : memref<192x4xf32, #tpu.memory_space<vmem>>, vector<192x4xf32>
    tpu.vector_store %arg14[%c0_78, %c0_79], %93 {strides = array<i32>} : memref<192x4xf32, #tpu.memory_space<vmem>>, vector<192x4xf32>,
    %c0_80 = arith.constant 0 : index
    %c0_81 = arith.constant 0 : index
    %95 = vector.load %arg14[%c0_80, %c0_81] : memref<192x4xf32, #tpu.memory_space<vmem>>, vector<192x4xf32>
    %c0_82 = arith.constant 0 : index
    %c0_83 = arith.constant 0 : index
    %c0_84 = arith.constant 0 : index
    %96 = vector.load %arg2[%c0_82, %c0_83, %c0_84] : memref<1x192x4xf32, #tpu.memory_space<vmem>>, vector<1x192x4xf32>
    %97 = vector.shape_cast %96 : vector<1x192x4xf32> to vector<192x4xf32>
    %cst_85 = arith.constant 0.000000e+00 : f32
    %98 = vector.broadcast %cst_85 : f32 to vector<192x4xf32>
    %99 = arith.cmpf ogt, %95, %98 : vector<192x4xf32>
    %cst_86 = arith.constant 1.000000e-01 : f32
    %100 = vector.broadcast %cst_86 : f32 to vector<192x4xf32>
    %101 = arith.mulf %100, %95 : vector<192x4xf32>
    %102 = arith.select %99, %95, %101 : vector<192x4xi1>, vector<192x4xf32>
    %103 = arith.addf %97, %102 : vector<192x4xf32>
    %c0_87 = arith.constant 0 : index
    %c0_88 = arith.constant 0 : index
    %c0_89 = arith.constant 0 : index
    %104 = vector.load %arg12[%c0_87, %c0_88, %c0_89] : memref<1x192x4xf32, #tpu.memory_space<vmem>>, vector<1x192x4xf32>
    %105 = vector.shape_cast %104 : vector<1x192x4xf32> to vector<192x4xf32>
    %106 = vector.shape_cast %103 : vector<192x4xf32> to vector<1x192x4xf32>
    tpu.vector_store %arg12[%c0_87, %c0_88, %c0_89], %106 {strides = array<i32>} : memref<1x192x4xf32, #tpu.memory_space<vmem>>, vector<1x192x4xf32>,
    return
  }
  func.func @transform_0(%arg0: i32, %arg1: i32) -> (i32, i32, i32) {
    %c0_i32 = arith.constant 0 : i32
    %c0_i32_0 = arith.constant 0 : i32
    return %arg0, %arg1, %c0_i32 : i32, i32, i32
  }
  func.func @transform_1(%arg0: i32, %arg1: i32) -> (i32, i32, i32, i32) {
    %c0_i32 = arith.constant 0 : i32
    %c0_i32_0 = arith.constant 0 : i32
    %c0_i32_1 = arith.constant 0 : i32
    return %arg0, %arg1, %c0_i32, %c0_i32_0 : i32, i32, i32, i32
  }
  func.func @transform_2(%arg0: i32, %arg1: i32) -> (i32, i32, i32, i32) {
    %c0_i32 = arith.constant 0 : i32
    %c0_i32_0 = arith.constant 0 : i32
    %c0_i32_1 = arith.constant 0 : i32
    return %arg0, %arg1, %c0_i32, %c0_i32_0 : i32, i32, i32, i32
  }
  func.func @transform_3(%arg0: i32, %arg1: i32) -> (i32, i32) {
    %c0_i32 = arith.constant 0 : i32
    %c0_i32_0 = arith.constant 0 : i32
    return %arg1, %c0_i32 : i32, i32
  }
  func.func @transform_4(%arg0: i32, %arg1: i32) -> (i32, i32, i32) {
    %c0_i32 = arith.constant 0 : i32
    %c0_i32_0 = arith.constant 0 : i32
    %c0_i32_1 = arith.constant 0 : i32
    return %arg1, %c0_i32, %c0_i32_0 : i32, i32, i32
  }
  func.func @transform_5(%arg0: i32, %arg1: i32) -> (i32, i32, i32) {
    %c0_i32 = arith.constant 0 : i32
    %c0_i32_0 = arith.constant 0 : i32
    %c0_i32_1 = arith.constant 0 : i32
    return %arg1, %c0_i32, %c0_i32_0 : i32, i32, i32
  }
  func.func @transform_6(%arg0: i32, %arg1: i32) -> (i32, i32) {
    %c0_i32 = arith.constant 0 : i32
    %c0_i32_0 = arith.constant 0 : i32
    %c0_i32_1 = arith.constant 0 : i32
    return %c0_i32, %c0_i32_0 : i32, i32
  }
  func.func @transform_7(%arg0: i32, %arg1: i32) -> (i32, i32) {
    %c0_i32 = arith.constant 0 : i32
    %c0_i32_0 = arith.constant 0 : i32
    %c0_i32_1 = arith.constant 0 : i32
    return %c0_i32, %c0_i32_0 : i32, i32
  }
  func.func @transform_8(%arg0: i32, %arg1: i32) -> (i32, i32, i32) {
    %c0_i32 = arith.constant 0 : i32
    %c0_i32_0 = arith.constant 0 : i32
    %c0_i32_1 = arith.constant 0 : i32
    %c0_i32_2 = arith.constant 0 : i32
    return %c0_i32, %c0_i32_0, %c0_i32_1 : i32, i32, i32
  }
  func.func @transform_9(%arg0: i32, %arg1: i32) -> (i32, i32) {
    %c0_i32 = arith.constant 0 : i32
    %c0_i32_0 = arith.constant 0 : i32
    %c0_i32_1 = arith.constant 0 : i32
    return %c0_i32, %c0_i32_0 : i32, i32
  }
  func.func @transform_10(%arg0: i32, %arg1: i32) -> (i32, i32, i32) {
    %c0_i32 = arith.constant 0 : i32
    %c0_i32_0 = arith.constant 0 : i32
    return %arg0, %arg1, %c0_i32 : i32, i32, i32
  }
}

</mosaic_0001>

<bundles_post_ra>
// kernel: tpu_custom_call.1
= control target key start
LH: loop header
LB: loop body
LE: loop exit
PB: predicated region body
PF: predicated region fallthrough
CT: control target
= control target key end

     0   :  { %s6582_s0 = inlined_call_operand.hbm [shape: f32[2,384,4], index: 0, kind: input, shape index: {}]   ;;  %s6583_s1 = inlined_call_operand.hbm [shape: f32[2,2,24,4], index: 1, kind: input, shape index: {}]   ;;  %s6584_s2 = inlined_call_operand.hbm [shape: f32[2,2,24,4], index: 2, kind: input, shape index: {}]   ;;  %s6585_s3 = inlined_call_operand.hbm [shape: f32[384,1], index: 3, kind: input, shape index: {}]   ;;  %s6586_s4 = inlined_call_operand.hbm [shape: f32[2,24,1], index: 4, kind: input, shape index: {}]   ;;  %s6587_s5 = inlined_call_operand.hbm [shape: f32[2,24,1], index: 5, kind: input, shape index: {}]   ;;  %s6588_s6 = inlined_call_operand.hbm [shape: f32[4,2], index: 6, kind: input, shape index: {}]   ;;  %s6589_s7 = inlined_call_operand.hbm [shape: f32[1,2], index: 7, kind: input, shape index: {}]   ;;  %s6590_s8 = inlined_call_operand.hbm [shape: f32[3,6,4], index: 8, kind: input, shape index: {}]   ;;  %s6591_s9 = inlined_call_operand.hbm [shape: f32[1,4], index: 9, kind: input, shape index: {}]   ;;  %s6592_s10 = inlined_call_operand.hbm [shape: f32[2,384,4], index: 10, kind: output, shape index: {}]  }
   0x1   :  { %6644 = sst [smem:[#allocation48_spill]] %s6582_s0 }
   0x2   :  { %6645 = sst [smem:[#allocation49_spill]] %s6583_s1 }
   0x3   :  { %6646 = sst [smem:[#allocation50_spill]] %s6585_s3 }
   0x4   :  { %6647 = sst [smem:[#allocation51_spill]] %s6586_s4 }
   0x5   :  { %6648 = sst [smem:[#allocation52_spill]] %s6587_s5 }
   0x6   :  { %6649 = sst [smem:[#allocation53_spill]] %s6588_s6 }
   0x7   :  { %6650 = sst [smem:[#allocation54_spill]] %s6589_s7 }
   0x8   :  { %6651 = sst [smem:[#allocation55_spill]] %s6590_s8 }
   0x9   :  { %6652 = sst [smem:[#allocation56_spill]] %s6591_s9 }
   0xa   :  { %6653 = sst [smem:[#allocation57_spill]] %s6592_s10 }
   0xb   :  { %15 = vsyncpa [#allocation5], 0 }
   0xc   :  { %17 = vsyncpa [#allocation5 + $0x1], 0 }
   0xd   :  { %18 = vsyncpa [#allocation8], 0 }
   0xe   :  { %20 = vsyncpa [#allocation8 + $0x1], 0 }
   0xf   :  { %21 = vsyncpa [#allocation11], 0 }
  0x10   :  { %23 = vsyncpa [#allocation11 + $0x1], 0 }
  0x11   :  { %24 = vsyncpa [#allocation14], 0 }
  0x12   :  { %26 = vsyncpa [#allocation14 + $0x1], 0 }
  0x13   :  { %27 = vsyncpa [#allocation17], 0 }
  0x14   :  { %28 = vsyncpa [#allocation20], 0 }
  0x15   :  { %29 = vsyncpa [#allocation6], 0 }
  0x16   :  { %31 = vsyncpa [#allocation6 + $0x1], 0  ;;  %s5022_s13 = smov 0   ;;  %s5024_s14 = smov 0  }
  0x17   :  { %s5026_s15 = smov 0   ;;  %s5028_s16 = smov 0  }
  0x18   :  { %s5030_s17 = smov 0   ;;  %s5032_s18 = smov 0  }
  0x19   :  { %s5034_s19 = smov 0   ;;  %s5036_s20 = smov 0  }
  0x1a   :  { %s5038_s21 = smov 0   ;;  %s5040_s22 = smov 0  }
  0x1b   :  { %s5042_s23 = smov 0  }
  0x1c LB: > { %6654 = sst [smem:[#allocation30_spill]] %s4909_s14  ;;  %s5078_s24 = sadd.s32 4294967295, %s4945_s23   ;;  %s4945_s23 = sphi %s5042_s23, %s37_s23   ;;  %s4941_s22 = sphi %s5040_s22, %s6746_s22   ;;  %s4937_s21 = sphi %s5038_s21, %s6745_s21   ;;  %s4933_s20 = sphi %s5036_s20, %s6744_s20   ;;  %s4929_s19 = sphi %s5034_s19, %s6743_s19   ;;  %s4925_s18 = sphi %s5032_s18, %s6740_s18   ;;  %s4921_s17 = sphi %s5030_s17, %s6739_s17   ;;  %s4917_s16 = sphi %s5028_s16, %s6738_s16   ;;  %s4913_s15 = sphi %s5026_s15, %s6737_s15   ;;  %s4909_s14 = sphi %s5024_s14, %s6736_s14   ;;  %s4905_s13 = sphi %s5022_s13, %s6735_s13  }
  0x1d   : > { %6655 = sst [smem:[#allocation31_spill]] %s4913_s15  ;;  %s3896_s25 = sadd.s32 4294967294, %s4945_s23  }
  0x1e   : > { %6656 = sst [smem:[#allocation32_spill]] %s4917_s16  ;;  %p71_p0 = scmp.ne.s32.totalorder %s4921_s17, %s4917_s16 }
  0x1f   : > { %6657 = sst [smem:[#allocation33_spill]] %s4921_s17  ;;  %p6598_p1 = scmp.eq.s32.totalorder %s5078_s24, 0 }
  0x20   : > { %6658 = sst [smem:[#allocation34_spill]] %s4925_s18  ;;  %p321_p3 = scmp.eq.s32.totalorder %s3896_s25, 3 }
  0x21   : > { %6659 = sst [smem:[#allocation35_spill]] %s4929_s19  ;;  %p5087_p4 = por %p6598_p1, %p71_p0 }
  0x22   : > { %6660 = sst [smem:[#allocation36_spill]] %s4933_s20  ;;  %p3897_p5 = scmp.ge.s32.totalorder %s4945_s23, 1 }
  0x23   : > { %6661 = sst [smem:[#allocation37_spill]] %s4945_s23  ;;  %p5092_p6 = por %p321_p3, %p71_p0 }
  0x24   : > { %s6662_s26 = scalar_select %p5087_p4, 1, 0 }
  0x25   : > { %s6664_s27 = scalar_select %p5092_p6, 1, 0 }
  0x26   : > { %6663 = sst [smem:[#allocation38_spill]] %s6662_s26  ;;  %p328_p7 = scmp.lt.s32.totalorder %s4945_s23, 5 }
  0x27   : > { %6665 = sst [smem:[#allocation39_spill]] %s6664_s27  ;;  %s4947_s29 = smov [#allocation15]  }
  0x28   : > { %p5097_p8 = pnand %p3897_p5, %p328_p7  ;;  %s341_s30 = sshll.u32 %s4947_s29, 4  ;;  %s342_s30 = int_to_ptr.vmem [resolvable:$true] %s341_s30 }
  0x29   : > { %s4948_s11 = smov [#allocation16]   ;;  %s6670_s6 = sld [smem:[#allocation53_spill]] }
  0x2a   : > { %s6666_s28 = scalar_select %p5097_p8, 1, 0 }
  0x2b   : > { %p4358_p9 = pneg %p5097_p8  ;;  %s352_s12 = sshll.u32 %s4948_s11, 4  ;;  %s5109_s12 = int_to_ptr.vmem [resolvable:$true] %s352_s12 }
  0x2c   : > { %6667 = sst [smem:[#allocation40_spill]] %s6666_s28 }
  0x2d   : > { %p5105_p10 = pnand %p4358_p9, %p6598_p1 }
  0x2f   : > { %s6668_s25 = scalar_select %p5105_p10, 1, 0 }
  0x30   : > { %s4507_s10 = scalar_lea.hbm %s6670_s6, 64  ;;  %p5119_p12 = pneg %p5105_p10 }
  0x31   : > { %6669 = sst [smem:[#allocation41_spill]] %s6668_s25  ;;  %p4508_p11 = scmp.ne.s32.totalorder %s6670_s6, %s4507_s10 }
  0x32   : > { %s6671_s29 = scalar_select %p5119_p12, 1, 0 }
  0x33   : > { %p4510_p13 = pnand %p5119_p12, %p4508_p11  ;;  %p4514_p3 = scmp.lt.u32.totalorder %s4507_s10, %s6670_s6 }
  0x35   : > { %p4511_p0 = pneg %p4510_p13 }
  0x37   : > { %p4516_p5 = pnand %p4514_p3, %p4511_p0 }
  0x39   : > { %4519 = shalt.err (!%p4516_p5)
}
  0x3a   : > { %s4520_s16 = scalar_lea.vmem %s342_s30, 64  ;;  %p4528_p2 = scmp.lt.s32.totalorder %s342_s30, %s342_s30 }
  0x3b   : > { %p4521_p7 = scmp.ne.s32.totalorder %s342_s30, %s4520_s16  ;;  %p4529_p6 = scmp.lt.s32.totalorder %s4520_s16, %s4520_s16 }
  0x3d   : > { %p4523_p9 = pnand %p4521_p7, %p5119_p12  ;;  %p4530_p4 = por %p4529_p6, %p4528_p2 }
  0x3f   : > { %p4524_p1 = pneg %p4523_p9 }
  0x41   : > { %p4531_p8 = pnand %p4530_p4, %p4524_p1 }
  0x43   : > { %4534 = shalt.err (!%p4531_p8)
}
  0x44   : > { %4361 = dma.hbm_to_vmem [thread:$0]  (!%p5105_p10), %s6670_s6, 64, %s342_s30, [#allocation14]  }
  0x45   : > { %s6672_s7 = sld [smem:[#allocation54_spill]] }
  0x4b   : > { %s4535_s27 = scalar_lea.hbm %s6672_s7, 16 }
  0x4c   : > { %p4536_p11 = scmp.ne.s32.totalorder %s6672_s7, %s4535_s27  ;;  %p4542_p1 = scmp.lt.u32.totalorder %s4535_s27, %s6672_s7 }
  0x4e   : > { %p4538_p13 = pnand %p4536_p11, %p5119_p12 }
  0x50   : > { %p4539_p2 = pneg %p4538_p13 }
  0x52   : > { %p4544_p4 = pnand %p4542_p1, %p4539_p2 }
  0x54   : > { %4547 = shalt.err (!%p4544_p4)
}
  0x55   : > { %s4548_s30 = scalar_lea.vmem %s5109_s12, 16  ;;  %s4555_s28 = scalar_lea.vmem %s5109_s12, 32 }
  0x56   : > { %p4549_p6 = scmp.ne.s32.totalorder %s5109_s12, %s4548_s30  ;;  %p4556_p3 = scmp.lt.s32.totalorder %s5109_s12, %s5109_s12 }
  0x57   : > { %p4557_p5 = scmp.lt.s32.totalorder %s4555_s28, %s4548_s30 }
  0x58   : > { %p4551_p8 = pnand %p4549_p6, %p5119_p12 }
  0x59   : > { %p4558_p7 = por %p4557_p5, %p4556_p3 }
  0x5a   : > { %p4552_p0 = pneg %p4551_p8 }
  0x5c   : > { %p4559_p9 = pnand %p4558_p7, %p4552_p0 }
  0x5e   : > { %4562 = shalt.err (!%p4559_p9)
}
  0x5f   : > { %4364 = dma.hbm_to_vmem [thread:$0]  (!%p5105_p10), %s6672_s7, 16, %s5109_s12, [#allocation17]  }
  0x60   : > { %s46_s20 = sadd.s32 1, %s4937_s21  ;;  %s49_s10 = sadd.s32 1, %s4941_s22 }
  0x61   : > { %p47_p11 = scmp.ge.s32.totalorder %s46_s20, 2  ;;  %s58_s26 = sadd.s32 1, %s4925_s18 }
  0x62   : > { %p65_p13 = scmp.ne.s32.totalorder %s4925_s18, %s4921_s17  ;;  %p6615_p2 = scmp.eq.s32.totalorder %s4945_s23, 0 }
  0x63   : > { %s6748_s20 = smov (%p47_p11, %s46_s20), 0  ;;  %s6750_s10 = smov (!%p47_p11, %s49_s10), %s4941_s22 }
  0x64   : > { %6673 = sst [smem:[#allocation42_spill]] %s6748_s20  ;;  %s5170_s27 = ssub.s32 %s4937_s21, %s6748_s20 }
  0x65   : > { %p67_p1 = por %p6615_p2, %p65_p13  ;;  %p51_p4 = scmp.ge.s32.totalorder %s6750_s10, 2 }
  0x66   : > { %p6674_p6 = scmp.eq.s32.totalorder %s5078_s24, 3  ;;  %p6614_p0 = scmp.lt.s32.totalorder %s4945_s23, 4 }
  0x67   : > { %s6752_s10 = smov (%p51_p4, %s6750_s10), 0  ;;  %s5184_s11 = sand.u32 1, %s4925_s18  }
  0x68   : > { %p5176_p8 = por %p6674_p6, %p65_p13  ;;  %6677 = sst [smem:[#allocation44_spill]] %s6752_s10 }
  0x69   : > { %s53_s16 = ssub.s32 %s4941_s22, %s6752_s10  ;;  %s5189_s30 = sand.u32 1, %s4945_s23  }
  0x6a   : > { %s6675_s12 = scalar_select %p5176_p8, 1, 0 }
  0x6b   : > { %s55_s28 = sor.u32 %s5170_s27, %s53_s16  ;;  %p5194_p3 = pnand %p6614_p0, %p67_p1 }
  0x6c   : > { %6676 = sst [smem:[#allocation43_spill]] %s6675_s12  ;;  %p56_p5 = scmp.eq.s32.totalorder %s55_s28, 0 }
  0x6d   : > { %s6678_s5 = scalar_select %p5194_p3, 1, 0 }
  0x6e   : > { %s6622_s19 = smul.u32 24, %s5184_s11  ;;  %s6680_s1 = sld [smem:[#allocation49_spill]] }
  0x6f   : > { %s5200_s6 = scalar_select %p56_p5, %s4925_s18, %s58_s26  }
  0x70   : > { %s4313_s7 = smul.u32 3, %s4937_s21  ;;  %s414_s12 = scalar_lea.vmem [#allocation7], %s6622_s19 }
  0x71   : > { %6679 = sst [smem:[#allocation45_spill]] %s5200_s6  ;;  %s4314_s20 = smul.u32 6, %s4941_s22 }
  0x72   : > { %s423_s17 = sshll.u32 %s414_s12, 4  ;;  %s6621_s28 = scalar_lea.sflag [#allocation8], %s5189_s30  ;;  %s5206_s17 = int_to_ptr.vmem [resolvable:$true] %s423_s17 }
  0x73   : > { %s420_s10 = sadd.s32 %s4314_s20, %s4313_s7  ;;  %p5223_p9 = pneg %p5194_p3 }
  0x74   : > { %s3904_s4 = sshll.u32 %s420_s10, 7  ;;  %s4568_s25 = scalar_lea.hbm %s6680_s1, 1536 }
  0x75   : > { %s5211_s9 = scalar_lea.hbm %s6680_s1, %s3904_s4  ;;  %s5216_s26 = scalar_lea.hbm %s6584_s2, %s3904_s4 }
  0x76   : > { %s4563_s12 = scalar_lea.hbm %s5211_s9, 384  ;;  %p4569_p1 = scmp.lt.u32.totalorder %s5211_s9, %s6680_s1 }
  0x77   : > { %p4564_p7 = scmp.ne.s32.totalorder %s5211_s9, %s4563_s12  ;;  %p4570_p4 = scmp.lt.u32.totalorder %s4568_s25, %s4563_s12 }
  0x78   : > { %s6681_s7 = scalar_select %p5223_p9, 1, 0 }
  0x79   : > { %p4566_p11 = pnand %p5223_p9, %p4564_p7  ;;  %p4571_p6 = por %p4570_p4, %p4569_p1 }
  0x7a   : > { %p4572_p5 = scmp.lt.u32.totalorder %s4563_s12, %s5211_s9 }
  0x7b   : > { %p4567_p13 = pneg %p4566_p11 }
  0x7c   : > { %p4573_p0 = por %p4572_p5, %p4571_p6 }
  0x7e   : > { %p4574_p2 = pnand %p4573_p0, %p4567_p13 }
  0x80   : > { %4577 = shalt.err (!%p4574_p2)
}
  0x81   : > { %s4578_s4 = scalar_lea.vmem %s5206_s17, 384  ;;  %s4949_s16 = smov [#allocation7]  }
  0x82   : > { %p4579_p7 = scmp.ne.s32.totalorder %s5206_s17, %s4578_s4  ;;  %s4583_s0 = sshll.u32 %s4949_s16, 4  ;;  %s4584_s0 = int_to_ptr.vmem [resolvable:$false] %s4583_s0 }
  0x83   : > { %s4585_s8 = scalar_lea.vmem %s4584_s0, 768  ;;  %p4586_p10 = scmp.lt.s32.totalorder %s5206_s17, %s4584_s0 }
  0x84   : > { %p4581_p11 = pnand %p4579_p7, %p5223_p9  ;;  %p4587_p12 = scmp.lt.s32.totalorder %s4585_s8, %s4578_s4 }
  0x86   : > { %p4582_p8 = pneg %p4581_p11  ;;  %p4588_p1 = por %p4587_p12, %p4586_p10 }
  0x88   : > { %p4589_p4 = pnand %p4588_p1, %p4582_p8 }
  0x8a   : > { %4592 = shalt.err (!%p4589_p4)
}
  0x8b   : > { %s6623_s12 = smov 128   ;;  %s6625_s25 = smov 8  }
  0x8c   : > { %4377 = dma.hbm_to_vmem [thread:$0]  (!%p5194_p3), %s5211_s9, 384, %s5206_s17, %s6621_s28, %s6623_s12, %s6623_s12, %s6625_s25  }
  0x8d   : > { %p138_p10 = scmp.eq.s32.totalorder %s5170_s27, 0  ;;  %s140_s20 = sadd.s32 1, %s4913_s15 }
  0x8e   : > { %p147_p12 = scmp.ne.s32.totalorder %s4913_s15, %s4909_s14  ;;  %p6683_p2 = scmp.eq.s32.totalorder %s4945_s23, 0 }
  0x8f   : > { %s5256_s10 = scalar_select %p138_p10, %s4913_s15, %s140_s20  }
  0x90   : > { %p149_p8 = por %p147_p12, %p6683_p2  ;;  %p153_p0 = scmp.ne.s32.totalorder %s4909_s14, %s4905_s13 }
  0x91   : > { %6682 = sst [smem:[#allocation46_spill]] %s5256_s10  ;;  %s458_s4 = sand.u32 1, %s4913_s15  }
  0x92   : > { %p6684_p13 = scmp.eq.s32.totalorder %s5078_s24, 0  ;;  %s4318_s0 = smul.u32 192, %s458_s4 }
  0x93   : > { %s4027_s8 = smul.u32 3072, %s4937_s21  ;;  %p6687_p5 = scmp.lt.s32.totalorder %s4945_s23, 4 }
  0x94   : > { %p5265_p6 = por %p153_p0, %p6684_p13  ;;  %s5276_s17 = smul.u32 24, %s458_s4 }
  0x95   : > { %p5272_p7 = pnand %p6687_p5, %p149_p8  ;;  %s6689_s3 = sld [smem:[#allocation50_spill]] }
  0x96   : > { %s6685_s16 = scalar_select %p5265_p6, 1, 0 }
  0x97   : > { %s6688_s9 = scalar_select %p5272_p7, 1, 0 }
  0x98   : > { %6686 = sst [smem:[#allocation47_spill]] %s6685_s16  ;;  %s460_s28 = scalar_lea.vmem [#allocation10], %s4318_s0 }
  0x99   : > { %s467_s19 = sshll.u32 %s460_s28, 4  ;;  %p5290_p1 = pneg %p5272_p7  ;;  %s5283_s19 = int_to_ptr.vmem [resolvable:$true] %s467_s19 }
  0x9b   : > { %s5281_s13 = scalar_lea.hbm %s6689_s3, %s4027_s8  ;;  %s4598_s20 = scalar_lea.hbm %s6689_s3, 6144 }
  0x9c   : > { %s4593_s25 = scalar_lea.hbm %s5281_s13, 3072  ;;  %p4599_p12 = scmp.lt.u32.totalorder %s5281_s13, %s6689_s3 }
  0x9d   : > { %p4594_p11 = scmp.ne.s32.totalorder %s5281_s13, %s4593_s25  ;;  %p4600_p2 = scmp.lt.u32.totalorder %s4598_s20, %s4593_s25 }
  0x9e   : > { %s6690_s4 = scalar_select %p5290_p1, 1, 0 }
  0x9f   : > { %p4596_p4 = pnand %p5290_p1, %p4594_p11  ;;  %p4601_p8 = por %p4600_p2, %p4599_p12 }
  0xa0   : > { %p4602_p0 = scmp.lt.u32.totalorder %s4593_s25, %s5281_s13 }
  0xa1   : > { %p4597_p10 = pneg %p4596_p4 }
  0xa2   : > { %p4603_p13 = por %p4602_p0, %p4601_p8 }
  0xa4   : > { %p4604_p5 = pnand %p4603_p13, %p4597_p10 }
  0xa6   : > { %4607 = shalt.err (!%p4604_p5)
}
  0xa7   : > { %s4608_s12 = scalar_lea.vmem %s5283_s19, 3072  ;;  %s4952_s8 = smov [#allocation10]  }
  0xa8   : > { %p4609_p11 = scmp.ne.s32.totalorder %s5283_s19, %s4608_s12  ;;  %s4613_s27 = sshll.u32 %s4952_s8, 4  ;;  %s4614_s27 = int_to_ptr.vmem [resolvable:$false] %s4613_s27 }
  0xa9   : > { %s4615_s0 = scalar_lea.vmem %s4614_s27, 6144  ;;  %p4616_p3 = scmp.lt.s32.totalorder %s5283_s19, %s4614_s27 }
  0xaa   : > { %p4611_p4 = pnand %p4609_p11, %p5290_p1  ;;  %p4617_p9 = scmp.lt.s32.totalorder %s4615_s0, %s4608_s12 }
  0xac   : > { %p4612_p6 = pneg %p4611_p4  ;;  %p4618_p12 = por %p4617_p9, %p4616_p3 }
  0xae   : > { %p4619_p2 = pnand %p4618_p12, %p4612_p6 }
  0xb0   : > { %4622 = shalt.err (!%p4619_p2)
}
  0xb1   : > { %s6691_s25 = smov 8   ;;  %s6692_s20 = smov 128  }
  0xb2   : > { %s6693_s28 = scalar_lea.sflag [#allocation11], %s5189_s30  ;;  %s4953_s1 = smov [#allocation18]  }
  0xb3   : > { %4383 = dma.hbm_to_vmem [thread:$0]  (!%p5272_p7), %s5281_s13, 3072, %s5283_s19, %s6693_s28, %s6692_s20, %s6692_s20, %s6691_s25  }
  0xb4   : > { %s362_s8 = sshll.u32 %s4953_s1, 4  ;;  %s4954_s3 = smov [#allocation19]   ;;  %s363_s8 = int_to_ptr.vmem [resolvable:$true] %s362_s8 }
  0xb5   : > { %s376_s6 = sshll.u32 %s4954_s3, 4  ;;  %s6694_s0 = sld [smem:[#allocation55_spill]]  ;;  %s5318_s6 = int_to_ptr.vmem [resolvable:$true] %s376_s6 }
  0xb6   : > { %p6695_p9 = scmp.ne.s32.totalorder %s6671_s29, 0 }
  0xbb   : > { %s4623_s18 = scalar_lea.hbm %s6694_s0, 384 }
  0xbc   : > { %p4624_p3 = scmp.ne.s32.totalorder %s6694_s0, %s4623_s18  ;;  %p4630_p8 = scmp.lt.u32.totalorder %s4623_s18, %s6694_s0 }
  0xbe   : > { %p4626_p6 = pnand %p4624_p3, %p6695_p9 }
  0xc0   : > { %p4627_p10 = pneg %p4626_p6 }
  0xc2   : > { %p4632_p0 = pnand %p4630_p8, %p4627_p10 }
  0xc4   : > { %4635 = shalt.err (!%p4632_p0)
}
  0xc5   : > { %s4636_s1 = scalar_lea.vmem %s363_s8, 384  ;;  %p4644_p4 = scmp.lt.s32.totalorder %s363_s8, %s363_s8 }
  0xc6   : > { %p4637_p13 = scmp.ne.s32.totalorder %s363_s8, %s4636_s1  ;;  %p4645_p12 = scmp.lt.s32.totalorder %s4636_s1, %s4636_s1 }
  0xc8   : > { %p4639_p5 = pnand %p4637_p13, %p6695_p9  ;;  %p4646_p2 = por %p4645_p12, %p4644_p4 }
  0xca   : > { %p4640_p11 = pneg %p4639_p5 }
  0xcc   : > { %p4647_p7 = pnand %p4646_p2, %p4640_p11 }
  0xce   : > { %4650 = shalt.err (!%p4647_p7)
}
  0xcf   : > { %s6696_s3 = sld [smem:[#allocation41_spill]]  ;;  %s6698_s13 = sld [smem:[#allocation56_spill]] }
  0xd5   : > { %p6697_p3 = scmp.ne.s32.totalorder %s6696_s3, 0  ;;  %s6699_s28 = smov %s6698_s13 }
  0xd6   : > { %s4651_s12 = scalar_lea.hbm %s6698_s13, 16 }
  0xd7   : > { %4367 = dma.hbm_to_vmem [thread:$0]  (!%p6697_p3), %s6694_s0, 384, %s363_s8, [#allocation17], %s6692_s20, %s6692_s20, %s6691_s25  }
  0xd8   : > { %p4652_p6 = scmp.ne.s32.totalorder %s6699_s28, %s4651_s12  ;;  %p4658_p8 = scmp.lt.u32.totalorder %s4651_s12, %s6699_s28 }
  0xda   : > { %p4654_p7 = pnand %p4652_p6, %p6695_p9 }
  0xdc   : > { %p4655_p10 = pneg %p4654_p7 }
  0xde   : > { %p4660_p0 = pnand %p4658_p8, %p4655_p10 }
  0xe0   : > { %4663 = shalt.err (!%p4660_p0)
}
  0xe1   : > { %s4664_s8 = scalar_lea.vmem %s5318_s6, 16  ;;  %s4671_s15 = scalar_lea.vmem %s5318_s6, 32 }
  0xe2   : > { %p4665_p13 = scmp.ne.s32.totalorder %s5318_s6, %s4664_s8  ;;  %p4672_p4 = scmp.lt.s32.totalorder %s5318_s6, %s5318_s6 }
  0xe3   : > { %p4673_p12 = scmp.lt.s32.totalorder %s4671_s15, %s4664_s8 }
  0xe4   : > { %p4667_p5 = pnand %p4665_p13, %p6695_p9 }
  0xe5   : > { %p4674_p2 = por %p4673_p12, %p4672_p4 }
  0xe6   : > { %p4668_p11 = pneg %p4667_p5 }
  0xe8   : > { %p4675_p6 = pnand %p4674_p2, %p4668_p11 }
  0xea   : > { %4678 = shalt.err (!%p4675_p6)
}
  0xeb   : > { %4370 = dma.hbm_to_vmem [thread:$0]  (!%p6697_p3), %s6699_s28, 16, %s5318_s6, [#allocation20]  }
  0xec   : > { %s4310_s29 = smul.u32 192, %s5184_s11  ;;  %s6701_s18 = sld [smem:[#allocation48_spill]] }
  0xed   : > { %s392_s23 = smul.u32 24, %s4937_s21  ;;  %s388_s6 = scalar_lea.sflag [#allocation5], %s5184_s11 }
  0xee   : > { %s4311_s10 = smul.u32 48, %s4941_s22  ;;  %s391_s13 = scalar_lea.vmem [#allocation4], %s4310_s29 }
  0xef   : > { %s400_s12 = sshll.u32 %s391_s13, 4  ;;  %s6700_s27 = smul.u32 24, %s5184_s11  ;;  %s5370_s12 = int_to_ptr.vmem [resolvable:$true] %s400_s12 }
  0xf0   : > { %s397_s3 = sadd.s32 %s4311_s10, %s392_s23  ;;  %p6703_p3 = scmp.ne.s32.totalorder %s6681_s7, 0 }
  0xf1   : > { %s437_s19 = scalar_lea.vmem [#allocation9], %s6700_s27  ;;  %s3903_s8 = sshll.u32 %s397_s3, 7 }
  0xf2   : > { %s446_s1 = sshll.u32 %s437_s19, 4  ;;  %s6702_s0 = smov %s6701_s18  ;;  %s5372_s1 = int_to_ptr.vmem [resolvable:$true] %s446_s1 }
  0xf3   : > { %s5377_s14 = scalar_lea.hbm %s6701_s18, %s3903_s8  ;;  %s4684_s13 = scalar_lea.hbm %s6702_s0, 12288 }
  0xf4   : > { %s4679_s29 = scalar_lea.hbm %s5377_s14, 3072  ;;  %p4685_p8 = scmp.lt.u32.totalorder %s5377_s14, %s6702_s0 }
  0xf5   : > { %p4680_p9 = scmp.ne.s32.totalorder %s5377_s14, %s4679_s29  ;;  %p4686_p0 = scmp.lt.u32.totalorder %s4684_s13, %s4679_s29 }
  0xf6   : > { %p4688_p5 = scmp.lt.u32.totalorder %s4679_s29, %s5377_s14 }
  0xf7   : > { %p4682_p7 = pnand %p4680_p9, %p6703_p3  ;;  %p4687_p13 = por %p4686_p0, %p4685_p8 }
  0xf9   : > { %p4683_p10 = pneg %p4682_p7  ;;  %p4689_p11 = por %p4688_p5, %p4687_p13 }
  0xfb   : > { %p4690_p4 = pnand %p4689_p11, %p4683_p10 }
  0xfd   : > { %4693 = shalt.err (!%p4690_p4)
}
  0xfe   : > { %s4694_s3 = scalar_lea.vmem %s5370_s12, 3072  ;;  %s4955_s8 = smov [#allocation4]  }
  0xff   : > { %p4695_p12 = scmp.ne.s32.totalorder %s5370_s12, %s4694_s3  ;;  %s4699_s15 = sshll.u32 %s4955_s8, 4  ;;  %s4700_s15 = int_to_ptr.vmem [resolvable:$false] %s4699_s15 }
 0x100   : > { %s4701_s16 = scalar_lea.vmem %s4700_s15, 6144  ;;  %p4702_p9 = scmp.lt.s32.totalorder %s5370_s12, %s4700_s15 }
 0x101   : > { %p4697_p2 = pnand %p4695_p12, %p6703_p3  ;;  %p4703_p7 = scmp.lt.s32.totalorder %s4701_s16, %s4694_s3 }
 0x103   : > { %p4698_p6 = pneg %p4697_p2  ;;  %p4704_p8 = por %p4703_p7, %p4702_p9 }
 0x105   : > { %p4705_p0 = pnand %p4704_p8, %p4698_p6 }
 0x107   : > { %4708 = shalt.err (!%p4705_p0)
}
 0x108   : > { %p6704_p10 = scmp.ne.s32.totalorder %s6678_s5, 0  ;;  %s4709_s18 = scalar_lea.hbm %s5216_s26, 384 }
 0x109   : > { %p4710_p13 = scmp.ne.s32.totalorder %s5216_s26, %s4709_s18  ;;  %s4714_s10 = scalar_lea.hbm %s6584_s2, 1536 }
 0x10a   : > { %4374 = dma.hbm_to_vmem [thread:$0]  (!%p6704_p10), %s5377_s14, 3072, %s5370_s12, %s388_s6, %s6692_s20, %s6692_s20, %s6691_s25  }
 0x10b   : > { %p4712_p5 = pnand %p4710_p13, %p6703_p3  ;;  %p4715_p4 = scmp.lt.u32.totalorder %s5216_s26, %s6584_s2 }
 0x10c   : > { %p4716_p12 = scmp.lt.u32.totalorder %s4714_s10, %s4709_s18  ;;  %p4718_p6 = scmp.lt.u32.totalorder %s4709_s18, %s5216_s26 }
 0x10d   : > { %p4713_p11 = pneg %p4712_p5 }
 0x10e   : > { %p4717_p2 = por %p4716_p12, %p4715_p4 }
 0x110   : > { %p4719_p9 = por %p4718_p6, %p4717_p2 }
 0x112   : > { %p4720_p7 = pnand %p4719_p9, %p4713_p11 }
 0x114   : > { %4723 = shalt.err (!%p4720_p7)
}
 0x115   : > { %s4724_s14 = scalar_lea.vmem %s5372_s1, 384  ;;  %s4956_s11 = smov [#allocation9]  }
 0x116   : > { %p4725_p8 = scmp.ne.s32.totalorder %s5372_s1, %s4724_s14  ;;  %s4729_s12 = sshll.u32 %s4956_s11, 4  ;;  %s4730_s12 = int_to_ptr.vmem [resolvable:$false] %s4729_s12 }
 0x117   : > { %s4731_s6 = scalar_lea.vmem %s4730_s12, 768  ;;  %p4732_p5 = scmp.lt.s32.totalorder %s5372_s1, %s4730_s12 }
 0x118   : > { %p4727_p0 = pnand %p4725_p8, %p6703_p3  ;;  %p4733_p1 = scmp.lt.s32.totalorder %s4731_s6, %s4724_s14 }
 0x11a   : > { %p4728_p13 = pneg %p4727_p0  ;;  %p4734_p4 = por %p4733_p1, %p4732_p5 }
 0x11c   : > { %p4735_p12 = pnand %p4734_p4, %p4728_p13 }
 0x11e   : > { %4738 = shalt.err (!%p4735_p12)
}
 0x11f   : > { %s6705_s19 = scalar_lea.sflag [#allocation8], %s5189_s30  ;;  %s4320_s7 = smul.u32 384, %s4937_s21 }
 0x120   : > { %4380 = dma.hbm_to_vmem [thread:$0]  (!%p6704_p10), %s5216_s26, 384, %s5372_s1, %s6705_s19, %s6692_s20, %s6692_s20, %s6691_s25  }
 0x121   : > { %s481_s3 = scalar_lea.vmem [#allocation12], %s5276_s17  ;;  %s6706_s16 = sld [smem:[#allocation51_spill]] }
 0x122   : > { %s488_s8 = sshll.u32 %s481_s3, 4  ;;  %p6708_p3 = scmp.ne.s32.totalorder %s6690_s4, 0  ;;  %s5434_s8 = int_to_ptr.vmem [resolvable:$true] %s488_s8 }
 0x127   : > { %s6707_s29 = smov %s6706_s16  ;;  %s5441_s18 = scalar_lea.hbm %s6706_s16, %s4320_s7 }
 0x128   : > { %s4739_s23 = scalar_lea.hbm %s5441_s18, 384  ;;  %s4744_s10 = scalar_lea.hbm %s6707_s29, 768 }
 0x129   : > { %p4740_p1 = scmp.ne.s32.totalorder %s5441_s18, %s4739_s23  ;;  %p4745_p2 = scmp.lt.u32.totalorder %s5441_s18, %s6707_s29 }
 0x12a   : > { %p4746_p6 = scmp.lt.u32.totalorder %s4744_s10, %s4739_s23  ;;  %p4748_p7 = scmp.lt.u32.totalorder %s4739_s23, %s5441_s18 }
 0x12b   : > { %p4742_p11 = pnand %p4740_p1, %p6708_p3 }
 0x12c   : > { %p4747_p9 = por %p4746_p6, %p4745_p2 }
 0x12d   : > { %p4743_p10 = pneg %p4742_p11 }
 0x12e   : > { %p4749_p8 = por %p4748_p7, %p4747_p9 }
 0x130   : > { %p4750_p0 = pnand %p4749_p8, %p4743_p10 }
 0x132   : > { %4753 = shalt.err (!%p4750_p0)
}
 0x133   : > { %s4754_s14 = scalar_lea.vmem %s5434_s8, 384  ;;  %s4957_s11 = smov [#allocation12]  }
 0x134   : > { %p4755_p13 = scmp.ne.s32.totalorder %s5434_s8, %s4754_s14  ;;  %s4759_s12 = sshll.u32 %s4957_s11, 4  ;;  %s4760_s12 = int_to_ptr.vmem [resolvable:$false] %s4759_s12 }
 0x135   : > { %s4761_s6 = scalar_lea.vmem %s4760_s12, 768  ;;  %p4762_p12 = scmp.lt.s32.totalorder %s5434_s8, %s4760_s12 }
 0x136   : > { %p4757_p5 = pnand %p4755_p13, %p6708_p3  ;;  %p4763_p1 = scmp.lt.s32.totalorder %s4761_s6, %s4754_s14 }
 0x138   : > { %p4758_p4 = pneg %p4757_p5  ;;  %p4764_p11 = por %p4763_p1, %p4762_p12 }
 0x13a   : > { %p4765_p2 = pnand %p4764_p11, %p4758_p4 }
 0x13c   : > { %4768 = shalt.err (!%p4765_p2)
}
 0x13d   : > { %p6709_p10 = scmp.ne.s32.totalorder %s6688_s9, 0  ;;  %s6710_s19 = scalar_lea.sflag [#allocation11], %s5189_s30 }
 0x13e   : > { %s6711_s5 = sld [smem:[#allocation52_spill]]  ;;  %s502_s23 = scalar_lea.vmem [#allocation13], %s5276_s17 }
 0x13f   : > { %4386 = dma.hbm_to_vmem [thread:$0]  (!%p6709_p10), %s5441_s18, 384, %s5434_s8, %s6710_s19, %s6692_s20, %s6692_s20, %s6691_s25  }
 0x140   : > { %s509_s26 = sshll.u32 %s502_s23, 4  ;;  %s499_s1 = scalar_lea.sflag [#allocation14], %s5189_s30  ;;  %s5477_s26 = int_to_ptr.vmem [resolvable:$true] %s509_s26 }
 0x144   : > { %s5474_s16 = scalar_lea.hbm %s6711_s5, %s4320_s7  ;;  %s4774_s13 = scalar_lea.hbm %s6711_s5, 768 }
 0x145   : > { %s4769_s10 = scalar_lea.hbm %s5474_s16, 384  ;;  %p4775_p8 = scmp.lt.u32.totalorder %s5474_s16, %s6711_s5 }
 0x146   : > { %p4770_p6 = scmp.ne.s32.totalorder %s5474_s16, %s4769_s10  ;;  %p4776_p0 = scmp.lt.u32.totalorder %s4774_s13, %s4769_s10 }
 0x147   : > { %p4778_p5 = scmp.lt.u32.totalorder %s4769_s10, %s5474_s16 }
 0x148   : > { %p4772_p9 = pnand %p4770_p6, %p6708_p3  ;;  %p4777_p13 = por %p4776_p0, %p4775_p8 }
 0x14a   : > { %p4773_p7 = pneg %p4772_p9  ;;  %p4779_p4 = por %p4778_p5, %p4777_p13 }
 0x14c   : > { %p4780_p12 = pnand %p4779_p4, %p4773_p7 }
 0x14e   : > { %4783 = shalt.err (!%p4780_p12)
}
 0x14f   : > { %s4784_s17 = scalar_lea.vmem %s5477_s26, 384  ;;  %s4958_s14 = smov [#allocation13]  }
 0x150   : > { %p4785_p1 = scmp.ne.s32.totalorder %s5477_s26, %s4784_s17  ;;  %s4789_s11 = sshll.u32 %s4958_s14, 4  ;;  %s4790_s11 = int_to_ptr.vmem [resolvable:$false] %s4789_s11 }
 0x151   : > { %s4791_s12 = scalar_lea.vmem %s4790_s11, 768  ;;  %p4792_p6 = scmp.lt.s32.totalorder %s5477_s26, %s4790_s11 }
 0x152   : > { %p4787_p11 = pnand %p4785_p1, %p6708_p3  ;;  %p4793_p9 = scmp.lt.s32.totalorder %s4791_s12, %s4784_s17 }
 0x154   : > { %p4788_p2 = pneg %p4787_p11  ;;  %p4794_p8 = por %p4793_p9, %p4792_p6 }
 0x156   : > { %p4795_p0 = pnand %p4794_p8, %p4788_p2 }
 0x158   : > { %4798 = shalt.err (!%p4795_p0)
}
 0x159   : > { %4389 = dma.hbm_to_vmem [thread:$0]  (!%p6709_p10), %s5474_s16, 384, %s5477_s26, %s499_s1, %s6692_s20, %s6692_s20, %s6691_s25  }
 0x15a   : > { %s6712_s4 = sld [smem:[#allocation40_spill]] }
 0x160   : > { %p6713_p3 = scmp.ne.s32.totalorder %s6712_s4, 0 }
 0x161   : > { %s6714_s6 = sld [smem:[#allocation33_spill]] (!%p6713_p3)  ;;  %s6715_s19 = sld [smem:[#allocation38_spill]] (!%p6713_p3) }
 0x162   : > { %521 = sbr.rel (%p6713_p3) target bundleno = 1280 (0x500), region = 60 }
 0x167   : > { %s5509_s3 = sand.u32 (!%p6713_p3), 1, %s6714_s6   ;;  %p6716_p7 = scmp.ne.s32.totalorder (!%p6713_p3), %s6715_s19, 0 }
 0x168   : > { %s4323_s15 = smul.u32 (!%p6713_p3), 192, %s5509_s3  ;;  %s524_s9 = scalar_lea.sflag (!%p6713_p3), [#allocation5], %s5509_s3 }
 0x16a   : > { %s5515_s23 = scalar_lea.vmem [#allocation4], %s4323_s15 }
 0x16b   : > { %4872 = dma.done.wait (%p6716_p7), %s524_s9, 3072  }
 0x16c   : > { %4874 = vsyncadd (%p6716_p7), %s524_s9, 4294964224  ;;  %s532_s30 = sand.u32 1, %s5078_s24   ;;  %s4324_s25 = smul.u32 24, %s5509_s3 }
 0x16d   : > { %s533_s20 = scalar_lea.sflag [#allocation8], %s532_s30 }
 0x16e   : > { %s5523_s16 = scalar_lea.vmem [#allocation7], %s4324_s25 }
 0x16f   : > { %4876 = dma.done.wait (%p6716_p7), %s533_s20, 768  }
 0x170   : > { %4878 = vsyncadd (%p6716_p7), %s533_s20, 4294966528  ;;  %s6717_s26 = sld [smem:[#allocation30_spill]]  ;;  %s6718_s1 = sld [smem:[#allocation47_spill]] }
 0x171   : > { %s5530_s18 = scalar_lea.vmem [#allocation9], %s4324_s25  ;;  %s551_s13 = scalar_lea.sflag [#allocation11], %s532_s30 }
 0x176   : > { %s552_s10 = sand.u32 1, %s6717_s26   ;;  %p6719_p10 = scmp.ne.s32.totalorder %s6718_s1, 0 }
 0x177   : > { %s4325_s8 = smul.u32 192, %s552_s10 }
 0x179   : > { %s5532_s7 = scalar_lea.vmem [#allocation10], %s4325_s8 }
 0x17a   : > { %4880 = dma.done.wait (%p6719_p10), %s551_s13, 3456  }
 0x17b   : > { %4882 = vsyncadd (%p6719_p10), %s551_s13, 4294963840  ;;  %s4326_s27 = smul.u32 24, %s552_s10  ;;  %s569_s14 = scalar_lea.sflag [#allocation14], %s532_s30 }
 0x17d   : > { %s5538_s17 = scalar_lea.vmem [#allocation12], %s4326_s27  ;;  %s5540_s11 = scalar_lea.vmem [#allocation13], %s4326_s27 }
 0x17e   : > { %4884 = dma.done.wait (%p6719_p10), %s569_s14, 384  }
 0x17f   : > { %4886 = vsyncadd (%p6719_p10), %s569_s14, 4294966912  ;;  %p6720_p13 = scmp.eq.s32.totalorder %s5078_s24, 0 }
 0x181   : > { %4888 = dma.done.wait (%p6720_p13), [#allocation14], 64   ;;  %p6721_p5 = pmov %p6720_p13 }
 0x183   : > { %4890 = vsyncadd (%p6721_p5), [#allocation14], 4294967232  ;;  %p6722_p4 = pmov %p6721_p5 }
 0x185   : > { %4892 = dma.done.wait (%p6722_p4), [#allocation17], 400   ;;  %p6723_p12 = pmov %p6722_p4 }
 0x186   : > { %p6724_p1 = pmov %p6722_p4 }
 0x187   : > { %4894 = vsyncadd (%p6723_p12), [#allocation17], 4294966896 }
 0x188   : > { %4896 = dma.done.wait (%p6724_p1), [#allocation20], 16   ;;  %p6725_p11 = pmov %p6724_p1 }
 0x189   : > { %vm655_vm0 = vcmask 15360   ;;  %v4959_v0 = vmov 0.0   ;;  %vm4960_vm1 = vmmov 0   ;;  %v4961_v1 = vmov 0   ;;  %v653_v2 = vld [vmem:[#allocation15] sm:$0xf] }
 0x18a   : > { %4898 = vsyncadd (%p6725_p11), [#allocation20], 4294967280  ;;  %4136 = vmatprep.subr.mxu1 %v4959_v0  ;;  %658 = vst.msk [vmem:[#allocation2 + $0x10] sm:$0xff] %vm655_vm0, %v4959_v0  ;;  %4185 = vmatprep.subr.mxu0 %v4959_v0  ;;  %vm684_vm2 = vcmask 1043456   ;;  %vm674_vm3 = vcmask 31744   ;;  %v662_v3 = vld [vmem:[%s5523_s16] sm:$0xff] }
 0x18b   : > { %659 = vst.msk [vmem:[#allocation2 + $0x108] sm:$0xff] %vm655_vm0, %v4959_v0  ;;  %4138 = vmatprep.mubr.msk.f32.mxu1 %vm4960_vm1, %v4959_v0  ;;  %4187 = vmatprep.mubr.msk.f32.mxu0 %vm4960_vm1, %v4959_v0  ;;  %v1370_v4 = vld [vmem:[%s5530_s18] sm:$0xff]  ;;  %v663_v5 = vld [vmem:[%s5523_s16 + $0x8] sm:$0xff]  ;;  %v1371_v6 = vld [vmem:[%s5530_s18 + $0x8] sm:$0xff]  ;;  %s4962_s24 = smov 2   ;;  %s4963_s12 = smov 4  }
 0x18c   : > { %4505 = vset.pattern.permute.xlu0 %v4961_v1  ;;  %4506 = vset.pattern.permute.xlu1 %v4961_v1  ;;  %v665_v7 = vld [vmem:[%s5538_s17] sm:$0xff]  ;;  %v666_v8 = vld [vmem:[%s5538_s17 + $0x8] sm:$0xff]  ;;  %v664_v10 = vld [vmem:[%s5523_s16 + $0x10] sm:$0xff]  ;;  %s6420_s4 = scalar_lea.vmem [#allocation21], %s4323_s15  ;;  %s6726_s6 = sld [smem:[#allocation35_spill]] }
 0x18d   : > { %4137 = vmatpush3.msk.msra.mxu1 %vm684_vm2, %v653_v2  ;;  %4186 = vmatpush3.msk.msra.mxu0 %vm684_vm2, %v653_v2  ;;  %vm768_vm4 = vcmp.gt.f32.partialorder %v665_v7, 0.0  ;;  %vm769_vm5 = vcmp.gt.f32.partialorder %v666_v8, 0.0  ;;  %v826_v11 = vld [vmem:[%s5532_s7 + $0x8] sm:$0xff]  ;;  %v1372_v12 = vld [vmem:[%s5530_s18 + $0x10] sm:$0xff]  ;;  %v803_v17 = vld [vmem:[%s5515_s23 + $0x10] sm:$0xff]  ;;  %s6727_s19 = sld [smem:[#allocation36_spill]] }
 0x18e   : > { %4139 = vmatmul.mubr.msk.f32.vlgmr.msra.gmra.mrb[0].mxu1 %vm674_vm3, %v662_v3  ;;  %4147 = vmatprep.subr.msk.mxu1 %vm684_vm2, %v653_v2  ;;  %v780_v9 = vsel %vm768_vm4, 1, %v4961_v1  ;;  %v801_v13 = vld [vmem:[%s5515_s23] sm:$0xff]  ;;  %v781_v14 = vsel %vm769_vm5, 1, %v4961_v1  ;;  %vm1107_vm6 = vcmp.gt.f32.partialorder %v826_v11, 0.0  ;;  %v802_v15 = vld [vmem:[%s5515_s23 + $0x8] sm:$0xff]  ;;  %v828_v16 = vld [vmem:[%s5532_s7 + $0x18] sm:$0xff] }
 0x18f   : > { %4188 = vmatmul.mubr.msk.f32.vlgmr.msra.gmra.mrb[0].mxu0 %vm674_vm3, %v1370_v4  ;;  %4148 = vmatpush3.msk.msra.mxu1 %vm684_vm2, %v653_v2  ;;  %v667_v18 = vld [vmem:[%s5538_s17 + $0x10] sm:$0xff]  ;;  %v1203_v19 = vsel %vm1107_vm6, 1, %v4961_v1  ;;  %v825_v20 = vld [vmem:[%s5532_s7] sm:$0xff]  ;;  %vm1109_vm8 = vcmp.gt.f32.partialorder %v828_v16, 0.0  ;;  %v804_v23 = vld [vmem:[%s5515_s23 + $0x18] sm:$0xff]  ;;  %s3652_s25 = sshll.u32 %s6420_s4, 4  ;;  %s6510_s25 = int_to_ptr.vmem [resolvable:$true] %s3652_s25 }
 0x190   : > { %4141 = vmatprep.mubr.msk.f32.mxu1 %vm4960_vm1, %v4959_v0  ;;  %4190 = vmatprep.mubr.msk.f32.mxu0 %vm4960_vm1, %v4959_v0  ;;  %vm770_vm7 = vcmp.gt.f32.partialorder %v667_v18, 0.0  ;;  %vm1106_vm9 = vcmp.gt.f32.partialorder %v825_v20, 0.0  ;;  %v827_v22 = vld [vmem:[%s5532_s7 + $0x10] sm:$0xff]  ;;  %v830_v24 = vld [vmem:[%s5532_s7 + $0x28] sm:$0xff]  ;;  %v805_v25 = vld [vmem:[%s5515_s23 + $0x20] sm:$0xff]  ;;  %v1205_v27 = vsel %vm1109_vm8, 1, %v4961_v1 }
 0x191   : > { %784 = vperm.xlu0 %4505, %v780_v9   ;;  %v782_v21 = vsel %vm770_vm7, 1, %v4961_v1  ;;  %v1202_v26 = vsel %vm1106_vm9, 1, %v4961_v1  ;;  %vm1108_vm10 = vcmp.gt.f32.partialorder %v827_v22, 0.0  ;;  %vm1111_vm11 = vcmp.gt.f32.partialorder %v830_v24, 0.0  ;;  %v829_v28 = vld [vmem:[%s5532_s7 + $0x20] sm:$0xff]  ;;  %v806_v29 = vld [vmem:[%s5515_s23 + $0x28] sm:$0xff] }
 0x192   : > { %4142 = vmatmul.mubr.msk.f32.gmra.mrb[2].mxu1 %vm674_vm3, %v663_v5  ;;  %790 = vperm.xlu1 %4506, %v782_v21   ;;  %v832_v30 = vld [vmem:[%s5532_s7 + $0x38] sm:$0xff]  ;;  %v807_v31 = vld [vmem:[%s5515_s23 + $0x30] sm:$0xff]  ;;  %v1204_v32 = vsel %vm1108_vm10, 1, %v4961_v1  ;;  %v1207_v33 = vsel %vm1111_vm11, 1, %v4961_v1  ;;  %vm1110_vm12 = vcmp.gt.f32.partialorder %v829_v28, 0.0  ;;  %v834_v36 = vld [vmem:[%s5532_s7 + $0x48] sm:$0xff] }
 0x193   : > { %4191 = vmatmul.mubr.msk.f32.gmra.mrb[2].mxu0 %vm674_vm3, %v1371_v6  ;;  %4144 = vmatprep.mubr.msk.f32.mxu1 %vm4960_vm1, %v4959_v0  ;;  %vm1113_vm13 = vcmp.gt.f32.partialorder %v832_v30, 0.0  ;;  %v831_v34 = vld [vmem:[%s5532_s7 + $0x30] sm:$0xff]  ;;  %v808_v35 = vld [vmem:[%s5515_s23 + $0x38] sm:$0xff]  ;;  %v809_v37 = vld [vmem:[%s5515_s23 + $0x40] sm:$0xff]  ;;  %v1206_v38 = vsel %vm1110_vm12, 1, %v4961_v1  ;;  %vm1115_vm15 = vcmp.gt.f32.partialorder %v834_v36, 0.0 }
 0x194   : > { %4193 = vmatprep.mubr.msk.f32.mxu0 %vm4960_vm1, %v4959_v0  ;;  %v1209_v39 = vsel %vm1113_vm13, 1, %v4961_v1  ;;  %vm1112_vm14 = vcmp.gt.f32.partialorder %v831_v34, 0.0  ;;  %v833_v40 = vld [vmem:[%s5532_s7 + $0x40] sm:$0xff]  ;;  %v810_v41 = vld [vmem:[%s5515_s23 + $0x48] sm:$0xff]  ;;  %v836_v42 = vld [vmem:[%s5532_s7 + $0x58] sm:$0xff]  ;;  %v1211_v45 = vsel %vm1115_vm15, 1, %v4961_v1 }
 0x195   : > { %787 = vperm.xlu0 %4505, %v781_v14   ;;  %v811_v43 = vld [vmem:[%s5515_s23 + $0x50] sm:$0xff]  ;;  %v1208_v44 = vsel %vm1112_vm14, 1, %v4961_v1  ;;  %vm1114_vm1 = vcmp.gt.f32.partialorder %v833_v40, 0.0  ;;  %vm1117_vm2 = vcmp.gt.f32.partialorder %v836_v42, 0.0  ;;  %v812_v47 = vld [vmem:[%s5515_s23 + $0x58] sm:$0xff]  ;;  %v838_v48 = vld [vmem:[%s5532_s7 + $0x68] sm:$0xff] }
 0x196   : > { %4145 = vmatmul.mubr.msk.f32.gmra.mrb[4].mxu1 %vm674_vm3, %v664_v10  ;;  %1227 = vperm.xlu1 %4506, %v1202_v26   ;;  %v835_v46 = vld [vmem:[%s5532_s7 + $0x50] sm:$0xff]  ;;  %v813_v49 = vld [vmem:[%s5515_s23 + $0x60] sm:$0xff]  ;;  %v1210_v50 = vsel %vm1114_vm1, 1, %v4961_v1  ;;  %v1213_v51 = vsel %vm1117_vm2, 1, %v4961_v1  ;;  %vm1119_vm5 = vcmp.gt.f32.partialorder %v838_v48, 0.0  ;;  %v814_v53 = vld [vmem:[%s5515_s23 + $0x68] sm:$0xff] }
 0x197   : > { %4194 = vmatmul.mubr.msk.f32.gmra.mrb[4].mxu0 %vm674_vm3, %v1372_v12  ;;  %4149 = vmatprep.mubr.msk.f32.mxu1 %vm674_vm3, %v801_v13  ;;  %vm1116_vm4 = vcmp.gt.f32.partialorder %v835_v46, 0.0  ;;  %v837_v52 = vld [vmem:[%s5532_s7 + $0x60] sm:$0xff]  ;;  %v840_v54 = vld [vmem:[%s5532_s7 + $0x78] sm:$0xff]  ;;  %v815_v55 = vld [vmem:[%s5515_s23 + $0x70] sm:$0xff]  ;;  %v1215_v57 = vsel %vm1119_vm5, 1, %v4961_v1  ;;  %s3644_s15 = smul.u32 24, %s6726_s6 }
 0x198   : > { %v1212_v56 = vsel %vm1116_vm4, 1, %v4961_v1  ;;  %vm1118_vm6 = vcmp.gt.f32.partialorder %v837_v52, 0.0  ;;  %vm1121_vm7 = vcmp.gt.f32.partialorder %v840_v54, 0.0  ;;  %v839_v58 = vld [vmem:[%s5532_s7 + $0x70] sm:$0xff]  ;;  %v816_v59 = vld [vmem:[%s5515_s23 + $0x78] sm:$0xff]  ;;  %v842_v60 = vld [vmem:[%s5532_s7 + $0x88] sm:$0xff] }
 0x199   : > { %1230 = vperm.xlu0 %4505, %v1203_v19   ;;  %v817_v61 = vld [vmem:[%s5515_s23 + $0x80] sm:$0xff]  ;;  %v1214_v62 = vsel %vm1118_vm6, 1, %v4961_v1  ;;  %v1217_v63 = vsel %vm1121_vm7, 1, %v4961_v1  ;;  %vm1120_vm8 = vcmp.gt.f32.partialorder %v839_v58, 0.0  ;;  %vm1123_vm9 = vcmp.gt.f32.partialorder %v842_v60, 0.0  ;;  %v818_v2 = vld [vmem:[%s5515_s23 + $0x88] sm:$0xff] }
 0x19a   : > { %4150 = vmatmul.mubr.msk.f32.vlgmr.msra.gmra.mrb[6].mxu1 %vm674_vm3, %v802_v15  ;;  %1233 = vperm.xlu1 %4506, %v1204_v32   ;;  %v841_v0 = vld [vmem:[%s5532_s7 + $0x80] sm:$0xff]  ;;  %v844_v3 = vld [vmem:[%s5532_s7 + $0x98] sm:$0xff]  ;;  %v819_v4 = vld [vmem:[%s5515_s23 + $0x90] sm:$0xff]  ;;  %v1216_v5 = vsel %vm1120_vm8, 1, %v4961_v1  ;;  %v1219_v6 = vsel %vm1123_vm9, 1, %v4961_v1  ;;  %s4327_s9 = smul.u32 48, %s6727_s19 }
 0x19b   : > { %4152 = vmatprep.mubr.msk.f32.mxu1 %vm674_vm3, %v803_v17  ;;  %vm1122_vm10 = vcmp.gt.f32.partialorder %v841_v0, 0.0  ;;  %vm1125_vm11 = vcmp.gt.f32.partialorder %v844_v3, 0.0  ;;  %v843_v7 = vld [vmem:[%s5532_s7 + $0x90] sm:$0xff]  ;;  %v820_v8 = vld [vmem:[%s5515_s23 + $0x98] sm:$0xff]  ;;  %v846_v9 = vld [vmem:[%s5532_s7 + $0xa8] sm:$0xff]  ;;  %s6728_s20 = sld [smem:[#allocation43_spill]] }
 0x19c   : > { %v821_v10 = vld [vmem:[%s5515_s23 + $0xa0] sm:$0xff]  ;;  %v1218_v11 = vsel %vm1122_vm10, 1, %v4961_v1  ;;  %v1221_v12 = vsel %vm1125_vm11, 1, %v4961_v1  ;;  %vm1124_vm12 = vcmp.gt.f32.partialorder %v843_v7, 0.0  ;;  %vm1127_vm13 = vcmp.gt.f32.partialorder %v846_v9, 0.0  ;;  %v822_v14 = vld [vmem:[%s5515_s23 + $0xa8] sm:$0xff]  ;;  %s3649_s30 = sadd.s32 %s4327_s9, %s3644_s15 }
 0x19d   : > { %1236 = vperm.xlu0 %4505, %v1205_v27   ;;  %v845_v13 = vld [vmem:[%s5532_s7 + $0xa0] sm:$0xff]  ;;  %v847_v15 = vld [vmem:[%s5532_s7 + $0xb0] sm:$0xff]  ;;  %v1220_v17 = vsel %vm1124_vm12, 1, %v4961_v1  ;;  %v1223_v18 = vsel %vm1127_vm13, 1, %v4961_v1  ;;  %v824_v19 = vld [vmem:[%s5515_s23 + $0xb8] sm:$0xff]  ;;  %vm1939_vm13 = vcmask 1045504  }
 0x19e   : > { %4153 = vmatmul.mubr.msk.f32.gmra.mrb[8].mxu1 %vm674_vm3, %v804_v23  ;;  %1239 = vperm.xlu1 %4506, %v1206_v38   ;;  %v823_v16 = vld [vmem:[%s5515_s23 + $0xb0] sm:$0xff]  ;;  %vm1126_vm14 = vcmp.gt.f32.partialorder %v845_v13, 0.0  ;;  %vm1128_vm15 = vcmp.gt.f32.partialorder %v847_v15, 0.0  ;;  %v848_v20 = vld [vmem:[%s5532_s7 + $0xb8] sm:$0xff]  ;;  %v1865_v9 = vld [vmem:[#allocation18] sm:$0x3f] }
 0x19f   : > { %4155 = vmatprep.mubr.msk.f32.mxu1 %vm674_vm3, %v805_v25  ;;  %v1222_v21 = vsel %vm1126_vm14, 1, %v4961_v1  ;;  %v1224_v22 = vsel %vm1128_vm15, 1, %v4961_v1  ;;  %vm1129_vm1 = vcmp.gt.f32.partialorder %v848_v20, 0.0  ;;  %v1373_v23 = vld [vmem:[%s5540_s11] sm:$0xff]  ;;  %v1374_v25 = vld [vmem:[%s5540_s11 + $0x8] sm:$0xff]  ;;  %v1375_v27 = vld [vmem:[%s5540_s11 + $0x10] sm:$0xff]  ;;  %4196 = vmatprep.subr.msk.mxu0 %vm1939_vm13, %v1865_v9 }
 0x1a0   : > { %v1225_v24 = vsel %vm1129_vm1, 1, %v4961_v1  ;;  %vm1465_vm2 = vcmp.gt.f32.partialorder %v1373_v23, 0.0  ;;  %vm1466_vm4 = vcmp.gt.f32.partialorder %v1374_v25, 0.0  ;;  %vm1467_vm5 = vcmp.gt.f32.partialorder %v1375_v27, 0.0  ;;  %4197 = vmatpush3.msk.msra.mxu0 %vm1939_vm13, %v1865_v9  ;;  %s4024_s16 = sshll.u32 %s3649_s30, 7  ;;  %s6729_s10 = sld [smem:[#allocation57_spill]] }
 0x1a1   : > { %1242 = vperm.xlu0 %4505, %v1207_v33   ;;  %v1477_v26 = vsel %vm1465_vm2, 1, %v4961_v1  ;;  %v1478_v28 = vsel %vm1466_vm4, 1, %v4961_v1  ;;  %s4799_s18 = scalar_lea.vmem %s6510_s25, 3072  ;;  %p6730_p6 = scmp.ne.s32.totalorder %s6728_s20, 0 }
 0x1a2   : > { %4156 = vmatmul.mubr.msk.f32.gmra.mrb[10].mxu1 %vm674_vm3, %v806_v29  ;;  %1245 = vperm.xlu1 %4506, %v1208_v44   ;;  %v1479_v29 = vsel %vm1467_vm5, 1, %v4961_v1  ;;  %p4800_p2 = scmp.ne.s32.totalorder %s6510_s25, %s4799_s18  ;;  %s4964_s13 = smov [#allocation21]  }
 0x1a3   : > { %4158 = vmatprep.mubr.msk.f32.mxu1 %vm674_vm3, %v807_v31  ;;  %s4803_s7 = sshll.u32 %s4964_s13, 4  ;;  %s4804_s7 = int_to_ptr.vmem [resolvable:$false] %s4803_s7 }
 0x1a4   : > { %p4801_p9 = pnand %p4800_p2, %p6730_p6  ;;  %s4805_s27 = scalar_lea.vmem %s4804_s7, 6144 }
 0x1a5   : > { %1248 = vperm.xlu0 %4505, %v1209_v39   ;;  %p4806_p0 = scmp.lt.s32.totalorder %s6510_s25, %s4804_s7  ;;  %p4807_p3 = scmp.lt.s32.totalorder %s4805_s27, %s4799_s18 }
 0x1a6   : > { %4159 = vmatmul.mubr.msk.f32.gmra.mrb[12].mxu1 %vm674_vm3, %v808_v35  ;;  %1251 = vperm.xlu1 %4506, %v1210_v50   ;;  %s6515_s8 = scalar_lea.hbm %s6729_s10, %s4024_s16  ;;  %p4802_p8 = pneg %p4801_p9 }
 0x1a7   : > { %4161 = vmatprep.mubr.msk.f32.mxu1 %vm674_vm3, %v809_v37  ;;  %p4808_p7 = por %p4807_p3, %p4806_p0 }
 0x1a9   : > { %1254 = vperm.xlu0 %4505, %v1211_v45   ;;  %p4809_p10 = pnand %p4808_p7, %p4802_p8 }
 0x1aa   : > { %4162 = vmatmul.mubr.msk.f32.gmra.mrb[14].mxu1 %vm674_vm3, %v810_v41  ;;  %1257 = vperm.xlu1 %4506, %v1212_v56  }
 0x1ab   : > { %4164 = vmatprep.mubr.msk.f32.mxu1 %vm674_vm3, %v811_v43 }
 0x1ad   : > { %1260 = vperm.xlu0 %4505, %v1213_v51  }
 0x1ae   : > { %4165 = vmatmul.mubr.msk.f32.gmra.mrb[16].mxu1 %vm674_vm3, %v812_v47  ;;  %1263 = vperm.xlu1 %4506, %v1214_v62   ;;  %v5718_v47 = vld [vmem:[#allocation16] ss:$0 sm:$0xff] }
 0x1af   : > { %4167 = vmatprep.mubr.msk.f32.mxu1 %vm674_vm3, %v813_v49 }
 0x1b1   : > { %1266 = vperm.xlu0 %4505, %v1215_v57  }
 0x1b2   : > { %4168 = vmatmul.mubr.msk.f32.gmra.mrb[18].mxu1 %vm674_vm3, %v814_v53  ;;  %1269 = vperm.xlu1 %4506, %v1216_v5  }
 0x1b3   : > { %4170 = vmatprep.mubr.msk.f32.mxu1 %vm674_vm3, %v815_v55 }
 0x1b5   : > { %1272 = vperm.xlu0 %4505, %v1217_v63  }
 0x1b6   : > { %4171 = vmatmul.mubr.msk.f32.gmra.mrb[20].mxu1 %vm674_vm3, %v816_v59  ;;  %1275 = vperm.xlu1 %4506, %v1218_v11  }
 0x1b7   : > { %4173 = vmatprep.mubr.msk.f32.mxu1 %vm674_vm3, %v817_v61 }
 0x1b9   : > { %1278 = vperm.xlu0 %4505, %v1219_v6  }
 0x1ba   : > { %4174 = vmatmul.mubr.msk.f32.gmra.mrb[22].mxu1 %vm674_vm3, %v818_v2  ;;  %1281 = vperm.xlu1 %4506, %v1220_v17  }
 0x1bb   : > { %4176 = vmatprep.mubr.msk.f32.mxu1 %vm674_vm3, %v819_v4 }
 0x1bd   : > { %1284 = vperm.xlu0 %4505, %v1221_v12  }
 0x1be   : > { %4177 = vmatmul.mubr.msk.f32.gmra.mrb[24].mxu1 %vm674_vm3, %v820_v8  ;;  %1287 = vperm.xlu1 %4506, %v1222_v21  }
 0x1bf   : > { %4179 = vmatprep.mubr.msk.f32.mxu1 %vm674_vm3, %v821_v10 }
 0x1c1   : > { %1290 = vperm.xlu0 %4505, %v1223_v18  }
 0x1c2   : > { %4180 = vmatmul.mubr.msk.f32.gmra.mrb[26].mxu1 %vm674_vm3, %v822_v14 }
 0x1c3   : > { %4182 = vmatprep.mubr.msk.f32.mxu1 %vm674_vm3, %v823_v16 }
 0x1c5   : > { %1293 = vperm.xlu0 %4505, %v1224_v22  }
 0x1c6   : > { %4183 = vmatmul.mubr.msk.f32.gmra.mrb[28].mxu1 %vm674_vm3, %v824_v19 }
 0x1c9   : > { %1296 = vperm.xlu0 %4505, %v1225_v24  }
 0x1cd   : > { %1481 = vperm.xlu0 %4505, %v1477_v26  }
 0x1d1   : > { %1484 = vperm.xlu0 %4505, %v1478_v28  }
 0x1d5   : > { %1487 = vperm.xlu0 %4505, %v1479_v29  }
 0x210   : > { %v785_v30 = vpop.permute.xlu0 %784 }
 0x211   : > { %v5712_v43 = vpop.permute.xlu1 %790  ;;  %vm792_vm6 = vcmp.eq.s32.totalorder %v785_v30, 1 }
 0x212   : > { %vm794_vm15 = vcmp.eq.s32.totalorder %v5712_v43, 1 }
 0x214   : > { %v788_v31 = vpop.permute.xlu0 %787 }
 0x215   : > { %v5716_v45 = vpop.permute.xlu1 %1227  ;;  %vm793_vm12 = vcmp.eq.s32.totalorder %v788_v31, 1 }
 0x218   : > { %v5688_v32 = vpop.permute.xlu0 %1230 }
 0x219   : > { %v5720_v48 = vpop.permute.xlu1 %1233 }
 0x21c   : > { %v5690_v33 = vpop.permute.xlu0 %1236 }
 0x21d   : > { %v5726_v4 = vpop.permute.xlu1 %1239 }
 0x220   : > { %v5692_v34 = vpop.permute.xlu0 %1242 }
 0x221   : > { %v5737_v23 = vpop.permute.xlu1 %1245 }
 0x224   : > { %v5694_v35 = vpop.permute.xlu0 %1248 }
 0x228   : > { %v5696_v36 = vpop.permute.xlu0 %1254 }
 0x22c   : > { %v5698_v37 = vpop.permute.xlu0 %1260 }
 0x230   : > { %v5700_v38 = vpop.permute.xlu0 %1266 }
 0x234   : > { %v5702_v39 = vpop.permute.xlu0 %1272 }
 0x238   : > { %v5704_v1 = vpop.permute.xlu0 %1278 }
 0x23c   : > { %v5706_v40 = vpop.permute.xlu0 %1284 }
 0x240   : > { %v5708_v41 = vpop.permute.xlu0 %1290 }
 0x244   : > { %v5710_v42 = vpop.permute.xlu0 %1293 }
 0x248   : > { %v5714_v44 = vpop.permute.xlu0 %1296 }
 0x24c   : > { %v1482_v46 = vpop.permute.xlu0 %1481 }
 0x24d   : > { %vm1489_vm8 = vcmp.eq.s32.totalorder %v1482_v46, 1 }
 0x250   : > { %v1485_v56 = vpop.permute.xlu0 %1484 }
 0x251   : > { %vm1490_vm14 = vcmp.eq.s32.totalorder %v1485_v56, 1 }
 0x254   : > { %v1488_v19 = vpop.permute.xlu0 %1487 }
 0x255   : > { %vm1491_vm4 = vcmp.eq.s32.totalorder %v1488_v19, 1 }
 0x261   : > { %v754_v49 = vpop.f32.mrb[0].mxu1 }
 0x262   : > { %v755_v50 = vadd.f32 %v5718_v47, %v754_v49  ;;  %v4140_v51 = vpop.f32.mrb[1].mxu1  ;;  %v1451_v52 = vpop.f32.mrb[0].mxu0 }
 0x263   : > { %v1452_v53 = vadd.f32 %v5718_v47, %v1451_v52  ;;  %v4189_v54 = vpop.f32.mrb[1].mxu0 }
 0x264   : > { %vm771_vm7 = vcmp.gt.f32.partialorder %v755_v50, 0.0  ;;  %v774_v55 = vmul.f32 0.1, %v755_v50 }
 0x265   : > { %vm1468_vm9 = vcmp.gt.f32.partialorder %v1452_v53, 0.0  ;;  %v1471_v57 = vmul.f32 0.1, %v1452_v53  ;;  %v759_v58 = vpop.f32.mrb[2].mxu1 }
 0x266   : > { %v777_v59 = vsel %vm771_vm7, %v755_v50, %v774_v55  ;;  %v760_v60 = vadd.f32 %v5718_v47, %v759_v58  ;;  %v1456_v61 = vpop.f32.mrb[2].mxu0  ;;  %v4143_v62 = vpop.f32.mrb[3].mxu1  ;;  %vm1299_vm7 = vcmp.eq.s32.totalorder %v5688_v32, 1 }
 0x267   : > { %v795_v63 = vsel %vm792_vm6, %v777_v59, 0.0  ;;  %v1474_v0 = vsel %vm1468_vm9, %v1452_v53, %v1471_v57  ;;  %v1457_v2 = vadd.f32 %v5718_v47, %v1456_v61  ;;  %v4192_v3 = vpop.f32.mrb[3].mxu0  ;;  %v5750_v58 = vpop.permute.xlu1 %1251 }
 0x268   : > { %798 = vst.msk [vmem:[#allocation2 + $0x18] sm:$0xff] %vm655_vm0, %v795_v63  ;;  %v1492_v5 = vsel %vm1489_vm8, %v1474_v0, 0.0  ;;  %vm772_vm10 = vcmp.gt.f32.partialorder %v760_v60, 0.0  ;;  %v775_v6 = vmul.f32 0.1, %v760_v60  ;;  %vm1298_vm8 = vcmp.eq.s32.totalorder %v5716_v45, 1 }
 0x269   : > { %1495 = vst.msk [vmem:[#allocation2 + $0xf0] sm:$0xff] %vm655_vm0, %v1492_v5  ;;  %vm1469_vm11 = vcmp.gt.f32.partialorder %v1457_v2, 0.0  ;;  %v1472_v7 = vmul.f32 0.1, %v1457_v2  ;;  %v764_v8 = vpop.f32.mrb[4].mxu1 }
 0x26a   : > { %v778_v10 = vsel %vm772_vm10, %v760_v60, %v775_v6  ;;  %v765_v11 = vadd.f32 %v5718_v47, %v764_v8  ;;  %v1461_v12 = vpop.f32.mrb[4].mxu0  ;;  %v4146_v13 = vpop.f32.mrb[5].mxu1 }
 0x26b   : > { %v796_v14 = vsel %vm793_vm12, %v778_v10, 0.0  ;;  %v1475_v15 = vsel %vm1469_vm11, %v1457_v2, %v1472_v7  ;;  %v1462_v16 = vadd.f32 %v5718_v47, %v1461_v12  ;;  %v4195_v17 = vpop.f32.mrb[5].mxu0  ;;  %vm1301_vm11 = vcmp.eq.s32.totalorder %v5690_v33, 1  ;;  %v5765_v9 = vpop.permute.xlu1 %1257 }
 0x26c   : > { %799 = vst.msk [vmem:[#allocation2 + $0x20] sm:$0xff] %vm655_vm0, %v796_v14  ;;  %v1493_v18 = vsel %vm1490_vm14, %v1475_v15, 0.0  ;;  %vm773_vm1 = vcmp.gt.f32.partialorder %v765_v11, 0.0  ;;  %v776_v20 = vmul.f32 0.1, %v765_v11  ;;  %vm1300_vm12 = vcmp.eq.s32.totalorder %v5720_v48, 1 }
 0x26d   : > { %1496 = vst.msk [vmem:[#allocation2 + $0xf8] sm:$0xff] %vm655_vm0, %v1493_v18  ;;  %vm1470_vm2 = vcmp.gt.f32.partialorder %v1462_v16, 0.0  ;;  %v1473_v21 = vmul.f32 0.1, %v1462_v16  ;;  %v4151_v22 = vpop.f32.mrb[6].mxu1 }
 0x26e   : > { %v779_v24 = vsel %vm773_vm1, %v765_v11, %v776_v20  ;;  %v993_v25 = vadd.f32 %v4151_v22, %v5718_v47  ;;  %v987_v26 = vpop.f32.mrb[7].mxu1  ;;  %vm1303_vm1 = vcmp.eq.s32.totalorder %v5692_v34, 1 }
 0x26f   : > { %v797_v27 = vsel %vm794_vm15, %v779_v24, 0.0  ;;  %v1476_v28 = vsel %vm1470_vm2, %v1462_v16, %v1473_v21  ;;  %v988_v29 = vadd.f32 %v5718_v47, %v987_v26  ;;  %v1553_v30 = vld [vmem:[#allocation2 + $0x18] sm:$0xff]  ;;  %vm1302_vm2 = vcmp.eq.s32.totalorder %v5726_v4, 1 }
 0x270   : > { %800 = vst.msk [vmem:[#allocation2 + $0x28] sm:$0xff] %vm655_vm0, %v797_v27  ;;  %v1494_v31 = vsel %vm1491_vm4, %v1476_v28, 0.0  ;;  %vm1131_vm5 = vcmp.gt.f32.partialorder %v993_v25, 0.0  ;;  %v1155_v46 = vmul.f32 0.1, %v993_v25  ;;  %1625 = vrot.lane.b32.xlu1 %v1553_v30, %s4962_s24  ;;  %v5778_v27 = vpop.permute.xlu1 %1263 }
 0x271   : > { %1497 = vst.msk [vmem:[#allocation2 + $0x100] sm:$0xff] %vm655_vm0, %v1494_v31  ;;  %vm1130_vm6 = vcmp.gt.f32.partialorder %v988_v29, 0.0  ;;  %v1154_v49 = vmul.f32 0.1, %v988_v29  ;;  %v4154_v50 = vpop.f32.mrb[8].mxu1 }
 0x272   : > { %v1179_v43 = vsel %vm1131_vm5, %v993_v25, %v1155_v46  ;;  %v1003_v51 = vadd.f32 %v4154_v50, %v5718_v47  ;;  %v997_v52 = vpop.f32.mrb[9].mxu1 }
 0x273   : > { %v1323_v53 = vsel %vm1299_vm7, %v1179_v43, 0.0  ;;  %v1178_v54 = vsel %vm1130_vm6, %v988_v29, %v1154_v49  ;;  %v998_v55 = vadd.f32 %v5718_v47, %v997_v52  ;;  %v1577_v56 = vld [vmem:[#allocation2 + $0x19] sm:$0xff]  ;;  %vm1305_vm6 = vcmp.eq.s32.totalorder %v5694_v35, 1 }
 0x274   : > { %v1554_v57 = vld [vmem:[#allocation2 + $0x20] sm:$0xff]  ;;  %1347 = vst.msk [vmem:[#allocation2 + $0x38] sm:$0xff] %vm655_vm0, %v1323_v53  ;;  %v1322_v59 = vsel %vm1298_vm8, %v1178_v54, 0.0  ;;  %vm1133_vm9 = vcmp.gt.f32.partialorder %v1003_v51, 0.0  ;;  %v1157_v60 = vmul.f32 0.1, %v1003_v51  ;;  %1721 = vrot.lane.b32.xlu1 %v1577_v56, %s4963_s12  ;;  %v1270_v56 = vpop.permute.xlu1 %1269 }
 0x275   : > { %1627 = vrot.lane.b32.xlu0 %v1554_v57, %s4962_s24  ;;  %1346 = vst.msk [vmem:[#allocation2 + $0x30] sm:$0xff] %vm655_vm0, %v1322_v59  ;;  %vm1132_vm10 = vcmp.gt.f32.partialorder %v998_v55, 0.0  ;;  %v1156_v32 = vmul.f32 0.1, %v998_v55  ;;  %v4157_v45 = vpop.f32.mrb[10].mxu1  ;;  %vm1304_vm7 = vcmp.eq.s32.totalorder %v5737_v23, 1 }
 0x276   : > { %v1181_v61 = vsel %vm1133_vm9, %v1003_v51, %v1157_v60  ;;  %v1013_v62 = vadd.f32 %v4157_v45, %v5718_v47  ;;  %v1007_v63 = vpop.f32.mrb[11].mxu1 }
 0x277   : > { %v1325_v0 = vsel %vm1301_vm11, %v1181_v61, 0.0  ;;  %v1180_v2 = vsel %vm1132_vm10, %v998_v55, %v1156_v32  ;;  %v1008_v3 = vadd.f32 %v5718_v47, %v1007_v63  ;;  %v1578_v5 = vld [vmem:[#allocation2 + $0x21] sm:$0xff]  ;;  %vm1307_vm10 = vcmp.eq.s32.totalorder %v5696_v36, 1  ;;  %v2513_v61 = vld [vmem:[#allocation18 + $0x8] sm:$0x3f] }
 0x278   : > { %v1555_v6 = vld [vmem:[#allocation2 + $0x28] sm:$0xff]  ;;  %1349 = vst.msk [vmem:[#allocation2 + $0x48] sm:$0xff] %vm655_vm0, %v1325_v0  ;;  %v1324_v7 = vsel %vm1300_vm12, %v1180_v2, 0.0  ;;  %vm1135_vm14 = vcmp.gt.f32.partialorder %v1013_v62, 0.0  ;;  %v1159_v8 = vmul.f32 0.1, %v1013_v62  ;;  %4234 = vmatprep.subr.msk.mxu1 %vm1939_vm13, %v2513_v61 }
 0x279   : > { %1723 = vrot.lane.b32.xlu0 %v1578_v5, %s4963_s12  ;;  %1629 = vrot.lane.b32.xlu1 %v1555_v6, %s4962_s24  ;;  %1348 = vst.msk [vmem:[#allocation2 + $0x40] sm:$0xff] %vm655_vm0, %v1324_v7  ;;  %vm1134_vm15 = vcmp.gt.f32.partialorder %v1008_v3, 0.0  ;;  %v1158_v33 = vmul.f32 0.1, %v1008_v3  ;;  %v4160_v48 = vpop.f32.mrb[12].mxu1  ;;  %vm1306_vm11 = vcmp.eq.s32.totalorder %v5750_v58, 1 }
 0x27a   : > { %v1183_v10 = vsel %vm1135_vm14, %v1013_v62, %v1159_v8  ;;  %v1023_v11 = vadd.f32 %v4160_v48, %v5718_v47  ;;  %v1017_v12 = vpop.f32.mrb[13].mxu1  ;;  %4235 = vmatpush3.msk.msra.mxu1 %vm1939_vm13, %v2513_v61  ;;  %v1276_v48 = vpop.permute.xlu1 %1275 }
 0x27b   : > { %v1327_v13 = vsel %vm1303_vm1, %v1183_v10, 0.0  ;;  %v1182_v14 = vsel %vm1134_vm15, %v1008_v3, %v1158_v33  ;;  %v1018_v15 = vadd.f32 %v5718_v47, %v1017_v12  ;;  %v1557_v16 = vld [vmem:[#allocation2 + $0x38] sm:$0xff]  ;;  %vm1309_vm15 = vcmp.eq.s32.totalorder %v5698_v37, 1 }
 0x27c   : > { %1351 = vst.msk [vmem:[#allocation2 + $0x58] sm:$0xff] %vm655_vm0, %v1327_v13  ;;  %v1326_v17 = vsel %vm1302_vm2, %v1182_v14, 0.0  ;;  %vm1137_vm4 = vcmp.gt.f32.partialorder %v1023_v11, 0.0  ;;  %v1161_v18 = vmul.f32 0.1, %v1023_v11  ;;  %v1579_v34 = vld [vmem:[#allocation2 + $0x29] sm:$0xff] }
 0x27d   : > { %1633 = vrot.lane.b32.xlu1 %v1557_v16, %s4962_s24  ;;  %1350 = vst.msk [vmem:[#allocation2 + $0x50] sm:$0xff] %vm655_vm0, %v1326_v17  ;;  %vm1136_vm5 = vcmp.gt.f32.partialorder %v1018_v15, 0.0  ;;  %v1160_v19 = vmul.f32 0.1, %v1018_v15  ;;  %v4163_v20 = vpop.f32.mrb[14].mxu1  ;;  %1725 = vrot.lane.b32.xlu0 %v1579_v34, %s4963_s12  ;;  %v2200_v35 = vld [vmem:[#allocation2 + $0x30] sm:$0xff] }
 0x27e   : > { %v1185_v4 = vsel %vm1137_vm4, %v1023_v11, %v1161_v18  ;;  %v1033_v21 = vadd.f32 %v4163_v20, %v5718_v47  ;;  %v1027_v22 = vpop.f32.mrb[15].mxu1  ;;  %v2224_v54 = vld [vmem:[#allocation2 + $0x31] sm:$0xff]  ;;  %vm1308_vm1 = vcmp.eq.s32.totalorder %v5765_v9, 1 }
 0x27f   : > { %v1329_v24 = vsel %vm1305_vm6, %v1185_v4, 0.0  ;;  %v1184_v25 = vsel %vm1136_vm5, %v1018_v15, %v1160_v19  ;;  %v1028_v26 = vadd.f32 %v5718_v47, %v1027_v22  ;;  %v1559_v37 = vld [vmem:[#allocation2 + $0x48] sm:$0xff]  ;;  %vm1311_vm5 = vcmp.eq.s32.totalorder %v5700_v38, 1 }
 0x280   : > { %1353 = vst.msk [vmem:[#allocation2 + $0x68] sm:$0xff] %vm655_vm0, %v1329_v24  ;;  %v1328_v28 = vsel %vm1304_vm7, %v1184_v25, 0.0  ;;  %vm1139_vm8 = vcmp.gt.f32.partialorder %v1033_v21, 0.0  ;;  %v1163_v29 = vmul.f32 0.1, %v1033_v21  ;;  %vm1310_vm6 = vcmp.eq.s32.totalorder %v5778_v27, 1 }
 0x281   : > { %2274 = vrot.lane.b32.xlu1 %v1557_v16, %s4962_s24  ;;  %1352 = vst.msk [vmem:[#allocation2 + $0x60] sm:$0xff] %vm655_vm0, %v1328_v28  ;;  %vm1138_vm9 = vcmp.gt.f32.partialorder %v1028_v26, 0.0  ;;  %v1162_v30 = vmul.f32 0.1, %v1028_v26  ;;  %v4166_v31 = vpop.f32.mrb[16].mxu1  ;;  %2272 = vrot.lane.b32.xlu0 %v2200_v35, %s4962_s24  ;;  %v1558_v18 = vld [vmem:[#allocation2 + $0x40] sm:$0xff] }
 0x282   : > { %v1187_v23 = vsel %vm1139_vm8, %v1033_v21, %v1163_v29  ;;  %v1043_v46 = vadd.f32 %v4166_v31, %v5718_v47  ;;  %v1037_v49 = vpop.f32.mrb[17].mxu1  ;;  %v1581_v20 = vld [vmem:[#allocation2 + $0x39] sm:$0xff]  ;;  %v1282_v21 = vpop.permute.xlu1 %1281  ;;  %v1582_v29 = vld [vmem:[#allocation2 + $0x41] sm:$0xff] }
 0x283   : > { %v1331_v50 = vsel %vm1307_vm10, %v1187_v23, 0.0  ;;  %v1186_v43 = vsel %vm1138_vm9, %v1028_v26, %v1162_v30  ;;  %v1038_v51 = vadd.f32 %v5718_v47, %v1037_v49  ;;  %vm1313_vm9 = vcmp.eq.s32.totalorder %v5702_v39, 1 }
 0x284   : > { %1355 = vst.msk [vmem:[#allocation2 + $0x78] sm:$0xff] %vm655_vm0, %v1331_v50  ;;  %v1330_v52 = vsel %vm1306_vm11, %v1186_v43, 0.0  ;;  %vm1141_vm12 = vcmp.gt.f32.partialorder %v1043_v46, 0.0  ;;  %v1165_v53 = vmul.f32 0.1, %v1043_v46  ;;  %vm1312_vm10 = vcmp.eq.s32.totalorder %v1270_v56, 1 }
 0x285   : > { %1631 = vrot.lane.b32.xlu1 %v2200_v35, %s4962_s24  ;;  %1354 = vst.msk [vmem:[#allocation2 + $0x70] sm:$0xff] %vm655_vm0, %v1330_v52  ;;  %vm1140_vm14 = vcmp.gt.f32.partialorder %v1038_v51, 0.0  ;;  %v1164_v36 = vmul.f32 0.1, %v1038_v51  ;;  %v4169_v55 = vpop.f32.mrb[18].mxu1  ;;  %2368 = vrot.lane.b32.xlu0 %v2224_v54, %s4963_s12  ;;  %v1561_v52 = vld [vmem:[#allocation2 + $0x58] sm:$0xff] }
 0x286   : > { %v1189_v57 = vsel %vm1141_vm12, %v1043_v46, %v1165_v53  ;;  %v1053_v58 = vadd.f32 %v4169_v55, %v5718_v47  ;;  %v1047_v59 = vpop.f32.mrb[19].mxu1  ;;  %v1288_v53 = vpop.permute.xlu1 %1287 }
 0x287   : > { %v1333_v60 = vsel %vm1309_vm15, %v1189_v57, 0.0  ;;  %v1188_v32 = vsel %vm1140_vm14, %v1038_v51, %v1164_v36  ;;  %v1048_v45 = vadd.f32 %v5718_v47, %v1047_v59  ;;  %vm1315_vm14 = vcmp.eq.s32.totalorder %v5704_v1, 1 }
 0x288   : > { %1357 = vst.msk [vmem:[#allocation2 + $0x88] sm:$0xff] %vm655_vm0, %v1333_v60  ;;  %v1332_v62 = vsel %vm1308_vm1, %v1188_v32, 0.0  ;;  %vm1143_vm2 = vcmp.gt.f32.partialorder %v1053_v58, 0.0  ;;  %v1167_v63 = vmul.f32 0.1, %v1053_v58  ;;  %vm1314_vm15 = vcmp.eq.s32.totalorder %v1276_v48, 1 }
 0x289   : > { %1727 = vrot.lane.b32.xlu1 %v2224_v54, %s4963_s12  ;;  %1356 = vst.msk [vmem:[#allocation2 + $0x80] sm:$0xff] %vm655_vm0, %v1332_v62  ;;  %vm1142_vm4 = vcmp.gt.f32.partialorder %v1048_v45, 0.0  ;;  %v1166_v0 = vmul.f32 0.1, %v1048_v45  ;;  %v4172_v2 = vpop.f32.mrb[20].mxu1  ;;  %1637 = vrot.lane.b32.xlu0 %v1559_v37, %s4962_s24 }
 0x28a   : > { %v1191_v3 = vsel %vm1143_vm2, %v1053_v58, %v1167_v63  ;;  %v1063_v5 = vadd.f32 %v4172_v2, %v5718_v47  ;;  %v1057_v6 = vpop.f32.mrb[21].mxu1  ;;  %v1584_v2 = vld [vmem:[#allocation2 + $0x51] sm:$0xff] }
 0x28b   : > { %v1335_v7 = vsel %vm1311_vm5, %v1191_v3, 0.0  ;;  %v1190_v8 = vsel %vm1142_vm4, %v1048_v45, %v1166_v0  ;;  %v1058_v33 = vadd.f32 %v5718_v47, %v1057_v6  ;;  %vm1317_vm4 = vcmp.eq.s32.totalorder %v5706_v40, 1  ;;  %v1583_v3 = vld [vmem:[#allocation2 + $0x49] sm:$0xff]  ;;  %v2206_v6 = vld [vmem:[#allocation2 + $0x60] sm:$0xff] }
 0x28c   : > { %1359 = vst.msk [vmem:[#allocation2 + $0x98] sm:$0xff] %vm655_vm0, %v1335_v7  ;;  %v1334_v9 = vsel %vm1310_vm6, %v1190_v8, 0.0  ;;  %vm1145_vm7 = vcmp.gt.f32.partialorder %v1063_v5, 0.0  ;;  %v1169_v10 = vmul.f32 0.1, %v1063_v5  ;;  %vm1316_vm5 = vcmp.eq.s32.totalorder %v1282_v21, 1 }
 0x28d   : > { %2278 = vrot.lane.b32.xlu1 %v1559_v37, %s4962_s24  ;;  %1358 = vst.msk [vmem:[#allocation2 + $0x90] sm:$0xff] %vm655_vm0, %v1334_v9  ;;  %vm1144_vm8 = vcmp.gt.f32.partialorder %v1058_v33, 0.0  ;;  %v1168_v38 = vmul.f32 0.1, %v1058_v33  ;;  %v4175_v11 = vpop.f32.mrb[22].mxu1  ;;  %2918 = vrot.lane.b32.xlu0 %v1559_v37, %s4962_s24  ;;  %v1560_v37 = vld [vmem:[#allocation2 + $0x50] sm:$0xff] }
 0x28e   : > { %v1193_v12 = vsel %vm1145_vm7, %v1063_v5, %v1169_v10  ;;  %v1073_v13 = vadd.f32 %v4175_v11, %v5718_v47  ;;  %v1067_v14 = vpop.f32.mrb[23].mxu1  ;;  %v1586_v5 = vld [vmem:[#allocation2 + $0x61] sm:$0xff]  ;;  %v2209_v7 = vld [vmem:[#allocation2 + $0x78] sm:$0xff]  ;;  %v1564_v8 = vld [vmem:[#allocation2 + $0x70] sm:$0xff] }
 0x28f   : > { %v1337_v15 = vsel %vm1313_vm9, %v1193_v12, 0.0  ;;  %v1192_v16 = vsel %vm1144_vm8, %v1058_v33, %v1168_v38  ;;  %v1068_v17 = vadd.f32 %v5718_v47, %v1067_v14  ;;  %vm1319_vm8 = vcmp.eq.s32.totalorder %v5708_v41, 1  ;;  %v1588_v33 = vld [vmem:[#allocation2 + $0x71] sm:$0xff]  ;;  %v2231_v48 = vld [vmem:[#allocation2 + $0x69] sm:$0xff] }
 0x290   : > { %1361 = vst.msk [vmem:[#allocation2 + $0xa8] sm:$0xff] %vm655_vm0, %v1337_v15  ;;  %v1336_v34 = vsel %vm1312_vm10, %v1192_v16, 0.0  ;;  %vm1147_vm11 = vcmp.gt.f32.partialorder %v1073_v13, 0.0  ;;  %v1171_v19 = vmul.f32 0.1, %v1073_v13  ;;  %vm1318_vm9 = vcmp.eq.s32.totalorder %v1288_v53, 1 }
 0x291   : > { %1635 = vrot.lane.b32.xlu1 %v1558_v18, %s4962_s24  ;;  %1360 = vst.msk [vmem:[#allocation2 + $0xa0] sm:$0xff] %vm655_vm0, %v1336_v34  ;;  %vm1146_vm12 = vcmp.gt.f32.partialorder %v1068_v17, 0.0  ;;  %v1170_v39 = vmul.f32 0.1, %v1068_v17  ;;  %v4178_v4 = vpop.f32.mrb[24].mxu1  ;;  %1729 = vrot.lane.b32.xlu0 %v1581_v20, %s4963_s12  ;;  %v2211_v9 = vld [vmem:[#allocation2 + $0x88] sm:$0xff] }
 0x292   : > { %v1195_v22 = vsel %vm1147_vm11, %v1073_v13, %v1171_v19  ;;  %v1083_v24 = vadd.f32 %v4178_v4, %v5718_v47  ;;  %v1077_v25 = vpop.f32.mrb[25].mxu1  ;;  %v1566_v10 = vld [vmem:[#allocation2 + $0x80] sm:$0xff]  ;;  %v1529_v12 = vld [vmem:[#allocation2 + $0x17] sm:$0xff] }
 0x293   : > { %v1339_v26 = vsel %vm1315_vm14, %v1195_v22, 0.0  ;;  %v1194_v27 = vsel %vm1146_vm12, %v1068_v17, %v1170_v39  ;;  %v1078_v28 = vadd.f32 %v5718_v47, %v1077_v25  ;;  %vm1321_vm12 = vcmp.eq.s32.totalorder %v5714_v44, 1  ;;  %v1585_v44 = vld [vmem:[#allocation2 + $0x59] sm:$0xff]  ;;  %v1590_v11 = vld [vmem:[#allocation2 + $0x81] sm:$0xff] }
 0x294   : > { %1363 = vst.msk [vmem:[#allocation2 + $0xb8] sm:$0xff] %vm655_vm0, %v1339_v26  ;;  %v1338_v35 = vsel %vm1314_vm15, %v1194_v27, 0.0  ;;  %vm1149_vm1 = vcmp.gt.f32.partialorder %v1083_v24, 0.0  ;;  %v1173_v30 = vmul.f32 0.1, %v1083_v24  ;;  %vm1320_vm14 = vcmp.eq.s32.totalorder %v5710_v42, 1 }
 0x295   : > { %1731 = vrot.lane.b32.xlu1 %v1582_v29, %s4963_s12  ;;  %1362 = vst.msk [vmem:[#allocation2 + $0xb0] sm:$0xff] %vm655_vm0, %v1338_v35  ;;  %vm1148_vm2 = vcmp.gt.f32.partialorder %v1078_v28, 0.0  ;;  %v1172_v1 = vmul.f32 0.1, %v1078_v28  ;;  %v4181_v31 = vpop.f32.mrb[26].mxu1  ;;  %2370 = vrot.lane.b32.xlu0 %v1581_v20, %s4963_s12  ;;  %v2207_v42 = vld [vmem:[#allocation2 + $0x68] sm:$0xff] }
 0x296   : > { %v1197_v23 = vsel %vm1149_vm1, %v1083_v24, %v1173_v30  ;;  %v1093_v46 = vadd.f32 %v4181_v31, %v5718_v47  ;;  %v1087_v49 = vpop.f32.mrb[27].mxu1  ;;  %vm1866_vm15 = vcmask 48128   ;;  %v2233_v17 = vld [vmem:[#allocation2 + $0x79] sm:$0xff]  ;;  %v1531_v4 = vld [vmem:[#allocation2 + $0x27] sm:$0xff]  ;;  %v1568_v31 = vld [vmem:[#allocation2 + $0x90] sm:$0xff] }
 0x297   : > { %v1341_v50 = vsel %vm1317_vm4, %v1197_v23, 0.0  ;;  %v1196_v43 = vsel %vm1148_vm2, %v1078_v28, %v1172_v1  ;;  %v1088_v51 = vadd.f32 %v5718_v47, %v1087_v49  ;;  %v2213_v28 = vld [vmem:[#allocation2 + $0x98] sm:$0xff] }
 0x298   : > { %1365 = vst.msk [vmem:[#allocation2 + $0xc8] sm:$0xff] %vm655_vm0, %v1341_v50  ;;  %v1340_v54 = vsel %vm1316_vm5, %v1196_v43, 0.0  ;;  %vm1151_vm6 = vcmp.gt.f32.partialorder %v1093_v46, 0.0  ;;  %v1175_v36 = vmul.f32 0.1, %v1093_v46 }
 0x299   : > { %1641 = vrot.lane.b32.xlu1 %v1561_v52, %s4962_s24  ;;  %1364 = vst.msk [vmem:[#allocation2 + $0xc0] sm:$0xff] %vm655_vm0, %v1340_v54  ;;  %vm1150_vm7 = vcmp.gt.f32.partialorder %v1088_v51, 0.0  ;;  %v1174_v40 = vmul.f32 0.1, %v1088_v51  ;;  %v4184_v55 = vpop.f32.mrb[28].mxu1  ;;  %2276 = vrot.lane.b32.xlu0 %v1558_v18, %s4962_s24  ;;  %v1530_v18 = vld [vmem:[#allocation2 + $0x1f] sm:$0xff] }
 0x29a   : > { %v1199_v56 = vsel %vm1151_vm6, %v1093_v46, %v1175_v36  ;;  %v1103_v57 = vadd.f32 %v4184_v55, %v5718_v47  ;;  %v1097_v58 = vpop.f32.mrb[29].mxu1  ;;  %v2235_v54 = vld [vmem:[#allocation2 + $0x89] sm:$0xff]  ;;  %v1533_v36 = vld [vmem:[#allocation2 + $0x37] sm:$0xff] }
 0x29b   : > { %v1343_v59 = vsel %vm1319_vm8, %v1199_v56, 0.0  ;;  %v1198_v60 = vsel %vm1150_vm7, %v1088_v51, %v1174_v40  ;;  %v1098_v32 = vadd.f32 %v5718_v47, %v1097_v58  ;;  %v1592_v51 = vld [vmem:[#allocation2 + $0x91] sm:$0xff]  ;;  %v1534_v58 = vld [vmem:[#allocation2 + $0x3f] sm:$0xff] }
 0x29c   : > { %1367 = vst.msk [vmem:[#allocation2 + $0xd8] sm:$0xff] %vm655_vm0, %v1343_v59  ;;  %v1342_v45 = vsel %vm1318_vm9, %v1198_v60, 0.0  ;;  %vm1153_vm10 = vcmp.gt.f32.partialorder %v1103_v57, 0.0  ;;  %v1177_v61 = vmul.f32 0.1, %v1103_v57 }
 0x29d   : > { %2282 = vrot.lane.b32.xlu1 %v1561_v52, %s4962_s24  ;;  %1366 = vst.msk [vmem:[#allocation2 + $0xd0] sm:$0xff] %vm655_vm0, %v1342_v45  ;;  %vm1152_vm11 = vcmp.gt.f32.partialorder %v1098_v32, 0.0  ;;  %v1176_v41 = vmul.f32 0.1, %v1098_v32  ;;  %2372 = vrot.lane.b32.xlu0 %v1582_v29, %s4963_s12  ;;  %v2176_v29 = vld [vmem:[#allocation2 + $0x2f] sm:$0xff] }
 0x29e   : > { %v1201_v62 = vsel %vm1153_vm10, %v1103_v57, %v1177_v61 }
 0x29f   : > { %v1345_v63 = vsel %vm1321_vm12, %v1201_v62, 0.0  ;;  %v1200_v47 = vsel %vm1152_vm11, %v1098_v32, %v1176_v41 }
 0x2a0   : > { %1369 = vst.msk [vmem:[#allocation2 + $0xe8] sm:$0xff] %vm655_vm0, %v1345_v63  ;;  %v1344_v0 = vsel %vm1320_vm14, %v1200_v47, 0.0  ;;  %v2215_v47 = vld [vmem:[#allocation2 + $0xa8] sm:$0xff] }
 0x2a1   : > { %1639 = vrot.lane.b32.xlu1 %v1560_v37, %s4962_s24  ;;  %1368 = vst.msk [vmem:[#allocation2 + $0xe0] sm:$0xff] %vm655_vm0, %v1344_v0  ;;  %2922 = vrot.lane.b32.xlu0 %v1561_v52, %s4962_s24 }
 0x2a5   : > { %1735 = vrot.lane.b32.xlu1 %v1584_v2, %s4963_s12  ;;  %1733 = vrot.lane.b32.xlu0 %v1583_v3, %s4963_s12 }
 0x2a9   : > { %2920 = vrot.lane.b32.xlu1 %v1560_v37, %s4962_s24  ;;  %2374 = vrot.lane.b32.xlu0 %v1583_v3, %s4963_s12 }
 0x2ad   : > { %2286 = vrot.lane.b32.xlu1 %v2207_v42, %s4962_s24  ;;  %2280 = vrot.lane.b32.xlu0 %v1560_v37, %s4962_s24 }
 0x2b1   : > { %1737 = vrot.lane.b32.xlu1 %v1585_v44, %s4963_s12  ;;  %2376 = vrot.lane.b32.xlu0 %v1584_v2, %s4963_s12 }
 0x2b5   : > { %1739 = vrot.lane.b32.xlu1 %v1586_v5, %s4963_s12  ;;  %3014 = vrot.lane.b32.xlu0 %v1583_v3, %s4963_s12  ;;  %v1570_v3 = vld [vmem:[#allocation2 + $0xa0] sm:$0xff] }
 0x2b9   : > { %2378 = vrot.lane.b32.xlu1 %v1585_v44, %s4963_s12  ;;  %3016 = vrot.lane.b32.xlu0 %v1584_v2, %s4963_s12 }
 0x2bd   : > { %2284 = vrot.lane.b32.xlu1 %v2206_v6, %s4962_s24  ;;  %1645 = vrot.lane.b32.xlu0 %v2207_v42, %s4962_s24 }
 0x2c1   : > { %2924 = vrot.lane.b32.xlu1 %v2206_v6, %s4962_s24  ;;  %2926 = vrot.lane.b32.xlu0 %v2207_v42, %s4962_s24 }
 0x2c5   : > { %2290 = vrot.lane.b32.xlu1 %v2209_v7, %s4962_s24  ;;  %1643 = vrot.lane.b32.xlu0 %v2206_v6, %s4962_s24  ;;  %v1594_v6 = vld [vmem:[#allocation2 + $0xa1] sm:$0xff] }
 0x2c9   : > { %1647 = vrot.lane.b32.xlu1 %v1564_v8, %s4962_s24  ;;  %2380 = vrot.lane.b32.xlu0 %v1586_v5, %s4963_s12 }
 0x2cd   : > { %1743 = vrot.lane.b32.xlu1 %v1588_v33, %s4963_s12  ;;  %3018 = vrot.lane.b32.xlu0 %v1585_v44, %s4963_s12 }
 0x2d1   : > { %2382 = vrot.lane.b32.xlu1 %v2231_v48, %s4963_s12  ;;  %3020 = vrot.lane.b32.xlu0 %v1586_v5, %s4963_s12 }
 0x2d5   : > { %2288 = vrot.lane.b32.xlu1 %v1564_v8, %s4962_s24  ;;  %1649 = vrot.lane.b32.xlu0 %v2209_v7, %s4962_s24 }
 0x2d9   : > { %2928 = vrot.lane.b32.xlu1 %v1564_v8, %s4962_s24  ;;  %2930 = vrot.lane.b32.xlu0 %v2209_v7, %s4962_s24  ;;  %v5933_v7 = vld [vmem:[#allocation2 + $0x47] sm:$0xff] }
 0x2dd   : > { %2294 = vrot.lane.b32.xlu1 %v2211_v9, %s4962_s24  ;;  %1741 = vrot.lane.b32.xlu0 %v2231_v48, %s4963_s12 }
 0x2e1   : > { %1651 = vrot.lane.b32.xlu1 %v1566_v10, %s4962_s24  ;;  %2384 = vrot.lane.b32.xlu0 %v1588_v33, %s4963_s12 }
 0x2e2   : > { %v1626_v38 = vpop.permute.xlu1 %1625 }
 0x2e3   : > { %v1793_v13 = vsel %vm655_vm0, %v1529_v12, %v1626_v38 }
 0x2e5   : > { %1747 = vrot.lane.b32.xlu1 %v1590_v11, %s4963_s12  ;;  %3022 = vrot.lane.b32.xlu0 %v2231_v48, %s4963_s12  ;;  %v5937_v48 = vld [vmem:[#allocation2 + $0x4f] sm:$0xff] }
 0x2e6   : > { %v1722_v14 = vpop.permute.xlu1 %1721 }
 0x2e7   : > { %v1628_v15 = vpop.permute.xlu0 %1627  ;;  %v1817_v16 = vsel %vm674_vm3, %v1793_v13, %v1722_v14 }
 0x2e8   : > { %4198 = vmatprep.mubr.msk.f32.mxu0 %vm1866_vm15, %v1817_v16  ;;  %v1794_v34 = vsel %vm655_vm0, %v1530_v18, %v1628_v15 }
 0x2e9   : > { %2386 = vrot.lane.b32.xlu1 %v2233_v17, %s4963_s12  ;;  %3024 = vrot.lane.b32.xlu0 %v1588_v33, %s4963_s12 }
 0x2eb   : > { %v1724_v19 = vpop.permute.xlu0 %1723  ;;  %v1630_v20 = vpop.permute.xlu1 %1629 }
 0x2ec   : > { %v1818_v39 = vsel %vm674_vm3, %v1794_v34, %v1724_v19  ;;  %v1795_v22 = vsel %vm655_vm0, %v1531_v4, %v1630_v20  ;;  %v5958_v34 = vld [vmem:[#allocation2 + $0x57] sm:$0xff] }
 0x2ed   : > { %4199 = vmatmul.mubr.msk.f32.vlgmr.msra.gmra.mrb[6].mxu0 %vm1866_vm15, %v1818_v39  ;;  %2292 = vrot.lane.b32.xlu1 %v1566_v10, %s4962_s24 }
 0x2ee   : > { %1653 = vrot.lane.b32.xlu0 %v2211_v9, %s4962_s24 }
 0x2ef   : > { %v1634_v21 = vpop.permute.xlu1 %1633  ;;  %v1726_v24 = vpop.permute.xlu0 %1725 }
 0x2f0   : > { %v1819_v25 = vsel %vm674_vm3, %v1795_v22, %v1726_v24  ;;  %v1797_v55 = vsel %vm655_vm0, %v1533_v36, %v1634_v21  ;;  %v5966_v22 = vld [vmem:[#allocation2 + $0xb8] sm:$0xff] }
 0x2f1   : > { %2932 = vrot.lane.b32.xlu1 %v1566_v10, %s4962_s24  ;;  %4201 = vmatprep.mubr.msk.f32.mxu0 %vm1866_vm15, %v1819_v25  ;;  %v2237_v10 = vld [vmem:[#allocation2 + $0x99] sm:$0xff] }
 0x2f2   : > { %2934 = vrot.lane.b32.xlu0 %v2211_v9, %s4962_s24 }
 0x2f3   : > { %v2275_v26 = vpop.permute.xlu1 %2274  ;;  %v2273_v27 = vpop.permute.xlu0 %2272 }
 0x2f4   : > { %v2440_v30 = vsel %vm655_vm0, %v2176_v29, %v2273_v27  ;;  %v2441_v32 = vsel %vm655_vm0, %v1533_v36, %v2275_v26 }
 0x2f5   : > { %2298 = vrot.lane.b32.xlu1 %v2213_v28, %s4962_s24 }
 0x2f6   : > { %1745 = vrot.lane.b32.xlu0 %v2233_v17, %s4963_s12 }
 0x2f7   : > { %v1632_v35 = vpop.permute.xlu1 %1631  ;;  %v2369_v1 = vpop.permute.xlu0 %2368 }
 0x2f8   : > { %v2464_v23 = vsel %vm674_vm3, %v2440_v30, %v2369_v1  ;;  %v1796_v46 = vsel %vm655_vm0, %v2176_v29, %v1632_v35  ;;  %v1572_v30 = vld [vmem:[#allocation2 + $0xb0] sm:$0xff] }
 0x2f9   : > { %1655 = vrot.lane.b32.xlu1 %v1568_v31, %s4962_s24  ;;  %4236 = vmatprep.mubr.msk.f32.mxu1 %vm1866_vm15, %v2464_v23  ;;  %v1596_v23 = vld [vmem:[#allocation2 + $0xb1] sm:$0xff] }
 0x2fa   : > { %2388 = vrot.lane.b32.xlu0 %v1590_v11, %s4963_s12 }
 0x2fb   : > { %v1728_v49 = vpop.permute.xlu1 %1727  ;;  %v1638_v43 = vpop.permute.xlu0 %1637 }
 0x2fc   : > { %v1820_v50 = vsel %vm674_vm3, %v1796_v46, %v1728_v49  ;;  %v1799_v33 = vsel %vm655_vm0, %v5933_v7, %v1638_v43  ;;  %v3159_v46 = vld [vmem:[#allocation18 + $0x10] sm:$0x3f]  ;;  %v2239_v43 = vld [vmem:[#allocation2 + $0xa9] sm:$0xff] }
 0x2fd   : > { %1751 = vrot.lane.b32.xlu1 %v1592_v51, %s4963_s12  ;;  %4202 = vmatmul.mubr.msk.f32.gmra.mrb[8].mxu0 %vm1866_vm15, %v1820_v50 }
 0x2fe   : > { %3026 = vrot.lane.b32.xlu0 %v2233_v17, %s4963_s12  ;;  %4272 = vmatprep.subr.msk.mxu0 %vm1939_vm13, %v3159_v46 }
 0x2ff   : > { %v2279_v52 = vpop.permute.xlu1 %2278  ;;  %v5905_v53 = vpop.permute.xlu0 %2918  ;;  %4273 = vmatpush3.msk.msra.mxu0 %vm1939_vm13, %v3159_v46 }
 0x300   : > { %v2443_v14 = vsel %vm655_vm0, %v5933_v7, %v2279_v52  ;;  %v2182_v52 = vld [vmem:[#allocation2 + $0x5f] sm:$0xff] }
 0x301   : > { %2390 = vrot.lane.b32.xlu1 %v2235_v54, %s4963_s12 }
 0x302   : > { %3028 = vrot.lane.b32.xlu0 %v1590_v11, %s4963_s12 }
 0x303   : > { %v1636_v40 = vpop.permute.xlu1 %1635  ;;  %v1730_v56 = vpop.permute.xlu0 %1729 }
 0x304   : > { %v1821_v57 = vsel %vm674_vm3, %v1797_v55, %v1730_v56  ;;  %v1798_v59 = vsel %vm655_vm0, %v1534_v58, %v1636_v40  ;;  %v3948_v55 = vld [vmem:[#allocation19] ss:$0 sm:$0xff] }
 0x305   : > { %2296 = vrot.lane.b32.xlu1 %v1568_v31, %s4962_s24  ;;  %4204 = vmatprep.mubr.msk.f32.mxu0 %vm1866_vm15, %v1821_v57  ;;  %1506 = vst.msk [vmem:[#allocation3 + $0x8] sm:$0xff] %vm674_vm3, %v3948_v55  ;;  %1505 = vst.msk [vmem:[#allocation3] sm:$0xff] %vm674_vm3, %v3948_v55 }
 0x306   : > { %1657 = vrot.lane.b32.xlu0 %v2213_v28, %s4962_s24  ;;  %1507 = vst.msk [vmem:[#allocation3 + $0x10] sm:$0xff] %vm674_vm3, %v3948_v55  ;;  %1508 = vst.msk [vmem:[#allocation3 + $0x18] sm:$0xff] %vm674_vm3, %v3948_v55 }
 0x307   : > { %v1732_v60 = vpop.permute.xlu1 %1731  ;;  %v2371_v61 = vpop.permute.xlu0 %2370  ;;  %1509 = vst.msk [vmem:[#allocation3 + $0x20] sm:$0xff] %vm674_vm3, %v3948_v55  ;;  %1510 = vst.msk [vmem:[#allocation3 + $0x28] sm:$0xff] %vm674_vm3, %v3948_v55 }
 0x308   : > { %v1822_v45 = vsel %vm674_vm3, %v1798_v59, %v1732_v60  ;;  %v2465_v41 = vsel %vm674_vm3, %v2441_v32, %v2371_v61  ;;  %1511 = vst.msk [vmem:[#allocation3 + $0x30] sm:$0xff] %vm674_vm3, %v3948_v55  ;;  %1512 = vst.msk [vmem:[#allocation3 + $0x38] sm:$0xff] %vm674_vm3, %v3948_v55  ;;  %v6038_v61 = vld [vmem:[#allocation2 + $0xc8] sm:$0xff] }
 0x309   : > { %2936 = vrot.lane.b32.xlu1 %v1568_v31, %s4962_s24  ;;  %4205 = vmatmul.mubr.msk.f32.gmra.mrb[10].mxu0 %vm1866_vm15, %v1822_v45  ;;  %1513 = vst.msk [vmem:[#allocation3 + $0x40] sm:$0xff] %vm674_vm3, %v3948_v55  ;;  %1514 = vst.msk [vmem:[#allocation3 + $0x48] sm:$0xff] %vm674_vm3, %v3948_v55 }
 0x30a   : > { %2938 = vrot.lane.b32.xlu0 %v2213_v28, %s4962_s24  ;;  %4237 = vmatmul.mubr.msk.f32.vlgmr.msra.gmra.mrb[30].mxu1 %vm1866_vm15, %v2465_v41  ;;  %1515 = vst.msk [vmem:[#allocation3 + $0x50] sm:$0xff] %vm674_vm3, %v3948_v55  ;;  %1516 = vst.msk [vmem:[#allocation3 + $0x58] sm:$0xff] %vm674_vm3, %v3948_v55 }
 0x30b   : > { %v1642_v62 = vpop.permute.xlu1 %1641  ;;  %v2277_v63 = vpop.permute.xlu0 %2276  ;;  %1517 = vst.msk [vmem:[#allocation3 + $0x60] sm:$0xff] %vm674_vm3, %v3948_v55  ;;  %1518 = vst.msk [vmem:[#allocation3 + $0x68] sm:$0xff] %vm674_vm3, %v3948_v55 }
 0x30c   : > { %v2442_v0 = vsel %vm655_vm0, %v1534_v58, %v2277_v63  ;;  %v1801_v19 = vsel %vm655_vm0, %v5958_v34, %v1642_v62  ;;  %1519 = vst.msk [vmem:[#allocation3 + $0x70] sm:$0xff] %vm674_vm3, %v3948_v55  ;;  %1520 = vst.msk [vmem:[#allocation3 + $0x78] sm:$0xff] %vm674_vm3, %v3948_v55  ;;  %v2183_v62 = vld [vmem:[#allocation2 + $0x67] sm:$0xff] }
 0x30d   : > { %2302 = vrot.lane.b32.xlu1 %v2215_v47, %s4962_s24  ;;  %1521 = vst.msk [vmem:[#allocation3 + $0x80] sm:$0xff] %vm674_vm3, %v3948_v55  ;;  %1522 = vst.msk [vmem:[#allocation3 + $0x88] sm:$0xff] %vm674_vm3, %v3948_v55 }
 0x30e   : > { %1749 = vrot.lane.b32.xlu0 %v2235_v54, %s4963_s12  ;;  %1523 = vst.msk [vmem:[#allocation3 + $0x90] sm:$0xff] %vm674_vm3, %v3948_v55  ;;  %1524 = vst.msk [vmem:[#allocation3 + $0x98] sm:$0xff] %vm674_vm3, %v3948_v55 }
 0x30f   : > { %v2283_v37 = vpop.permute.xlu1 %2282  ;;  %v2373_v2 = vpop.permute.xlu0 %2372  ;;  %1525 = vst.msk [vmem:[#allocation3 + $0xa0] sm:$0xff] %vm674_vm3, %v3948_v55  ;;  %1526 = vst.msk [vmem:[#allocation3 + $0xa8] sm:$0xff] %vm674_vm3, %v3948_v55 }
 0x310   : > { %v2466_v42 = vsel %vm674_vm3, %v2442_v0, %v2373_v2  ;;  %v2445_v27 = vsel %vm655_vm0, %v5958_v34, %v2283_v37  ;;  %1527 = vst.msk [vmem:[#allocation3 + $0xb0] sm:$0xff] %vm674_vm3, %v3948_v55  ;;  %1528 = vst.msk [vmem:[#allocation3 + $0xb8] sm:$0xff] %vm674_vm3, %v3948_v55 }
 0x311   : > { %1659 = vrot.lane.b32.xlu1 %v1570_v3, %s4962_s24  ;;  %4239 = vmatprep.mubr.msk.f32.mxu1 %vm1866_vm15, %v2466_v42  ;;  %v1597_v42 = vld [vmem:[#allocation2 + $0xb9] sm:$0xff] }
 0x312   : > { %2392 = vrot.lane.b32.xlu0 %v1592_v51, %s4963_s12 }
 0x313   : > { %v1640_v44 = vpop.permute.xlu1 %1639  ;;  %v5929_v5 = vpop.permute.xlu0 %2922 }
 0x314   : > { %v1800_v38 = vsel %vm655_vm0, %v5937_v48, %v1640_v44  ;;  %v3088_v32 = vsel %vm655_vm0, %v5958_v34, %v5929_v5 }
 0x315   : > { %1755 = vrot.lane.b32.xlu1 %v1594_v6, %s4963_s12 }
 0x316   : > { %3030 = vrot.lane.b32.xlu0 %v2235_v54, %s4963_s12 }
 0x317   : > { %v1736_v8 = vpop.permute.xlu1 %1735  ;;  %v1734_v9 = vpop.permute.xlu0 %1733 }
 0x318   : > { %v1823_v11 = vsel %vm674_vm3, %v1799_v33, %v1734_v9  ;;  %v1824_v12 = vsel %vm674_vm3, %v1800_v38, %v1736_v8  ;;  %v2242_v8 = vld [vmem:[#allocation2 + $0xc1] sm:$0xff]  ;;  %v1540_v33 = vld [vmem:[#allocation2 + $0x6f] sm:$0xff] }
 0x319   : > { %2394 = vrot.lane.b32.xlu1 %v2237_v10, %s4963_s12  ;;  %4207 = vmatprep.mubr.msk.f32.mxu0 %vm1866_vm15, %v1823_v11 }
 0x31a   : > { %3032 = vrot.lane.b32.xlu0 %v1592_v51, %s4963_s12  ;;  %4208 = vmatmul.mubr.msk.f32.gmra.mrb[12].mxu0 %vm1866_vm15, %v1824_v12 }
 0x31b   : > { %v5946_v13 = vpop.permute.xlu1 %2920  ;;  %v2375_v15 = vpop.permute.xlu0 %2374 }
 0x31c   : > { %v2467_v16 = vsel %vm674_vm3, %v2443_v14, %v2375_v15  ;;  %v1599_v14 = vld [vmem:[#allocation2 + $0xc9] sm:$0xff] }
 0x31d   : > { %2300 = vrot.lane.b32.xlu1 %v1570_v3, %s4962_s24  ;;  %4240 = vmatmul.mubr.msk.f32.gmra.mrb[32].mxu1 %vm1866_vm15, %v2467_v16 }
 0x31e   : > { %1661 = vrot.lane.b32.xlu0 %v2215_v47, %s4962_s24 }
 0x31f   : > { %v5955_v17 = vpop.permute.xlu1 %2286  ;;  %v2281_v18 = vpop.permute.xlu0 %2280 }
 0x320   : > { %v2444_v39 = vsel %vm655_vm0, %v5937_v48, %v2281_v18  ;;  %v2447_v63 = vsel %vm655_vm0, %v2183_v62, %v5955_v17 }
 0x321   : > { %2940 = vrot.lane.b32.xlu1 %v1570_v3, %s4962_s24 }
 0x322   : > { %2942 = vrot.lane.b32.xlu0 %v2215_v47, %s4962_s24 }
 0x323   : > { %v1738_v20 = vpop.permute.xlu1 %1737  ;;  %v2377_v21 = vpop.permute.xlu0 %2376 }
 0x324   : > { %v1825_v4 = vsel %vm674_vm3, %v1801_v19, %v1738_v20  ;;  %v2468_v24 = vsel %vm674_vm3, %v2444_v39, %v2377_v21 }
 0x325   : > { %1665 = vrot.lane.b32.xlu1 %v5966_v22, %s4962_s24  ;;  %4210 = vmatprep.mubr.msk.f32.mxu0 %vm1866_vm15, %v1825_v4 }
 0x326   : > { %1753 = vrot.lane.b32.xlu0 %v2237_v10, %s4963_s12  ;;  %4242 = vmatprep.mubr.msk.f32.mxu1 %vm1866_vm15, %v2468_v24 }
 0x327   : > { %v1740_v25 = vpop.permute.xlu1 %1739  ;;  %v5974_v26 = vpop.permute.xlu0 %3014 }
 0x329   : > { %2306 = vrot.lane.b32.xlu1 %v5966_v22, %s4962_s24 }
 0x32a   : > { %2396 = vrot.lane.b32.xlu0 %v1594_v6, %s4963_s12 }
 0x32b   : > { %v2379_v28 = vpop.permute.xlu1 %2378  ;;  %v5982_v35 = vpop.permute.xlu0 %3016 }
 0x32c   : > { %v2469_v29 = vsel %vm674_vm3, %v2445_v27, %v2379_v28  ;;  %v1576_v27 = vld [vmem:[#allocation2 + $0xd0] sm:$0xff] }
 0x32d   : > { %1663 = vrot.lane.b32.xlu1 %v1572_v30, %s4962_s24  ;;  %4243 = vmatmul.mubr.msk.f32.gmra.mrb[34].mxu1 %vm1866_vm15, %v2469_v29 }
 0x32e   : > { %3034 = vrot.lane.b32.xlu0 %v2237_v10, %s4963_s12  ;;  %v2185_v10 = vld [vmem:[#allocation2 + $0x77] sm:$0xff] }
 0x32f   : > { %v2285_v1 = vpop.permute.xlu1 %2284  ;;  %v5987_v31 = vpop.permute.xlu0 %1645 }
 0x330   : > { %v2446_v57 = vsel %vm655_vm0, %v2182_v52, %v2285_v1  ;;  %v1803_v16 = vsel %vm655_vm0, %v2183_v62, %v5987_v31 }
 0x331   : > { %1759 = vrot.lane.b32.xlu1 %v1596_v23, %s4963_s12 }
 0x332   : > { %3036 = vrot.lane.b32.xlu0 %v1594_v6, %s4963_s12  ;;  %v1574_v6 = vld [vmem:[#allocation2 + $0xc0] sm:$0xff] }
 0x333   : > { %v2925_v49 = vpop.permute.xlu1 %2924  ;;  %v5993_v50 = vpop.permute.xlu0 %2926 }
 0x334   : > { %v3089_v37 = vsel %vm655_vm0, %v2182_v52, %v2925_v49 }
 0x335   : > { %2398 = vrot.lane.b32.xlu1 %v2239_v43, %s4963_s12 }
 0x336   : > { %1757 = vrot.lane.b32.xlu0 %v2239_v43, %s4963_s12 }
 0x337   : > { %v5997_v51 = vpop.permute.xlu1 %2290  ;;  %v1644_v54 = vpop.permute.xlu0 %1643 }
 0x338   : > { %v1802_v36 = vsel %vm655_vm0, %v2182_v52, %v1644_v54  ;;  %v2449_v29 = vsel %vm655_vm0, %v2185_v10, %v5997_v51  ;;  %v2187_v52 = vld [vmem:[#allocation2 + $0x87] sm:$0xff] }
 0x339   : > { %2304 = vrot.lane.b32.xlu1 %v1572_v30, %s4962_s24  ;;  %v1826_v40 = vsel %vm674_vm3, %v1802_v36, %v1740_v25 }
 0x33a   : > { %2400 = vrot.lane.b32.xlu0 %v1596_v23, %s4963_s12  ;;  %4211 = vmatmul.mubr.msk.f32.gmra.mrb[14].mxu0 %vm1866_vm15, %v1826_v40 }
 0x33b   : > { %v6003_v56 = vpop.permute.xlu1 %1647  ;;  %v2381_v58 = vpop.permute.xlu0 %2380 }
 0x33c   : > { %v2470_v59 = vsel %vm674_vm3, %v2446_v57, %v2381_v58  ;;  %v1804_v18 = vsel %vm655_vm0, %v1540_v33, %v6003_v56 }
 0x33d   : > { %2944 = vrot.lane.b32.xlu1 %v1572_v30, %s4962_s24  ;;  %4245 = vmatprep.mubr.msk.f32.mxu1 %vm1866_vm15, %v2470_v59 }
 0x33e   : > { %3038 = vrot.lane.b32.xlu0 %v2239_v43, %s4963_s12  ;;  %v1542_v43 = vld [vmem:[#allocation2 + $0x7f] sm:$0xff] }
 0x33f   : > { %v1744_v60 = vpop.permute.xlu1 %1743  ;;  %v3019_v45 = vpop.permute.xlu0 %3018 }
 0x340   : > { %v6041_v41 = vsel %vm674_vm3, %v3088_v32, %v3019_v45  ;;  %v1828_v19 = vsel %vm674_vm3, %v1804_v18, %v1744_v60 }
 0x341   : > { %1669 = vrot.lane.b32.xlu1 %v6038_v61, %s4962_s24 }
 0x342   : > { %3040 = vrot.lane.b32.xlu0 %v1596_v23, %s4963_s12  ;;  %v1600_v23 = vld [vmem:[#allocation2 + $0xd1] sm:$0xff] }
 0x343   : > { %v2383_v47 = vpop.permute.xlu1 %2382  ;;  %v3021_v2 = vpop.permute.xlu0 %3020 }
 0x344   : > { %v2471_v0 = vsel %vm674_vm3, %v2447_v63, %v2383_v47  ;;  %v6051_v3 = vsel %vm674_vm3, %v3089_v37, %v3021_v2  ;;  %v2246_v47 = vld [vmem:[#allocation2 + $0xe1] sm:$0xff]  ;;  %v2245_v2 = vld [vmem:[#allocation2 + $0xd9] sm:$0xff] }
 0x345   : > { %2310 = vrot.lane.b32.xlu1 %v6038_v61, %s4962_s24  ;;  %4246 = vmatmul.mubr.msk.f32.gmra.mrb[36].mxu1 %vm1866_vm15, %v2471_v0 }
 0x346   : > { %1761 = vrot.lane.b32.xlu0 %v1597_v42, %s4963_s12 }
 0x347   : > { %v2289_v44 = vpop.permute.xlu1 %2288  ;;  %v1650_v5 = vpop.permute.xlu0 %1649 }
 0x348   : > { %v2448_v39 = vsel %vm655_vm0, %v1540_v33, %v2289_v44  ;;  %v1805_v56 = vsel %vm655_vm0, %v2185_v10, %v1650_v5 }
 0x349   : > { %1667 = vrot.lane.b32.xlu1 %v1574_v6, %s4962_s24 }
 0x34a   : > { %2404 = vrot.lane.b32.xlu0 %v2242_v8, %s4963_s12 }
 0x34b   : > { %v2929_v9 = vpop.permute.xlu1 %2928  ;;  %v2931_v11 = vpop.permute.xlu0 %2930 }
 0x34c   : > { %v3091_v38 = vsel %vm655_vm0, %v1540_v33, %v2929_v9  ;;  %v6061_v12 = vsel %vm655_vm0, %v2185_v10, %v2931_v11  ;;  %v2866_v11 = vld [vmem:[#allocation2 + $0xe8] sm:$0xff] }
 0x34d   : > { %1763 = vrot.lane.b32.xlu1 %v2242_v8, %s4963_s12 }
 0x34e   : > { %1765 = vrot.lane.b32.xlu0 %v1599_v14, %s4963_s12 }
 0x34f   : > { %v6065_v15 = vpop.permute.xlu1 %2294  ;;  %v1742_v17 = vpop.permute.xlu0 %1741 }
 0x350   : > { %v1827_v34 = vsel %vm674_vm3, %v1803_v16, %v1742_v17  ;;  %v2451_v44 = vsel %vm655_vm0, %v2187_v52, %v6065_v15  ;;  %v2189_v15 = vld [vmem:[#allocation2 + $0x97] sm:$0xff] }
 0x351   : > { %2402 = vrot.lane.b32.xlu1 %v1597_v42, %s4963_s12  ;;  %4213 = vmatprep.mubr.msk.f32.mxu0 %vm1866_vm15, %v1827_v34  ;;  %v2890_v34 = vld [vmem:[#allocation2 + $0xe9] sm:$0xff] }
 0x352   : > { %2946 = vrot.lane.b32.xlu0 %v5966_v22, %s4962_s24  ;;  %4214 = vmatmul.mubr.msk.f32.gmra.mrb[16].mxu0 %vm1866_vm15, %v1828_v19  ;;  %v3090_v22 = vsel %vm655_vm0, %v2183_v62, %v5993_v50  ;;  %v2221_v62 = vld [vmem:[#allocation2 + $0xd8] sm:$0xff] }
 0x353   : > { %v1652_v20 = vpop.permute.xlu1 %1651  ;;  %v2385_v4 = vpop.permute.xlu0 %2384 }
 0x354   : > { %v2472_v21 = vsel %vm674_vm3, %v2448_v39, %v2385_v4  ;;  %v1806_v58 = vsel %vm655_vm0, %v1542_v43, %v1652_v20 }
 0x355   : > { %2308 = vrot.lane.b32.xlu1 %v1574_v6, %s4962_s24  ;;  %4248 = vmatprep.mubr.msk.f32.mxu1 %vm1866_vm15, %v2472_v21 }
 0x356   : > { %3042 = vrot.lane.b32.xlu0 %v1597_v42, %s4963_s12 }
 0x357   : > { %v1748_v24 = vpop.permute.xlu1 %1747  ;;  %v3023_v25 = vpop.permute.xlu0 %3022 }
 0x358   : > { %v6086_v28 = vsel %vm674_vm3, %v3090_v22, %v3023_v25  ;;  %v1830_v60 = vsel %vm674_vm3, %v1806_v58, %v1748_v24  ;;  %v2868_v24 = vld [vmem:[#allocation2 + $0xf8] sm:$0xff] }
 0x359   : > { %1671 = vrot.lane.b32.xlu1 %v1576_v27, %s4962_s24  ;;  %v1546_v58 = vld [vmem:[#allocation2 + $0x9f] sm:$0xff] }
 0x35a   : > { %3044 = vrot.lane.b32.xlu0 %v2242_v8, %s4963_s12 }
 0x35b   : > { %v2387_v30 = vpop.permute.xlu1 %2386  ;;  %v3025_v31 = vpop.permute.xlu0 %3024 }
 0x35c   : > { %v2473_v1 = vsel %vm674_vm3, %v2449_v29, %v2387_v30  ;;  %v6094_v46 = vsel %vm674_vm3, %v3091_v38, %v3025_v31  ;;  %v2222_v38 = vld [vmem:[#allocation2 + $0xe0] sm:$0xff] }
 0x35d   : > { %1767 = vrot.lane.b32.xlu1 %v1600_v23, %s4963_s12  ;;  %4249 = vmatmul.mubr.msk.f32.gmra.mrb[38].mxu1 %vm1866_vm15, %v2473_v1  ;;  %v2892_v1 = vld [vmem:[#allocation2 + $0xf9] sm:$0xff] }
 0x35e   : > { %2408 = vrot.lane.b32.xlu0 %v1600_v23, %s4963_s12 }
 0x35f   : > { %v2293_v49 = vpop.permute.xlu1 %2292 }
 0x360   : > { %v1654_v50 = vpop.permute.xlu0 %1653  ;;  %v2450_v45 = vsel %vm655_vm0, %v1542_v43, %v2293_v49 }
 0x361   : > { %2406 = vrot.lane.b32.xlu1 %v1599_v14, %s4963_s12  ;;  %v1807_v20 = vsel %vm655_vm0, %v2187_v52, %v1654_v50 }
 0x362   : > { %2950 = vrot.lane.b32.xlu0 %v6038_v61, %s4962_s24 }
 0x363   : > { %v2933_v51 = vpop.permute.xlu1 %2932 }
 0x364   : > { %v3093_v54 = vsel %vm655_vm0, %v1542_v43, %v2933_v51  ;;  %v2935_v36 = vpop.permute.xlu0 %2934 }
 0x365   : > { %v6104_v40 = vsel %vm655_vm0, %v2187_v52, %v2935_v36  ;;  %2948 = vrot.lane.b32.xlu1 %v1574_v6, %s4962_s24 }
 0x366   : > { %3046 = vrot.lane.b32.xlu0 %v1599_v14, %s4963_s12 }
 0x367   : > { %v6108_v55 = vpop.permute.xlu1 %2298 }
 0x368   : > { %v1746_v57 = vpop.permute.xlu0 %1745  ;;  %v2453_v50 = vsel %vm655_vm0, %v2189_v15, %v6108_v55  ;;  %v2191_v55 = vld [vmem:[#allocation2 + $0xa7] sm:$0xff] }
 0x369   : > { %v1829_v59 = vsel %vm674_vm3, %v1805_v56, %v1746_v57  ;;  %2312 = vrot.lane.b32.xlu1 %v1576_v27, %s4962_s24  ;;  %v2891_v57 = vld [vmem:[#allocation2 + $0xf1] sm:$0xff] }
 0x36a   : > { %3048 = vrot.lane.b32.xlu0 %v1600_v23, %s4963_s12  ;;  %4216 = vmatprep.mubr.msk.f32.mxu0 %vm1866_vm15, %v1829_v59 }
 0x36b   : > { %v1656_v32 = vpop.permute.xlu1 %1655  ;;  %4217 = vmatmul.mubr.msk.f32.gmra.mrb[18].mxu0 %vm1866_vm15, %v1830_v60 }
 0x36c   : > { %v2389_v61 = vpop.permute.xlu0 %2388 }
 0x36d   : > { %v2474_v63 = vsel %vm674_vm3, %v2450_v45, %v2389_v61  ;;  %2314 = vrot.lane.b32.xlu1 %v2221_v62, %s4962_s24  ;;  %v2869_v45 = vld [vmem:[#allocation2 + $0x100] sm:$0xff] }
 0x36e   : > { %2412 = vrot.lane.b32.xlu0 %v2246_v47, %s4963_s12  ;;  %4251 = vmatprep.mubr.msk.f32.mxu1 %vm1866_vm15, %v2474_v63 }
 0x36f   : > { %v1752_v37 = vpop.permute.xlu1 %1751 }
 0x370   : > { %v3027_v0 = vpop.permute.xlu0 %3026 }
 0x371   : > { %v6125_v42 = vsel %vm674_vm3, %v6061_v12, %v3027_v0  ;;  %2410 = vrot.lane.b32.xlu1 %v2245_v2, %s4963_s12  ;;  %v1544_v12 = vld [vmem:[#allocation2 + $0x8f] sm:$0xff] }
 0x372   : > { %2954 = vrot.lane.b32.xlu0 %v2221_v62, %s4962_s24  ;;  %v1808_v4 = vsel %vm655_vm0, %v1544_v12, %v1656_v32 }
 0x373   : > { %v2391_v5 = vpop.permute.xlu1 %2390  ;;  %v1832_v22 = vsel %vm674_vm3, %v1808_v4, %v1752_v37  ;;  %v2893_v37 = vld [vmem:[#allocation2 + $0x101] sm:$0xff] }
 0x374   : > { %v2475_v6 = vsel %vm674_vm3, %v2451_v44, %v2391_v5  ;;  %v3029_v8 = vpop.permute.xlu0 %3028 }
 0x375   : > { %v6133_v33 = vsel %vm674_vm3, %v3093_v54, %v3029_v8  ;;  %2952 = vrot.lane.b32.xlu1 %v1576_v27, %s4962_s24  ;;  %4252 = vmatmul.mubr.msk.f32.gmra.mrb[40].mxu1 %vm1866_vm15, %v2475_v6  ;;  %v2867_v54 = vld [vmem:[#allocation2 + $0xf0] sm:$0xff] }
 0x376   : > { %3050 = vrot.lane.b32.xlu0 %v2245_v2, %s4963_s12 }
 0x377   : > { %v2297_v9 = vpop.permute.xlu1 %2296 }
 0x378   : > { %v1658_v10 = vpop.permute.xlu0 %1657  ;;  %v2452_v27 = vsel %vm655_vm0, %v1544_v12, %v2297_v9 }
 0x379   : > { %2316 = vrot.lane.b32.xlu1 %v2222_v38, %s4962_s24  ;;  %v1809_v63 = vsel %vm655_vm0, %v2189_v15, %v1658_v10 }
 0x37a   : > { %2958 = vrot.lane.b32.xlu0 %v2866_v11, %s4962_s24 }
 0x37b   : > { %v2937_v14 = vpop.permute.xlu1 %2936 }
 0x37c   : > { %v3095_v16 = vsel %vm655_vm0, %v1544_v12, %v2937_v14  ;;  %v2939_v17 = vpop.permute.xlu0 %2938 }
 0x37d   : > { %v6142_v18 = vsel %vm655_vm0, %v2189_v15, %v2939_v17  ;;  %2318 = vrot.lane.b32.xlu1 %v2866_v11, %s4962_s24 }
 0x37e   : > { %3054 = vrot.lane.b32.xlu0 %v2890_v34, %s4963_s12 }
 0x37f   : > { %v6146_v19 = vpop.permute.xlu1 %2302 }
 0x380   : > { %v1750_v39 = vpop.permute.xlu0 %1749 }
 0x381   : > { %v1831_v21 = vsel %vm674_vm3, %v1807_v20, %v1750_v39  ;;  %2414 = vrot.lane.b32.xlu1 %v2890_v34, %s4963_s12  ;;  %v6200_v20 = vld [vmem:[#allocation2 + $0xaf] sm:$0xff] }
 0x382   : > { %2962 = vrot.lane.b32.xlu0 %v2868_v24, %s4962_s24  ;;  %4219 = vmatprep.mubr.msk.f32.mxu0 %vm1866_vm15, %v1831_v21 }
 0x383   : > { %v1660_v25 = vpop.permute.xlu1 %1659  ;;  %4220 = vmatmul.mubr.msk.f32.gmra.mrb[20].mxu0 %vm1866_vm15, %v1832_v22 }
 0x384   : > { %v2393_v29 = vpop.permute.xlu0 %2392  ;;  %v1810_v0 = vsel %vm655_vm0, %v1546_v58, %v1660_v25 }
 0x385   : > { %v2476_v30 = vsel %vm674_vm3, %v2452_v27, %v2393_v29  ;;  %2956 = vrot.lane.b32.xlu1 %v2222_v38, %s4962_s24 }
 0x386   : > { %3058 = vrot.lane.b32.xlu0 %v2892_v1, %s4963_s12  ;;  %4254 = vmatprep.mubr.msk.f32.mxu1 %vm1866_vm15, %v2476_v30 }
 0x387   : > { %v1756_v31 = vpop.permute.xlu1 %1755 }
 0x388   : > { %v3031_v23 = vpop.permute.xlu0 %3030  ;;  %v1834_v44 = vsel %vm674_vm3, %v1810_v0, %v1756_v31 }
 0x389   : > { %v6163_v49 = vsel %vm674_vm3, %v6104_v40, %v3031_v23  ;;  %3052 = vrot.lane.b32.xlu1 %v2246_v47, %s4963_s12  ;;  %v6220_v23 = vld [vmem:[#allocation2 + $0xb7] sm:$0xff] }
 0x38b   : > { %v2395_v43 = vpop.permute.xlu1 %2394 }
 0x38c   : > { %v2477_v51 = vsel %vm674_vm3, %v2453_v50, %v2395_v43  ;;  %v3033_v52 = vpop.permute.xlu0 %3032 }
 0x38d   : > { %v6170_v36 = vsel %vm674_vm3, %v3095_v16, %v3033_v52  ;;  %2960 = vrot.lane.b32.xlu1 %v2867_v54, %s4962_s24  ;;  %4255 = vmatmul.mubr.msk.f32.gmra.mrb[42].mxu1 %vm1866_vm15, %v2477_v51  ;;  %v2455_v16 = vsel %vm655_vm0, %v2191_v55, %v6146_v19 }
 0x38f   : > { %v2301_v56 = vpop.permute.xlu1 %2300 }
 0x390   : > { %v1662_v40 = vpop.permute.xlu0 %1661  ;;  %v2454_v6 = vsel %vm655_vm0, %v1546_v58, %v2301_v56 }
 0x391   : > { %3056 = vrot.lane.b32.xlu1 %v2891_v57, %s4963_s12  ;;  %v1811_v34 = vsel %vm655_vm0, %v2191_v55, %v1662_v40  ;;  %v6226_v40 = vld [vmem:[#allocation2 + $0xbf] sm:$0xff]  ;;  %v1842_v57 = vld [vmem:[#allocation3 + $0x8] sm:$0xff] }
 0x393   : > { %v2941_v59 = vpop.permute.xlu1 %2940 }
 0x394   : > { %v3097_v60 = vsel %vm655_vm0, %v1546_v58, %v2941_v59  ;;  %v2943_v32 = vpop.permute.xlu0 %2942  ;;  %v6228_v58 = vld [vmem:[#allocation2 + $0xc7] sm:$0xff] }
 0x395   : > { %v6177_v61 = vsel %vm655_vm0, %v2191_v55, %v2943_v32  ;;  %2964 = vrot.lane.b32.xlu1 %v2869_v45, %s4962_s24 }
 0x397   : > { %v1666_v62 = vpop.permute.xlu1 %1665 }
 0x398   : > { %v1754_v47 = vpop.permute.xlu0 %1753  ;;  %v1813_v43 = vsel %vm655_vm0, %v6220_v23, %v1666_v62 }
 0x399   : > { %v1833_v2 = vsel %vm674_vm3, %v1809_v63, %v1754_v47  ;;  %3060 = vrot.lane.b32.xlu1 %v2893_v37, %s4963_s12 }
 0x39a   : > { %4222 = vmatprep.mubr.msk.f32.mxu0 %vm1866_vm15, %v1833_v2 }
 0x39b   : > { %v2307_v5 = vpop.permute.xlu1 %2306  ;;  %4223 = vmatmul.mubr.msk.f32.gmra.mrb[22].mxu0 %vm1866_vm15, %v1834_v44 }
 0x39c   : > { %v2397_v8 = vpop.permute.xlu0 %2396  ;;  %v2457_v44 = vsel %vm655_vm0, %v6220_v23, %v2307_v5 }
 0x39d   : > { %v2478_v9 = vsel %vm674_vm3, %v2454_v6, %v2397_v8 }
 0x39e   : > { %4257 = vmatprep.mubr.msk.f32.mxu1 %vm1866_vm15, %v2478_v9 }
 0x39f   : > { %v1664_v10 = vpop.permute.xlu1 %1663 }
 0x3a0   : > { %v3035_v38 = vpop.permute.xlu0 %3034 }
 0x3a1   : > { %v6192_v11 = vsel %vm674_vm3, %v6142_v18, %v3035_v38  ;;  %v1812_v18 = vsel %vm655_vm0, %v6200_v20, %v1664_v10 }
 0x3a3   : > { %v1760_v12 = vpop.permute.xlu1 %1759 }
 0x3a4   : > { %v3037_v14 = vpop.permute.xlu0 %3036  ;;  %v1836_v24 = vsel %vm674_vm3, %v1812_v18, %v1760_v12  ;;  %v1843_v18 = vld [vmem:[#allocation3 + $0x10] sm:$0xff] }
 0x3a5   : > { %v6195_v15 = vsel %vm674_vm3, %v3097_v60, %v3037_v14  ;;  %v1841_v60 = vld [vmem:[#allocation3] sm:$0xff] }
 0x3a7   : > { %v2399_v17 = vpop.permute.xlu1 %2398 }
 0x3a8   : > { %v2479_v39 = vsel %vm674_vm3, %v2455_v16, %v2399_v17  ;;  %v1758_v4 = vpop.permute.xlu0 %1757  ;;  %v6254_v17 = vld [vmem:[#allocation2 + $0xcf] sm:$0xff] }
 0x3a9   : > { %v1835_v21 = vsel %vm674_vm3, %v1811_v34, %v1758_v4  ;;  %4258 = vmatmul.mubr.msk.f32.gmra.mrb[44].mxu1 %vm1866_vm15, %v2479_v39  ;;  %v1844_v34 = vld [vmem:[#allocation3 + $0x18] sm:$0xff] }
 0x3aa   : > { %4225 = vmatprep.mubr.msk.f32.mxu0 %vm1866_vm15, %v1835_v21  ;;  %v3086_v21 = vsel %vm655_vm0, %v5933_v7, %v5905_v53 }
 0x3ab   : > { %v2305_v19 = vpop.permute.xlu1 %2304  ;;  %4226 = vmatmul.mubr.msk.f32.gmra.mrb[24].mxu0 %vm1866_vm15, %v1836_v24 }
 0x3ac   : > { %v2456_v22 = vsel %vm655_vm0, %v6200_v20, %v2305_v19  ;;  %v2401_v25 = vpop.permute.xlu0 %2400 }
 0x3ad   : > { %v2480_v27 = vsel %vm674_vm3, %v2456_v22, %v2401_v25  ;;  %v3110_v25 = vsel %vm674_vm3, %v3086_v21, %v5974_v26 }
 0x3ae   : > { %4260 = vmatprep.mubr.msk.f32.mxu1 %vm1866_vm15, %v2480_v27 }
 0x3af   : > { %v6214_v29 = vpop.permute.xlu1 %2944 }
 0x3b0   : > { %v6216_v30 = vpop.permute.xlu0 %3038 }
 0x3b3   : > { %v1670_v1 = vpop.permute.xlu1 %1669 }
 0x3b4   : > { %v6218_v31 = vpop.permute.xlu0 %3040  ;;  %v1815_v32 = vsel %vm655_vm0, %v6228_v58, %v1670_v1 }
 0x3b7   : > { %v2311_v50 = vpop.permute.xlu1 %2310 }
 0x3b8   : > { %v1762_v51 = vpop.permute.xlu0 %1761  ;;  %v2459_v53 = vsel %vm655_vm0, %v6228_v58, %v2311_v50 }
 0x3b9   : > { %v1837_v52 = vsel %vm674_vm3, %v1813_v43, %v1762_v51  ;;  %v3087_v51 = vsel %vm655_vm0, %v5937_v48, %v5946_v13 }
 0x3ba   : > { %4228 = vmatprep.mubr.msk.f32.mxu0 %vm1866_vm15, %v1837_v52  ;;  %v3111_v26 = vsel %vm674_vm3, %v3087_v51, %v5982_v35  ;;  %v1846_v35 = vld [vmem:[#allocation3 + $0x28] sm:$0xff] }
 0x3bb   : > { %v1668_v54 = vpop.permute.xlu1 %1667 }
 0x3bc   : > { %v2405_v56 = vpop.permute.xlu0 %2404  ;;  %v1814_v59 = vsel %vm655_vm0, %v6226_v40, %v1668_v54 }
 0x3bf   : > { %v1764_v55 = vpop.permute.xlu1 %1763 }
 0x3c0   : > { %v1838_v45 = vsel %vm674_vm3, %v1814_v59, %v1764_v55  ;;  %v4200_v62 = vpop.f32.mrb[6].mxu0  ;;  %v1766_v63 = vpop.permute.xlu0 %1765 }
 0x3c1   : > { %v2129_v47 = vadd.f32 %v4200_v62, %v1842_v57  ;;  %v1839_v37 = vsel %vm674_vm3, %v1815_v32, %v1766_v63  ;;  %v2009_v0 = vpop.f32.mrb[7].mxu0  ;;  %4229 = vmatmul.mubr.msk.f32.gmra.mrb[26].mxu0 %vm1866_vm15, %v1838_v45 }
 0x3c2   : > { %v2128_v2 = vadd.f32 %v2009_v0, %v1841_v60  ;;  %4231 = vmatprep.mubr.msk.f32.mxu0 %vm1866_vm15, %v1839_v37 }
 0x3c3   : > { %2153 = vst.msk [vmem:[#allocation3 + $0x8] sm:$0xff] %vm674_vm3, %v2129_v47  ;;  %v2403_v6 = vpop.permute.xlu1 %2402 }
 0x3c4   : > { %2152 = vst.msk [vmem:[#allocation3] sm:$0xff] %vm674_vm3, %v2128_v2  ;;  %v2481_v8 = vsel %vm674_vm3, %v2457_v44, %v2403_v6  ;;  %v6243_v9 = vpop.permute.xlu0 %2946  ;;  %v2197_v2 = vld [vmem:[#allocation2 + $0xd7] sm:$0xff] }
 0x3c5   : > { %4261 = vmatmul.mubr.msk.f32.gmra.mrb[46].mxu1 %vm1866_vm15, %v2481_v8 }
 0x3c7   : > { %v2309_v10 = vpop.permute.xlu1 %2308 }
 0x3c8   : > { %v2458_v38 = vsel %vm655_vm0, %v6226_v40, %v2309_v10  ;;  %v6248_v12 = vpop.permute.xlu0 %3042 }
 0x3c9   : > { %v2482_v14 = vsel %vm674_vm3, %v2458_v38, %v2405_v56  ;;  %v1845_v56 = vld [vmem:[#allocation3 + $0x20] sm:$0xff]  ;;  %v3099_v38 = vsel %vm655_vm0, %v6200_v20, %v6214_v29  ;;  %v1847_v29 = vld [vmem:[#allocation3 + $0x30] sm:$0xff] }
 0x3ca   : > { %4263 = vmatprep.mubr.msk.f32.mxu1 %vm1866_vm15, %v2482_v14  ;;  %v2489_v32 = vld [vmem:[#allocation3 + $0x8] sm:$0xff]  ;;  %v2198_v14 = vld [vmem:[#allocation2 + $0xdf] sm:$0xff] }
 0x3cb   : > { %v1672_v5 = vpop.permute.xlu1 %1671  ;;  %v2488_v63 = vld [vmem:[#allocation3] sm:$0xff] }
 0x3cc   : > { %v6252_v16 = vpop.permute.xlu0 %3044  ;;  %v1816_v39 = vsel %vm655_vm0, %v6254_v17, %v1672_v5  ;;  %v3100_v5 = vsel %vm655_vm0, %v6220_v23, %v6243_v9 }
 0x3cf   : > { %v1768_v4 = vpop.permute.xlu1 %1767 }
 0x3d0   : > { %v1840_v24 = vsel %vm674_vm3, %v1816_v39, %v1768_v4  ;;  %v2409_v19 = vpop.permute.xlu0 %2408  ;;  %v4203_v22 = vpop.f32.mrb[8].mxu0 }
 0x3d1   : > { %v2131_v27 = vadd.f32 %v4203_v22, %v1844_v34  ;;  %v2019_v1 = vpop.f32.mrb[9].mxu0  ;;  %4232 = vmatmul.mubr.msk.f32.gmra.mrb[28].mxu0 %vm1866_vm15, %v1840_v24 }
 0x3d2   : > { %v2130_v43 = vadd.f32 %v2019_v1, %v1843_v18  ;;  %4274 = vmatprep.mubr.msk.f32.mxu0 %vm1866_vm15, %v3110_v25  ;;  %v2842_v25 = vld [vmem:[#allocation2 + $0xe7] sm:$0xff] }
 0x3d3   : > { %2155 = vst.msk [vmem:[#allocation3 + $0x18] sm:$0xff] %vm674_vm3, %v2131_v27  ;;  %v2407_v7 = vpop.permute.xlu1 %2406 }
 0x3d4   : > { %2154 = vst.msk [vmem:[#allocation3 + $0x10] sm:$0xff] %vm674_vm3, %v2130_v43  ;;  %v2483_v52 = vsel %vm674_vm3, %v2459_v53, %v2407_v7  ;;  %v6276_v54 = vpop.permute.xlu0 %2950 }
 0x3d5   : > { %4264 = vmatmul.mubr.msk.f32.gmra.mrb[48].mxu1 %vm1866_vm15, %v2483_v52  ;;  %4275 = vmatmul.mubr.msk.f32.vlgmr.msra.gmra.mrb[30].mxu0 %vm1866_vm15, %v3111_v26 }
 0x3d6   : > { %4277 = vmatprep.mubr.msk.f32.mxu0 %vm1866_vm15, %v6041_v41 }
 0x3d7   : > { %v2949_v48 = vpop.permute.xlu1 %2948 }
 0x3d8   : > { %v6282_v13 = vpop.permute.xlu0 %3046  ;;  %v3101_v34 = vsel %vm655_vm0, %v6226_v40, %v2949_v48 }
 0x3d9   : > { %4278 = vmatmul.mubr.msk.f32.gmra.mrb[32].mxu0 %vm1866_vm15, %v6051_v3  ;;  %v3125_v40 = vsel %vm674_vm3, %v3101_v34, %v6252_v16 }
 0x3da   : > { %4280 = vmatprep.mubr.msk.f32.mxu0 %vm1866_vm15, %v6086_v28 }
 0x3db   : > { %v2313_v50 = vpop.permute.xlu1 %2312  ;;  %v2490_v27 = vld [vmem:[#allocation3 + $0x10] sm:$0xff] }
 0x3dc   : > { %v2460_v57 = vsel %vm655_vm0, %v6254_v17, %v2313_v50  ;;  %v6290_v59 = vpop.permute.xlu0 %3048  ;;  %v4206_v55 = vpop.f32.mrb[10].mxu0 }
 0x3dd   : > { %v2133_v60 = vadd.f32 %v4206_v55, %v1846_v35  ;;  %v2029_v41 = vpop.f32.mrb[11].mxu0  ;;  %v4238_v45 = vpop.f32.mrb[30].mxu1  ;;  %4281 = vmatmul.mubr.msk.f32.gmra.mrb[34].mxu0 %vm1866_vm15, %v6094_v46  ;;  %v2484_v3 = vsel %vm674_vm3, %v2460_v57, %v2409_v19  ;;  %v2491_v19 = vld [vmem:[#allocation3 + $0x18] sm:$0xff] }
 0x3de   : > { %v2132_v62 = vadd.f32 %v2029_v41, %v1845_v56  ;;  %v2775_v28 = vadd.f32 %v4238_v45, %v2489_v32  ;;  %v2655_v47 = vpop.f32.mrb[31].mxu1  ;;  %4266 = vmatprep.mubr.msk.f32.mxu1 %vm1866_vm15, %v2484_v3  ;;  %4283 = vmatprep.mubr.msk.f32.mxu0 %vm1866_vm15, %v6125_v42 }
 0x3df   : > { %2157 = vst.msk [vmem:[#allocation3 + $0x28] sm:$0xff] %vm674_vm3, %v2133_v60  ;;  %v2774_v37 = vadd.f32 %v2655_v47, %v2488_v63  ;;  %v2315_v0 = vpop.permute.xlu1 %2314  ;;  %v2844_v63 = vld [vmem:[#allocation2 + $0xf7] sm:$0xff] }
 0x3e0   : > { %2156 = vst.msk [vmem:[#allocation3 + $0x20] sm:$0xff] %vm674_vm3, %v2132_v62  ;;  %2799 = vst.msk [vmem:[#allocation3 + $0x8] sm:$0xff] %vm674_vm3, %v2775_v28  ;;  %v2413_v46 = vpop.permute.xlu0 %2412  ;;  %v2461_v42 = vsel %vm655_vm0, %v2197_v2, %v2315_v0  ;;  %v2843_v62 = vld [vmem:[#allocation2 + $0xef] sm:$0xff] }
 0x3e1   : > { %2798 = vst.msk [vmem:[#allocation3] sm:$0xff] %vm674_vm3, %v2774_v37  ;;  %4284 = vmatmul.mubr.msk.f32.gmra.mrb[36].mxu0 %vm1866_vm15, %v6133_v33  ;;  %v3122_v33 = vsel %vm674_vm3, %v6177_v61, %v6216_v30  ;;  %v1848_v30 = vld [vmem:[#allocation3 + $0x38] sm:$0xff] }
 0x3e2   : > { %4286 = vmatprep.mubr.msk.f32.mxu0 %vm1866_vm15, %v6163_v49 }
 0x3e3   : > { %v2411_v44 = vpop.permute.xlu1 %2410 }
 0x3e4   : > { %v2485_v6 = vsel %vm674_vm3, %v2461_v42, %v2411_v44  ;;  %v2955_v8 = vpop.permute.xlu0 %2954  ;;  %v2845_v44 = vld [vmem:[#allocation2 + $0xff] sm:$0xff] }
 0x3e5   : > { %4267 = vmatmul.mubr.msk.f32.gmra.mrb[50].mxu1 %vm1866_vm15, %v2485_v6  ;;  %4287 = vmatmul.mubr.msk.f32.gmra.mrb[38].mxu0 %vm1866_vm15, %v6170_v36 }
 0x3e6   : > { %4289 = vmatprep.mubr.msk.f32.mxu0 %vm1866_vm15, %v6192_v11  ;;  %v3123_v11 = vsel %vm674_vm3, %v3099_v38, %v6218_v31  ;;  %v2493_v55 = vld [vmem:[#allocation3 + $0x28] sm:$0xff] }
 0x3e7   : > { %v2953_v10 = vpop.permute.xlu1 %2952  ;;  %v2492_v32 = vld [vmem:[#allocation3 + $0x20] sm:$0xff] }
 0x3e8   : > { %v3051_v49 = vpop.permute.xlu0 %3050  ;;  %v3103_v24 = vsel %vm655_vm0, %v6254_v17, %v2953_v10  ;;  %v3104_v17 = vsel %vm655_vm0, %v2197_v2, %v2955_v8 }
 0x3e9   : > { %4290 = vmatmul.mubr.msk.f32.gmra.mrb[40].mxu0 %vm1866_vm15, %v6195_v15  ;;  %v3124_v15 = vsel %vm674_vm3, %v3100_v5, %v6248_v12  ;;  %v3102_v12 = vsel %vm655_vm0, %v6228_v58, %v6276_v54  ;;  %v3127_v7 = vsel %vm674_vm3, %v3103_v24, %v6290_v59  ;;  %v3128_v26 = vsel %vm674_vm3, %v3104_v17, %v3051_v49  ;;  %v1849_v49 = vld [vmem:[#allocation3 + $0x40] sm:$0xff] }
 0x3ea   : > { %4292 = vmatprep.mubr.msk.f32.mxu0 %vm1866_vm15, %v3122_v33  ;;  %v3126_v21 = vsel %vm674_vm3, %v3102_v12, %v6282_v13  ;;  %v1850_v33 = vld [vmem:[#allocation3 + $0x48] sm:$0xff] }
 0x3eb   : > { %v2317_v36 = vpop.permute.xlu1 %2316 }
 0x3ec   : > { %v2462_v61 = vsel %vm655_vm0, %v2198_v14, %v2317_v36  ;;  %v2959_v4 = vpop.permute.xlu0 %2958 }
 0x3ed   : > { %4293 = vmatmul.mubr.msk.f32.gmra.mrb[42].mxu0 %vm1866_vm15, %v3123_v11  ;;  %v2486_v20 = vsel %vm674_vm3, %v2462_v61, %v2413_v46  ;;  %v4209_v39 = vpop.f32.mrb[12].mxu0  ;;  %v3106_v35 = vsel %vm655_vm0, %v2842_v25, %v2959_v4 }
 0x3ee   : > { %4269 = vmatprep.mubr.msk.f32.mxu1 %vm1866_vm15, %v2486_v20  ;;  %4295 = vmatprep.mubr.msk.f32.mxu0 %vm1866_vm15, %v3124_v15  ;;  %v2135_v31 = vadd.f32 %v4209_v39, %v1848_v30  ;;  %v2039_v9 = vpop.f32.mrb[13].mxu0  ;;  %v1851_v39 = vld [vmem:[#allocation3 + $0x50] sm:$0xff] }
 0x3ef   : > { %v2319_v23 = vpop.permute.xlu1 %2318  ;;  %v2134_v18 = vadd.f32 %v2039_v9, %v1847_v29  ;;  %v1852_v29 = vld [vmem:[#allocation3 + $0x58] sm:$0xff] }
 0x3f0   : > { %2159 = vst.msk [vmem:[#allocation3 + $0x38] sm:$0xff] %vm674_vm3, %v2135_v31  ;;  %v4241_v22 = vpop.f32.mrb[32].mxu1  ;;  %v2463_v16 = vsel %vm655_vm0, %v2842_v25, %v2319_v23  ;;  %v3055_v52 = vpop.permute.xlu0 %3054  ;;  %v1853_v25 = vld [vmem:[#allocation3 + $0x60] sm:$0xff] }
 0x3f1   : > { %4296 = vmatmul.mubr.msk.f32.gmra.mrb[44].mxu0 %vm1866_vm15, %v3125_v40  ;;  %2158 = vst.msk [vmem:[#allocation3 + $0x30] sm:$0xff] %vm674_vm3, %v2134_v18  ;;  %v2777_v58 = vadd.f32 %v4241_v22, %v2491_v19  ;;  %v2665_v1 = vpop.f32.mrb[33].mxu1  ;;  %v3130_v57 = vsel %vm674_vm3, %v3106_v35, %v3055_v52  ;;  %v1854_v22 = vld [vmem:[#allocation3 + $0x68] sm:$0xff]  ;;  %v1856_v52 = vld [vmem:[#allocation3 + $0x78] sm:$0xff] }
 0x3f2   : > { %4298 = vmatprep.mubr.msk.f32.mxu0 %vm1866_vm15, %v3126_v21  ;;  %v2776_v43 = vadd.f32 %v2665_v1, %v2490_v27 }
 0x3f3   : > { %v2415_v51 = vpop.permute.xlu1 %2414  ;;  %2801 = vst.msk [vmem:[#allocation3 + $0x18] sm:$0xff] %vm674_vm3, %v2777_v58 }
 0x3f4   : > { %v2487_v53 = vsel %vm674_vm3, %v2463_v16, %v2415_v51  ;;  %2800 = vst.msk [vmem:[#allocation3 + $0x10] sm:$0xff] %vm674_vm3, %v2776_v43  ;;  %v2963_v50 = vpop.permute.xlu0 %2962 }
 0x3f5   : > { %4270 = vmatmul.mubr.msk.f32.gmra.mrb[52].mxu1 %vm1866_vm15, %v2487_v53  ;;  %4299 = vmatmul.mubr.msk.f32.gmra.mrb[46].mxu0 %vm1866_vm15, %v3127_v7  ;;  %v3108_v0 = vsel %vm655_vm0, %v2844_v63, %v2963_v50 }
 0x3f6   : > { %4301 = vmatprep.mubr.msk.f32.mxu0 %vm1866_vm15, %v3128_v26 }
 0x3f7   : > { %v2957_v54 = vpop.permute.xlu1 %2956  ;;  %v2495_v5 = vld [vmem:[#allocation3 + $0x38] sm:$0xff] }
 0x3f8   : > { %v3105_v48 = vsel %vm655_vm0, %v2198_v14, %v2957_v54  ;;  %v3059_v3 = vpop.permute.xlu0 %3058  ;;  %v2494_v15 = vld [vmem:[#allocation3 + $0x30] sm:$0xff] }
 0x3f9   : > { %v3132_v2 = vsel %vm674_vm3, %v3108_v0, %v3059_v3  ;;  %v1855_v54 = vld [vmem:[#allocation3 + $0x70] sm:$0xff]  ;;  %v1860_v0 = vld [vmem:[#allocation3 + $0x98] sm:$0xff] }
 0x3fb   : > { %v3053_v13 = vpop.permute.xlu1 %3052 }
 0x3fc   : > { %v3129_v56 = vsel %vm674_vm3, %v3105_v48, %v3053_v13 }
 0x3fd   : > { %4302 = vmatmul.mubr.msk.f32.gmra.mrb[48].mxu0 %vm1866_vm15, %v3129_v56 }
 0x3fe   : > { %4304 = vmatprep.mubr.msk.f32.mxu0 %vm1866_vm15, %v3130_v57 }
 0x3ff   : > { %v2961_v59 = vpop.permute.xlu1 %2960 }
 0x400   : > { %v4244_v60 = vpop.f32.mrb[34].mxu1  ;;  %v3107_v47 = vsel %vm655_vm0, %v2843_v62, %v2961_v59 }
 0x401   : > { %v2779_v41 = vadd.f32 %v4244_v60, %v2493_v55  ;;  %v2675_v45 = vpop.f32.mrb[35].mxu1 }
 0x402   : > { %v2778_v28 = vadd.f32 %v2675_v45, %v2492_v32  ;;  %v1858_v32 = vld [vmem:[#allocation3 + $0x88] sm:$0xff]  ;;  %v1857_v45 = vld [vmem:[#allocation3 + $0x80] sm:$0xff] }
 0x403   : > { %2803 = vst.msk [vmem:[#allocation3 + $0x28] sm:$0xff] %vm674_vm3, %v2779_v41  ;;  %v3057_v37 = vpop.permute.xlu1 %3056 }
 0x404   : > { %2802 = vst.msk [vmem:[#allocation3 + $0x20] sm:$0xff] %vm674_vm3, %v2778_v28  ;;  %v3131_v46 = vsel %vm674_vm3, %v3107_v47, %v3057_v37 }
 0x405   : > { %4305 = vmatmul.mubr.msk.f32.gmra.mrb[50].mxu0 %vm1866_vm15, %v3131_v46 }
 0x406   : > { %4307 = vmatprep.mubr.msk.f32.mxu0 %vm1866_vm15, %v3132_v2 }
 0x407   : > { %v2965_v42 = vpop.permute.xlu1 %2964 }
 0x408   : > { %v3109_v6 = vsel %vm655_vm0, %v2845_v44, %v2965_v42  ;;  %v1859_v44 = vld [vmem:[#allocation3 + $0x90] sm:$0xff] }
 0x40b   : > { %v3061_v8 = vpop.permute.xlu1 %3060 }
 0x40c   : > { %v3133_v10 = vsel %vm674_vm3, %v3109_v6, %v3061_v8 }
 0x40d   : > { %4308 = vmatmul.mubr.msk.f32.gmra.mrb[52].mxu0 %vm1866_vm15, %v3133_v10  ;;  %v4212_v38 = vpop.f32.mrb[14].mxu0 }
 0x40e   : > { %v2137_v14 = vadd.f32 %v4212_v38, %v1850_v33  ;;  %v2049_v36 = vpop.f32.mrb[15].mxu0  ;;  %v1862_v38 = vld [vmem:[#allocation3 + $0xa8] sm:$0xff] }
 0x40f   : > { %v2136_v11 = vadd.f32 %v2049_v36, %v1849_v49 }
 0x410   : > { %2161 = vst.msk [vmem:[#allocation3 + $0x48] sm:$0xff] %vm674_vm3, %v2137_v14  ;;  %v1861_v14 = vld [vmem:[#allocation3 + $0xa0] sm:$0xff] }
 0x411   : > { %2160 = vst.msk [vmem:[#allocation3 + $0x40] sm:$0xff] %vm674_vm3, %v2136_v11 }
 0x417   : > { %v2497_v4 = vld [vmem:[#allocation3 + $0x48] sm:$0xff] }
 0x418   : > { %v4247_v61 = vpop.f32.mrb[36].mxu1  ;;  %v2496_v21 = vld [vmem:[#allocation3 + $0x40] sm:$0xff] }
 0x419   : > { %v2781_v30 = vadd.f32 %v4247_v61, %v2495_v5  ;;  %v2685_v34 = vpop.f32.mrb[37].mxu1 }
 0x41a   : > { %v2780_v20 = vadd.f32 %v2685_v34, %v2494_v15 }
 0x41b   : > { %2805 = vst.msk [vmem:[#allocation3 + $0x38] sm:$0xff] %vm674_vm3, %v2781_v30 }
 0x41c   : > { %2804 = vst.msk [vmem:[#allocation3 + $0x30] sm:$0xff] %vm674_vm3, %v2780_v20 }
 0x425   : > { %v4215_v31 = vpop.f32.mrb[16].mxu0 }
 0x426   : > { %v2139_v23 = vadd.f32 %v4215_v31, %v1852_v29  ;;  %v2059_v9 = vpop.f32.mrb[17].mxu0  ;;  %v1864_v31 = vld [vmem:[#allocation3 + $0xb8] sm:$0xff] }
 0x427   : > { %v2138_v12 = vadd.f32 %v2059_v9, %v1851_v39 }
 0x428   : > { %2163 = vst.msk [vmem:[#allocation3 + $0x58] sm:$0xff] %vm674_vm3, %v2139_v23  ;;  %v1863_v23 = vld [vmem:[#allocation3 + $0xb0] sm:$0xff] }
 0x429   : > { %2162 = vst.msk [vmem:[#allocation3 + $0x50] sm:$0xff] %vm674_vm3, %v2138_v12 }
 0x42f   : > { %v2499_v43 = vld [vmem:[#allocation3 + $0x58] sm:$0xff] }
 0x430   : > { %v4250_v18 = vpop.f32.mrb[38].mxu1  ;;  %v2498_v53 = vld [vmem:[#allocation3 + $0x50] sm:$0xff] }
 0x431   : > { %v2783_v40 = vadd.f32 %v4250_v18, %v2497_v4  ;;  %v2695_v24 = vpop.f32.mrb[39].mxu1 }
 0x432   : > { %v2782_v19 = vadd.f32 %v2695_v24, %v2496_v21  ;;  %v3135_v24 = vld [vmem:[#allocation3 + $0x8] sm:$0xff] }
 0x433   : > { %2807 = vst.msk [vmem:[#allocation3 + $0x48] sm:$0xff] %vm674_vm3, %v2783_v40 }
 0x434   : > { %2806 = vst.msk [vmem:[#allocation3 + $0x40] sm:$0xff] %vm674_vm3, %v2782_v19 }
 0x43e   : > { %v4218_v58 = vpop.f32.mrb[18].mxu0 }
 0x43f   : > { %v2141_v27 = vadd.f32 %v4218_v58, %v1854_v22  ;;  %v2069_v1 = vpop.f32.mrb[19].mxu0 }
 0x440   : > { %v2140_v16 = vadd.f32 %v2069_v1, %v1853_v25  ;;  %v3134_v1 = vld [vmem:[#allocation3] sm:$0xff] }
 0x441   : > { %2165 = vst.msk [vmem:[#allocation3 + $0x68] sm:$0xff] %vm674_vm3, %v2141_v27 }
 0x442   : > { %2164 = vst.msk [vmem:[#allocation3 + $0x60] sm:$0xff] %vm674_vm3, %v2140_v16 }
 0x448   : > { %v4253_v51 = vpop.f32.mrb[40].mxu1  ;;  %v2501_v56 = vld [vmem:[#allocation3 + $0x68] sm:$0xff] }
 0x449   : > { %v2785_v17 = vadd.f32 %v4253_v51, %v2499_v43  ;;  %v2705_v7 = vpop.f32.mrb[41].mxu1  ;;  %v2500_v55 = vld [vmem:[#allocation3 + $0x60] sm:$0xff] }
 0x44a   : > { %v2784_v26 = vadd.f32 %v2705_v7, %v2498_v53 }
 0x44b   : > { %2809 = vst.msk [vmem:[#allocation3 + $0x58] sm:$0xff] %vm674_vm3, %v2785_v17  ;;  %v3137_v17 = vld [vmem:[#allocation3 + $0x18] sm:$0xff] }
 0x44c   : > { %2808 = vst.msk [vmem:[#allocation3 + $0x50] sm:$0xff] %vm674_vm3, %v2784_v26  ;;  %v3136_v26 = vld [vmem:[#allocation3 + $0x10] sm:$0xff] }
 0x456   : > { %v4221_v48 = vpop.f32.mrb[20].mxu0 }
 0x457   : > { %v2143_v13 = vadd.f32 %v4221_v48, %v1856_v52  ;;  %v2079_v35 = vpop.f32.mrb[21].mxu0  ;;  %v3139_v48 = vld [vmem:[#allocation3 + $0x28] sm:$0xff] }
 0x458   : > { %v2142_v50 = vadd.f32 %v2079_v35, %v1855_v54 }
 0x459   : > { %2167 = vst.msk [vmem:[#allocation3 + $0x78] sm:$0xff] %vm674_vm3, %v2143_v13 }
 0x45a   : > { %2166 = vst.msk [vmem:[#allocation3 + $0x70] sm:$0xff] %vm674_vm3, %v2142_v50  ;;  %v3138_v50 = vld [vmem:[#allocation3 + $0x20] sm:$0xff] }
 0x460   : > { %v4256_v57 = vpop.f32.mrb[42].mxu1  ;;  %v2503_v47 = vld [vmem:[#allocation3 + $0x78] sm:$0xff] }
 0x461   : > { %v2787_v59 = vadd.f32 %v4256_v57, %v2501_v56  ;;  %v2715_v60 = vpop.f32.mrb[43].mxu1  ;;  %v2502_v2 = vld [vmem:[#allocation3 + $0x70] sm:$0xff] }
 0x462   : > { %v2786_v41 = vadd.f32 %v2715_v60, %v2500_v55  ;;  %v3493_v55 = vld [vmem:[%s5515_s23 + $0x8] sm:$0xff] }
 0x463   : > { %2811 = vst.msk [vmem:[#allocation3 + $0x68] sm:$0xff] %vm674_vm3, %v2787_v59 }
 0x464   : > { %2810 = vst.msk [vmem:[#allocation3 + $0x60] sm:$0xff] %vm674_vm3, %v2786_v41 }
 0x46e   : > { %v4224_v3 = vpop.f32.mrb[22].mxu0 }
 0x46f   : > { %v2145_v62 = vadd.f32 %v4224_v3, %v1858_v32  ;;  %v2089_v28 = vpop.f32.mrb[23].mxu0  ;;  %v3492_v32 = vld [vmem:[%s5515_s23] sm:$0xff]  ;;  %v3141_v3 = vld [vmem:[#allocation3 + $0x38] sm:$0xff] }
 0x470   : > { %v2144_v63 = vadd.f32 %v2089_v28, %v1857_v45 }
 0x471   : > { %2169 = vst.msk [vmem:[#allocation3 + $0x88] sm:$0xff] %vm674_vm3, %v2145_v62 }
 0x472   : > { %2168 = vst.msk [vmem:[#allocation3 + $0x80] sm:$0xff] %vm674_vm3, %v2144_v63 }
 0x478   : > { %v2505_v30 = vld [vmem:[#allocation3 + $0x88] sm:$0xff] }
 0x479   : > { %v2504_v20 = vld [vmem:[#allocation3 + $0x80] sm:$0xff] }
 0x47c   : > { %v4259_v37 = vpop.f32.mrb[44].mxu1 }
 0x47d   : > { %v2789_v46 = vadd.f32 %v4259_v37, %v2503_v47  ;;  %v2725_v42 = vpop.f32.mrb[45].mxu1  ;;  %v3140_v47 = vld [vmem:[#allocation3 + $0x30] sm:$0xff] }
 0x47e   : > { %v2788_v6 = vadd.f32 %v2725_v42, %v2502_v2  ;;  %v4227_v8 = vpop.f32.mrb[24].mxu0  ;;  %v3495_v42 = vld [vmem:[%s5515_s23 + $0x18] sm:$0xff] }
 0x47f   : > { %2813 = vst.msk [vmem:[#allocation3 + $0x78] sm:$0xff] %vm674_vm3, %v2789_v46  ;;  %v2147_v10 = vadd.f32 %v4227_v8, %v1860_v0  ;;  %v2099_v33 = vpop.f32.mrb[25].mxu0 }
 0x480   : > { %2812 = vst.msk [vmem:[#allocation3 + $0x70] sm:$0xff] %vm674_vm3, %v2788_v6  ;;  %v2146_v49 = vadd.f32 %v2099_v33, %v1859_v44  ;;  %v3494_v33 = vld [vmem:[%s5515_s23 + $0x10] sm:$0xff] }
 0x481   : > { %2171 = vst.msk [vmem:[#allocation3 + $0x98] sm:$0xff] %vm674_vm3, %v2147_v10 }
 0x482   : > { %2170 = vst.msk [vmem:[#allocation3 + $0x90] sm:$0xff] %vm674_vm3, %v2146_v49  ;;  %v3143_v49 = vld [vmem:[#allocation3 + $0x48] sm:$0xff] }
 0x488   : > { %v2507_v40 = vld [vmem:[#allocation3 + $0x98] sm:$0xff] }
 0x489   : > { %v2506_v58 = vld [vmem:[#allocation3 + $0x90] sm:$0xff] }
 0x494   : > { %v4230_v36 = vpop.f32.mrb[26].mxu0 }
 0x495   : > { %v2149_v11 = vadd.f32 %v4230_v36, %v1862_v38  ;;  %v2109_v5 = vpop.f32.mrb[27].mxu0 }
 0x496   : > { %v2148_v61 = vadd.f32 %v2109_v5, %v1861_v14 }
 0x497   : > { %2173 = vst.msk [vmem:[#allocation3 + $0xa8] sm:$0xff] %vm674_vm3, %v2149_v11 }
 0x498   : > { %2172 = vst.msk [vmem:[#allocation3 + $0xa0] sm:$0xff] %vm674_vm3, %v2148_v61  ;;  %v4262_v15 = vpop.f32.mrb[46].mxu1 }
 0x499   : > { %v2791_v34 = vadd.f32 %v4262_v15, %v2505_v30  ;;  %v2735_v29 = vpop.f32.mrb[47].mxu1 }
 0x49a   : > { %v2790_v39 = vadd.f32 %v2735_v29, %v2504_v20  ;;  %v3142_v20 = vld [vmem:[#allocation3 + $0x40] sm:$0xff] }
 0x49b   : > { %2815 = vst.msk [vmem:[#allocation3 + $0x88] sm:$0xff] %vm674_vm3, %v2791_v34 }
 0x49c   : > { %2814 = vst.msk [vmem:[#allocation3 + $0x80] sm:$0xff] %vm674_vm3, %v2790_v39 }
 0x49e   : > { %v2509_v14 = vld [vmem:[#allocation3 + $0xa8] sm:$0xff] }
 0x49f   : > { %v2508_v15 = vld [vmem:[#allocation3 + $0xa0] sm:$0xff] }
 0x4a4   : > { %v4233_v9 = vpop.f32.mrb[28].mxu0 }
 0x4a5   : > { %v2151_v12 = vadd.f32 %v4233_v9, %v1864_v31  ;;  %v2119_v4 = vpop.f32.mrb[29].mxu0 }
 0x4a6   : > { %v2150_v18 = vadd.f32 %v2119_v4, %v1863_v23 }
 0x4a7   : > { %2175 = vst.msk [vmem:[#allocation3 + $0xb8] sm:$0xff] %vm674_vm3, %v2151_v12 }
 0x4a8   : > { %2174 = vst.msk [vmem:[#allocation3 + $0xb0] sm:$0xff] %vm674_vm3, %v2150_v18  ;;  %v4265_v21 = vpop.f32.mrb[48].mxu1  ;;  %v4276_v19 = vpop.f32.mrb[30].mxu0  ;;  %v3497_v18 = vld [vmem:[%s5515_s23 + $0x28] sm:$0xff] }
 0x4a9   : > { %v2793_v22 = vadd.f32 %v4265_v21, %v2507_v40  ;;  %v3421_v25 = vadd.f32 %v4276_v19, %v3135_v24  ;;  %v2745_v27 = vpop.f32.mrb[49].mxu1  ;;  %v3301_v16 = vpop.f32.mrb[31].mxu0  ;;  %v3496_v24 = vld [vmem:[%s5515_s23 + $0x20] sm:$0xff] }
 0x4aa   : > { %v2792_v43 = vadd.f32 %v2745_v27, %v2506_v58  ;;  %v3420_v51 = vadd.f32 %v3301_v16, %v3134_v1  ;;  %v3144_v1 = vld [vmem:[#allocation3 + $0x50] sm:$0xff] }
 0x4ab   : > { %2817 = vst.msk [vmem:[#allocation3 + $0x98] sm:$0xff] %vm674_vm3, %v2793_v22  ;;  %3445 = vst.msk [vmem:[#allocation3 + $0x8] sm:$0xff] %vm674_vm3, %v3421_v25  ;;  %v3145_v22 = vld [vmem:[#allocation3 + $0x58] sm:$0xff] }
 0x4ac   : > { %2816 = vst.msk [vmem:[#allocation3 + $0x90] sm:$0xff] %vm674_vm3, %v2792_v43  ;;  %3444 = vst.msk [vmem:[#allocation3] sm:$0xff] %vm674_vm3, %v3420_v51  ;;  %v4279_v53 = vpop.f32.mrb[32].mxu0 }
 0x4ad   : > { %v3423_v7 = vadd.f32 %v4279_v53, %v3137_v17  ;;  %v3311_v52 = vpop.f32.mrb[33].mxu0 }
 0x4ae   : > { %v3422_v54 = vadd.f32 %v3311_v52, %v3136_v26  ;;  %v3499_v26 = vld [vmem:[%s5515_s23 + $0x38] sm:$0xff] }
 0x4af   : > { %3447 = vst.msk [vmem:[#allocation3 + $0x18] sm:$0xff] %vm674_vm3, %v3423_v7 }
 0x4b0   : > { %3446 = vst.msk [vmem:[#allocation3 + $0x10] sm:$0xff] %vm674_vm3, %v3422_v54  ;;  %v4282_v13 = vpop.f32.mrb[34].mxu0 }
 0x4b1   : > { %v3425_v35 = vadd.f32 %v4282_v13, %v3139_v48  ;;  %v3321_v56 = vpop.f32.mrb[35].mxu0  ;;  %v3498_v48 = vld [vmem:[%s5515_s23 + $0x30] sm:$0xff] }
 0x4b2   : > { %v3469_v57 = vld [vmem:[#allocation3 + $0x8] sm:$0xff]  ;;  %v3424_v59 = vadd.f32 %v3321_v56, %v3138_v50 }
 0x4b3   : > { %vm3517_vm0 = vcmp.gt.f32.partialorder %v3469_v57, 0.0  ;;  %v3541_v60 = vmul.f32 0.1, %v3469_v57  ;;  %v3468_v41 = vld [vmem:[#allocation3] sm:$0xff]  ;;  %3449 = vst.msk [vmem:[#allocation3 + $0x28] sm:$0xff] %vm674_vm3, %v3425_v35  ;;  %v3147_v35 = vld [vmem:[#allocation3 + $0x68] sm:$0xff] }
 0x4b4   : > { %vm3516_vm13 = vcmp.gt.f32.partialorder %v3468_v41, 0.0  ;;  %v3540_v45 = vmul.f32 0.1, %v3468_v41  ;;  %3448 = vst.msk [vmem:[#allocation3 + $0x20] sm:$0xff] %vm674_vm3, %v3424_v59  ;;  %v4285_v62 = vpop.f32.mrb[36].mxu0  ;;  %v3146_v59 = vld [vmem:[#allocation3 + $0x60] sm:$0xff] }
 0x4b5   : > { %v3565_v28 = vsel %vm3517_vm0, %v3469_v57, %v3541_v60  ;;  %v3427_v63 = vadd.f32 %v4285_v62, %v3141_v3  ;;  %v3331_v37 = vpop.f32.mrb[37].mxu0  ;;  %v3501_v62 = vld [vmem:[%s5515_s23 + $0x48] sm:$0xff] }
 0x4b6   : > { %v3589_v0 = vadd.f32 %v3565_v28, %v3493_v55  ;;  %v3564_v46 = vsel %vm3516_vm13, %v3468_v41, %v3540_v45  ;;  %v3471_v2 = vld [vmem:[#allocation3 + $0x18] sm:$0xff]  ;;  %v3426_v44 = vadd.f32 %v3331_v37, %v3140_v47  ;;  %v3500_v47 = vld [vmem:[%s5515_s23 + $0x40] sm:$0xff] }
 0x4b7   : > { %v3588_v6 = vadd.f32 %v3564_v46, %v3492_v32  ;;  %vm3519_vm1 = vcmp.gt.f32.partialorder %v3471_v2, 0.0  ;;  %v3543_v8 = vmul.f32 0.1, %v3471_v2  ;;  %v3470_v10 = vld [vmem:[#allocation3 + $0x10] sm:$0xff]  ;;  %3451 = vst.msk [vmem:[#allocation3 + $0x38] sm:$0xff] %vm674_vm3, %v3427_v63 }
 0x4b8   : > { %3613 = vst.msk [vmem:[%s6420_s4 + $0x8] sm:$0xff] %vm674_vm3, %v3589_v0  ;;  %vm3518_vm2 = vcmp.gt.f32.partialorder %v3470_v10, 0.0  ;;  %v3542_v38 = vmul.f32 0.1, %v3470_v10  ;;  %3450 = vst.msk [vmem:[#allocation3 + $0x30] sm:$0xff] %vm674_vm3, %v3426_v44  ;;  %v4268_v36 = vpop.f32.mrb[50].mxu1 }
 0x4b9   : > { %v4288_v11 = vpop.f32.mrb[38].mxu0  ;;  %3612 = vst.msk [vmem:[%s6420_s4] sm:$0xff] %vm674_vm3, %v3588_v6  ;;  %v3567_v5 = vsel %vm3519_vm1, %v3471_v2, %v3543_v8  ;;  %v2795_v61 = vadd.f32 %v4268_v36, %v2509_v14  ;;  %v2755_v34 = vpop.f32.mrb[51].mxu1  ;;  %v3149_v0 = vld [vmem:[#allocation3 + $0x78] sm:$0xff]  ;;  %v3148_v44 = vld [vmem:[#allocation3 + $0x70] sm:$0xff] }
 0x4ba   : > { %v3429_v30 = vadd.f32 %v4288_v11, %v3143_v49  ;;  %v3341_v29 = vpop.f32.mrb[39].mxu0  ;;  %v3591_v39 = vadd.f32 %v3567_v5, %v3495_v42  ;;  %v3566_v31 = vsel %vm3518_vm2, %v3470_v10, %v3542_v38  ;;  %v3473_v23 = vld [vmem:[#allocation3 + $0x28] sm:$0xff]  ;;  %v2794_v9 = vadd.f32 %v2755_v34, %v2508_v15  ;;  %v3503_v49 = vld [vmem:[%s5515_s23 + $0x58] sm:$0xff]  ;;  %v3502_v5 = vld [vmem:[%s5515_s23 + $0x50] sm:$0xff] }
 0x4bb   : > { %v3428_v12 = vadd.f32 %v3341_v29, %v3142_v20  ;;  %v3590_v4 = vadd.f32 %v3566_v31, %v3494_v33  ;;  %vm3521_vm4 = vcmp.gt.f32.partialorder %v3473_v23, 0.0  ;;  %v3545_v40 = vmul.f32 0.1, %v3473_v23  ;;  %v3472_v21 = vld [vmem:[#allocation3 + $0x20] sm:$0xff]  ;;  %2819 = vst.msk [vmem:[#allocation3 + $0xa8] sm:$0xff] %vm674_vm3, %v2795_v61  ;;  %v3151_v61 = vld [vmem:[#allocation3 + $0x88] sm:$0xff] }
 0x4bc   : > { %3453 = vst.msk [vmem:[#allocation3 + $0x48] sm:$0xff] %vm674_vm3, %v3429_v30  ;;  %3615 = vst.msk [vmem:[%s6420_s4 + $0x18] sm:$0xff] %vm674_vm3, %v3591_v39  ;;  %vm3520_vm5 = vcmp.gt.f32.partialorder %v3472_v21, 0.0  ;;  %v3544_v19 = vmul.f32 0.1, %v3472_v21  ;;  %v4291_v25 = vpop.f32.mrb[40].mxu0 }
 0x4bd   : > { %2818 = vst.msk [vmem:[#allocation3 + $0xa0] sm:$0xff] %vm674_vm3, %v2794_v9  ;;  %3452 = vst.msk [vmem:[#allocation3 + $0x40] sm:$0xff] %vm674_vm3, %v3428_v12  ;;  %v3569_v58 = vsel %vm3521_vm4, %v3473_v23, %v3545_v40  ;;  %v3431_v27 = vadd.f32 %v4291_v25, %v3145_v22  ;;  %v3351_v16 = vpop.f32.mrb[41].mxu0  ;;  %v2511_v15 = vld [vmem:[#allocation3 + $0xb8] sm:$0xff]  ;;  %v2510_v23 = vld [vmem:[#allocation3 + $0xb0] sm:$0xff] }
 0x4be   : > { %3614 = vst.msk [vmem:[%s6420_s4 + $0x10] sm:$0xff] %vm674_vm3, %v3590_v4  ;;  %v3593_v43 = vadd.f32 %v3569_v58, %v3497_v18  ;;  %v3568_v51 = vsel %vm3520_vm5, %v3472_v21, %v3544_v19  ;;  %v3475_v17 = vld [vmem:[#allocation3 + $0x38] sm:$0xff]  ;;  %v3430_v53 = vadd.f32 %v3351_v16, %v3144_v1  ;;  %v3150_v12 = vld [vmem:[#allocation3 + $0x80] sm:$0xff]  ;;  %v3505_v25 = vld [vmem:[%s5515_s23 + $0x68] sm:$0xff] }
 0x4bf   : > { %v3592_v7 = vadd.f32 %v3568_v51, %v3496_v24  ;;  %vm3523_vm6 = vcmp.gt.f32.partialorder %v3475_v17, 0.0  ;;  %v3547_v52 = vmul.f32 0.1, %v3475_v17  ;;  %v3474_v54 = vld [vmem:[#allocation3 + $0x30] sm:$0xff]  ;;  %3455 = vst.msk [vmem:[#allocation3 + $0x58] sm:$0xff] %vm674_vm3, %v3431_v27  ;;  %v3504_v1 = vld [vmem:[%s5515_s23 + $0x60] sm:$0xff] }
 0x4c0   : > { %3617 = vst.msk [vmem:[%s6420_s4 + $0x28] sm:$0xff] %vm674_vm3, %v3593_v43  ;;  %vm3522_vm7 = vcmp.gt.f32.partialorder %v3474_v54, 0.0  ;;  %v3546_v13 = vmul.f32 0.1, %v3474_v54  ;;  %3454 = vst.msk [vmem:[#allocation3 + $0x50] sm:$0xff] %vm674_vm3, %v3430_v53  ;;  %v4294_v50 = vpop.f32.mrb[42].mxu0 }
 0x4c1   : > { %3616 = vst.msk [vmem:[%s6420_s4 + $0x20] sm:$0xff] %vm674_vm3, %v3592_v7  ;;  %v3571_v56 = vsel %vm3523_vm6, %v3475_v17, %v3547_v52  ;;  %v3433_v57 = vadd.f32 %v4294_v50, %v3147_v35  ;;  %v3361_v55 = vpop.f32.mrb[43].mxu0  ;;  %v3153_v35 = vld [vmem:[#allocation3 + $0x98] sm:$0xff] }
 0x4c2   : > { %v3595_v60 = vadd.f32 %v3571_v56, %v3499_v26  ;;  %v3570_v41 = vsel %vm3522_vm7, %v3474_v54, %v3546_v13  ;;  %v3432_v45 = vadd.f32 %v3361_v55, %v3146_v59  ;;  %v3507_v26 = vld [vmem:[%s5515_s23 + $0x78] sm:$0xff]  ;;  %v3152_v59 = vld [vmem:[#allocation3 + $0x90] sm:$0xff] }
 0x4c3   : > { %v3477_v32 = vld [vmem:[#allocation3 + $0x48] sm:$0xff]  ;;  %v3594_v3 = vadd.f32 %v3570_v41, %v3498_v48  ;;  %3457 = vst.msk [vmem:[#allocation3 + $0x68] sm:$0xff] %vm674_vm3, %v3433_v57  ;;  %v3506_v48 = vld [vmem:[%s5515_s23 + $0x70] sm:$0xff] }
 0x4c4   : > { %vm3525_vm8 = vcmp.gt.f32.partialorder %v3477_v32, 0.0  ;;  %v3549_v28 = vmul.f32 0.1, %v3477_v32  ;;  %v3476_v63 = vld [vmem:[#allocation3 + $0x40] sm:$0xff]  ;;  %3619 = vst.msk [vmem:[%s6420_s4 + $0x38] sm:$0xff] %vm674_vm3, %v3595_v60  ;;  %3456 = vst.msk [vmem:[#allocation3 + $0x60] sm:$0xff] %vm674_vm3, %v3432_v45 }
 0x4c5   : > { %vm3524_vm9 = vcmp.gt.f32.partialorder %v3476_v63, 0.0  ;;  %v3548_v37 = vmul.f32 0.1, %v3476_v63  ;;  %v4297_v46 = vpop.f32.mrb[44].mxu0  ;;  %3618 = vst.msk [vmem:[%s6420_s4 + $0x30] sm:$0xff] %vm674_vm3, %v3594_v3 }
 0x4c6   : > { %v3573_v2 = vsel %vm3525_vm8, %v3477_v32, %v3549_v28  ;;  %v3435_v42 = vadd.f32 %v4297_v46, %v3149_v0  ;;  %v3371_v6 = vpop.f32.mrb[45].mxu0  ;;  %v3479_v33 = vld [vmem:[#allocation3 + $0x58] sm:$0xff] }
 0x4c7   : > { %v3597_v8 = vadd.f32 %v3573_v2, %v3501_v62  ;;  %v3572_v10 = vsel %vm3524_vm9, %v3476_v63, %v3548_v37  ;;  %v3434_v38 = vadd.f32 %v3371_v6, %v3148_v44  ;;  %vm3527_vm10 = vcmp.gt.f32.partialorder %v3479_v33, 0.0  ;;  %v3478_v11 = vld [vmem:[#allocation3 + $0x50] sm:$0xff]  ;;  %v3509_v62 = vld [vmem:[%s5515_s23 + $0x88] sm:$0xff] }
 0x4c8   : > { %v3596_v14 = vadd.f32 %v3572_v10, %v3500_v47  ;;  %v3551_v36 = vmul.f32 0.1, %v3479_v33  ;;  %3459 = vst.msk [vmem:[#allocation3 + $0x78] sm:$0xff] %vm674_vm3, %v3435_v42  ;;  %vm3526_vm11 = vcmp.gt.f32.partialorder %v3478_v11, 0.0  ;;  %v3550_v30 = vmul.f32 0.1, %v3478_v11 }
 0x4c9   : > { %3621 = vst.msk [vmem:[%s6420_s4 + $0x48] sm:$0xff] %vm674_vm3, %v3597_v8  ;;  %3458 = vst.msk [vmem:[#allocation3 + $0x70] sm:$0xff] %vm674_vm3, %v3434_v38  ;;  %v4271_v34 = vpop.f32.mrb[52].mxu1  ;;  %v4300_v20 = vpop.f32.mrb[46].mxu0  ;;  %v3508_v47 = vld [vmem:[%s5515_s23 + $0x80] sm:$0xff]  ;;  %v3155_v44 = vld [vmem:[#allocation3 + $0xa8] sm:$0xff] }
 0x4ca   : > { %3620 = vst.msk [vmem:[%s6420_s4 + $0x40] sm:$0xff] %vm674_vm3, %v3596_v14  ;;  %v3575_v29 = vsel %vm3527_vm10, %v3479_v33, %v3551_v36  ;;  %v2797_v39 = vadd.f32 %v4271_v34, %v2511_v15  ;;  %v3437_v31 = vadd.f32 %v4300_v20, %v3151_v61  ;;  %v2765_v9 = vpop.f32.mrb[53].mxu1  ;;  %v3381_v4 = vpop.f32.mrb[47].mxu0  ;;  %v3574_v40 = vsel %vm3526_vm11, %v3478_v11, %v3550_v30  ;;  %v3481_v21 = vld [vmem:[#allocation3 + $0x68] sm:$0xff]  ;;  %v3154_v10 = vld [vmem:[#allocation3 + $0xa0] sm:$0xff]  ;;  %v3511_v14 = vld [vmem:[%s5515_s23 + $0x98] sm:$0xff] }
 0x4cb   : > { %v3599_v18 = vadd.f32 %v3575_v29, %v3503_v49  ;;  %v2796_v24 = vadd.f32 %v2765_v9, %v2510_v23  ;;  %v3436_v19 = vadd.f32 %v3381_v4, %v3150_v12  ;;  %v3598_v22 = vadd.f32 %v3574_v40, %v3502_v5  ;;  %v3480_v27 = vld [vmem:[#allocation3 + $0x60] sm:$0xff]  ;;  %v3510_v5 = vld [vmem:[%s5515_s23 + $0x90] sm:$0xff] }
 0x4cc   : > { %vm3529_vm12 = vcmp.gt.f32.partialorder %v3481_v21, 0.0  ;;  %v3553_v58 = vmul.f32 0.1, %v3481_v21  ;;  %2821 = vst.msk [vmem:[#allocation3 + $0xb8] sm:$0xff] %vm674_vm3, %v2797_v39  ;;  %3461 = vst.msk [vmem:[#allocation3 + $0x88] sm:$0xff] %vm674_vm3, %v3437_v31  ;;  %vm3528_vm14 = vcmp.gt.f32.partialorder %v3480_v27, 0.0 }
 0x4cd   : > { %3623 = vst.msk [vmem:[%s6420_s4 + $0x58] sm:$0xff] %vm674_vm3, %v3599_v18  ;;  %v3552_v16 = vmul.f32 0.1, %v3480_v27  ;;  %2820 = vst.msk [vmem:[#allocation3 + $0xb0] sm:$0xff] %vm674_vm3, %v2796_v24  ;;  %v3513_v18 = vld [vmem:[%s5515_s23 + $0xa8] sm:$0xff]  ;;  %v3512_v24 = vld [vmem:[%s5515_s23 + $0xa0] sm:$0xff] }
 0x4ce   : > { %3460 = vst.msk [vmem:[#allocation3 + $0x80] sm:$0xff] %vm674_vm3, %v3436_v19  ;;  %3622 = vst.msk [vmem:[%s6420_s4 + $0x50] sm:$0xff] %vm674_vm3, %v3598_v22  ;;  %v3577_v43 = vsel %vm3529_vm12, %v3481_v21, %v3553_v58 }
 0x4cf   : > { %v3601_v51 = vadd.f32 %v3577_v43, %v3505_v25  ;;  %v3576_v17 = vsel %vm3528_vm14, %v3480_v27, %v3552_v16  ;;  %v3483_v53 = vld [vmem:[#allocation3 + $0x78] sm:$0xff] }
 0x4d0   : > { %v3600_v7 = vadd.f32 %v3576_v17, %v3504_v1  ;;  %vm3531_vm15 = vcmp.gt.f32.partialorder %v3483_v53, 0.0  ;;  %v3555_v52 = vmul.f32 0.1, %v3483_v53  ;;  %v3482_v54 = vld [vmem:[#allocation3 + $0x70] sm:$0xff]  ;;  %v4303_v50 = vpop.f32.mrb[48].mxu0  ;;  %v3515_v16 = vld [vmem:[%s5515_s23 + $0xb8] sm:$0xff] }
 0x4d1   : > { %3625 = vst.msk [vmem:[%s6420_s4 + $0x68] sm:$0xff] %vm674_vm3, %v3601_v51  ;;  %vm3530_vm0 = vcmp.gt.f32.partialorder %v3482_v54, 0.0  ;;  %v3554_v13 = vmul.f32 0.1, %v3482_v54  ;;  %v3439_v57 = vadd.f32 %v4303_v50, %v3153_v35  ;;  %v3391_v55 = vpop.f32.mrb[49].mxu0  ;;  %v3514_v17 = vld [vmem:[%s5515_s23 + $0xb0] sm:$0xff] }
 0x4d2   : > { %3624 = vst.msk [vmem:[%s6420_s4 + $0x60] sm:$0xff] %vm674_vm3, %v3600_v7  ;;  %v3579_v56 = vsel %vm3531_vm15, %v3483_v53, %v3555_v52  ;;  %v3438_v45 = vadd.f32 %v3391_v55, %v3152_v59  ;;  %s3637_s23 = scalar_lea.sflag [#allocation6], %s5509_s3 }
 0x4d3   : > { %v3603_v60 = vadd.f32 %v3579_v56, %v3507_v26  ;;  %v3578_v41 = vsel %vm3530_vm0, %v3482_v54, %v3554_v13  ;;  %v3485_v32 = vld [vmem:[#allocation3 + $0x88] sm:$0xff]  ;;  %3463 = vst.msk [vmem:[#allocation3 + $0x98] sm:$0xff] %vm674_vm3, %v3439_v57  ;;  %v3157_v29 = vld [vmem:[#allocation3 + $0xb8] sm:$0xff] }
 0x4d4   : > { %v3602_v3 = vadd.f32 %v3578_v41, %v3506_v48  ;;  %vm3533_vm13 = vcmp.gt.f32.partialorder %v3485_v32, 0.0  ;;  %v3557_v28 = vmul.f32 0.1, %v3485_v32  ;;  %3462 = vst.msk [vmem:[#allocation3 + $0x90] sm:$0xff] %vm674_vm3, %v3438_v45  ;;  %v3156_v23 = vld [vmem:[#allocation3 + $0xb0] sm:$0xff] }
 0x4d5   : > { %v3484_v63 = vld [vmem:[#allocation3 + $0x80] sm:$0xff]  ;;  %3627 = vst.msk [vmem:[%s6420_s4 + $0x78] sm:$0xff] %vm674_vm3, %v3603_v60 }
 0x4d6   : > { %vm3532_vm1 = vcmp.gt.f32.partialorder %v3484_v63, 0.0  ;;  %v3556_v37 = vmul.f32 0.1, %v3484_v63  ;;  %3626 = vst.msk [vmem:[%s6420_s4 + $0x70] sm:$0xff] %vm674_vm3, %v3602_v3  ;;  %v3581_v0 = vsel %vm3533_vm13, %v3485_v32, %v3557_v28 }
 0x4d7   : > { %v3605_v46 = vadd.f32 %v3581_v0, %v3509_v62 }
 0x4d8   : > { %v3580_v2 = vsel %vm3532_vm1, %v3484_v63, %v3556_v37  ;;  %v4306_v6 = vpop.f32.mrb[50].mxu0 }
 0x4d9   : > { %v3604_v42 = vadd.f32 %v3580_v2, %v3508_v47  ;;  %3629 = vst.msk [vmem:[%s6420_s4 + $0x88] sm:$0xff] %vm674_vm3, %v3605_v46  ;;  %v3441_v8 = vadd.f32 %v4306_v6, %v3155_v44  ;;  %v3401_v33 = vpop.f32.mrb[51].mxu0 }
 0x4da   : > { %v3487_v49 = vld [vmem:[#allocation3 + $0x98] sm:$0xff]  ;;  %v3440_v38 = vadd.f32 %v3401_v33, %v3154_v10 }
 0x4db   : > { %3628 = vst.msk [vmem:[%s6420_s4 + $0x80] sm:$0xff] %vm674_vm3, %v3604_v42  ;;  %vm3535_vm2 = vcmp.gt.f32.partialorder %v3487_v49, 0.0  ;;  %v3559_v36 = vmul.f32 0.1, %v3487_v49  ;;  %v3486_v11 = vld [vmem:[#allocation3 + $0x90] sm:$0xff]  ;;  %3465 = vst.msk [vmem:[#allocation3 + $0xa8] sm:$0xff] %vm674_vm3, %v3441_v8 }
 0x4dc   : > { %vm3534_vm4 = vcmp.gt.f32.partialorder %v3486_v11, 0.0  ;;  %v3558_v61 = vmul.f32 0.1, %v3486_v11  ;;  %3464 = vst.msk [vmem:[#allocation3 + $0xa0] sm:$0xff] %vm674_vm3, %v3440_v38 }
 0x4dd   : > { %v3583_v30 = vsel %vm3535_vm2, %v3487_v49, %v3559_v36 }
 0x4de   : > { %v3607_v15 = vadd.f32 %v3583_v30, %v3511_v14  ;;  %v3582_v34 = vsel %vm3534_vm4, %v3486_v11, %v3558_v61 }
 0x4df   : > { %v3606_v20 = vadd.f32 %v3582_v34, %v3510_v5 }
 0x4e0   : > { %3631 = vst.msk [vmem:[%s6420_s4 + $0x98] sm:$0xff] %vm674_vm3, %v3607_v15  ;;  %v4309_v39 = vpop.f32.mrb[52].mxu0 }
 0x4e1   : > { %3630 = vst.msk [vmem:[%s6420_s4 + $0x90] sm:$0xff] %vm674_vm3, %v3606_v20  ;;  %v3443_v31 = vadd.f32 %v4309_v39, %v3157_v29  ;;  %v3411_v9 = vpop.f32.mrb[53].mxu0 }
 0x4e2   : > { %v3489_v12 = vld [vmem:[#allocation3 + $0xa8] sm:$0xff]  ;;  %v3442_v4 = vadd.f32 %v3411_v9, %v3156_v23 }
 0x4e3   : > { %vm3537_vm5 = vcmp.gt.f32.partialorder %v3489_v12, 0.0  ;;  %v3561_v40 = vmul.f32 0.1, %v3489_v12  ;;  %v3488_v21 = vld [vmem:[#allocation3 + $0xa0] sm:$0xff]  ;;  %3467 = vst.msk [vmem:[#allocation3 + $0xb8] sm:$0xff] %vm674_vm3, %v3443_v31 }
 0x4e4   : > { %vm3536_vm6 = vcmp.gt.f32.partialorder %v3488_v21, 0.0  ;;  %v3560_v19 = vmul.f32 0.1, %v3488_v21  ;;  %3466 = vst.msk [vmem:[#allocation3 + $0xb0] sm:$0xff] %vm674_vm3, %v3442_v4 }
 0x4e5   : > { %v3585_v22 = vsel %vm3537_vm5, %v3489_v12, %v3561_v40 }
 0x4e6   : > { %v3609_v25 = vadd.f32 %v3585_v22, %v3513_v18  ;;  %v3584_v58 = vsel %vm3536_vm6, %v3488_v21, %v3560_v19 }
 0x4e7   : > { %v3608_v27 = vadd.f32 %v3584_v58, %v3512_v24 }
 0x4e8   : > { %3633 = vst.msk [vmem:[%s6420_s4 + $0xa8] sm:$0xff] %vm674_vm3, %v3609_v25 }
 0x4e9   : > { %3632 = vst.msk [vmem:[%s6420_s4 + $0xa0] sm:$0xff] %vm674_vm3, %v3608_v27 }
 0x4ea   : > { %v3491_v1 = vld [vmem:[#allocation3 + $0xb8] sm:$0xff] }
 0x4eb   : > { %vm3539_vm7 = vcmp.gt.f32.partialorder %v3491_v1, 0.0  ;;  %v3563_v43 = vmul.f32 0.1, %v3491_v1  ;;  %v3490_v51 = vld [vmem:[#allocation3 + $0xb0] sm:$0xff] }
 0x4ec   : > { %vm3538_vm8 = vcmp.gt.f32.partialorder %v3490_v51, 0.0  ;;  %v3562_v53 = vmul.f32 0.1, %v3490_v51 }
 0x4ed   : > { %v3587_v7 = vsel %vm3539_vm7, %v3491_v1, %v3563_v43 }
 0x4ee   : > { %v3611_v26 = vadd.f32 %v3587_v7, %v3515_v16  ;;  %v3586_v52 = vsel %vm3538_vm8, %v3490_v51, %v3562_v53 }
 0x4ef   : > { %v3610_v54 = vadd.f32 %v3586_v52, %v3514_v17 }
 0x4f0   : > { %3635 = vst.msk [vmem:[%s6420_s4 + $0xb8] sm:$0xff] %vm674_vm3, %v3611_v26 }
 0x4f1   : > { %3634 = vst.msk [vmem:[%s6420_s4 + $0xb0] sm:$0xff] %vm674_vm3, %v3610_v54 }
 0x4f2   : > { %4812 = shalt.err (!%p4809_p10)
}
 0x4f3   : > { %s4813_s17 = scalar_lea.hbm %s6515_s8, 3072  ;;  %s4817_s24 = scalar_lea.hbm %s6729_s10, 12288 }
 0x4f4   : > { %p4814_p13 = scmp.ne.s32.totalorder %s6515_s8, %s4813_s17  ;;  %p4818_p12 = scmp.lt.u32.totalorder %s6515_s8, %s6729_s10 }
 0x4f5   : > { %p4819_p1 = scmp.lt.u32.totalorder %s4817_s24, %s4813_s17  ;;  %p4821_p2 = scmp.lt.u32.totalorder %s4813_s17, %s6515_s8 }
 0x4f6   : > { %p4815_p5 = pnand %p4814_p13, %p6730_p6 }
 0x4f7   : > { %p4820_p11 = por %p4819_p1, %p4818_p12 }
 0x4f8   : > { %p4816_p4 = pneg %p4815_p5 }
 0x4f9   : > { %p4822_p9 = por %p4821_p2, %p4820_p11 }
 0x4fb   : > { %p4823_p8 = pnand %p4822_p9, %p4816_p4 }
 0x4fd   : > { %4826 = shalt.err (!%p4823_p8)
}
 0x4fe   : > { %s4965_s6 = smov 128   ;;  %s4966_s19 = smov 8  }
 0x4ff   : > { %4356 = dma.vmem_to_hbm [thread:$0]  (%p6730_p6), %s6510_s25, 3072, %s6515_s8, %s3637_s23, %s4965_s6, %s4965_s6, %s4966_s19  }
 0x500 PF: > { %s6731_s15 = sld [smem:[#allocation37_spill]]  ;;  %s6732_s9 = sld [smem:[#allocation32_spill]] }
 0x501   : > { %s6733_s30 = sld [smem:[#allocation39_spill]] }
 0x506   : > { %p4403_p0 = scmp.ge.s32.totalorder %s6731_s15, 2  ;;  %s3667_s16 = sand.u32 1, %s6732_s9  }
 0x507   : > { %p6734_p3 = scmp.ne.s32.totalorder %s6733_s30, 0  ;;  %s3668_s26 = scalar_lea.sflag [#allocation6], %s3667_s16 }
 0x509   : > { %p4391_p7 = pnand %p4403_p0, %p6734_p3 }
 0x50b   : > { %4900 = dma.done.wait (!%p4391_p7), %s3668_s26, 3072  }
 0x50c   : > { %4902 = vsyncadd (!%p4391_p7), %s3668_s26, 4294964224  ;;  %s37_s23 = sadd.s32 1, %s6731_s15   ;;  %s6735_s13 = sld [smem:[#allocation30_spill]] }
 0x50d   : > { %p34_p10 = scmp.ge.s32.totalorder %s37_s23, 6   ;;  %s6736_s14 = sld [smem:[#allocation31_spill]] }
 0x50e   : > { %s6737_s15 = sld [smem:[#allocation46_spill]]  ;;  %s6738_s16 = sld [smem:[#allocation33_spill]] }
 0x50f   : > { %s6739_s17 = sld [smem:[#allocation34_spill]]  ;;  %s6740_s18 = sld [smem:[#allocation45_spill]] }
 0x510   : > { %s6741_s3 = sld [smem:[#allocation42_spill]]  ;;  %s6742_s25 = sld [smem:[#allocation44_spill]] }
 0x511   : > { %s6743_s19 = smov %s4937_s21  ;;  %s6744_s20 = smov %s4941_s22 }
 0x512   :  { %36 = sbr.rel (!%p34_p10) target bundleno = 28 (0x1c), region = 184 }
 0x516   : > { %s6745_s21 = smov %s6741_s3  ;;  %s6746_s22 = smov %s6742_s25 }
 0x519   :  { %3673 = vsyncpa [#allocation5], 1 }
 0x51a   :  { %3675 = vsyncpa [#allocation5 + $0x1], 1 }
 0x51b   :  { %3676 = vsyncpa [#allocation8], 1 }
 0x51c   :  { %3678 = vsyncpa [#allocation8 + $0x1], 1 }
 0x51d   :  { %3679 = vsyncpa [#allocation11], 1 }
 0x51e   :  { %3681 = vsyncpa [#allocation11 + $0x1], 1 }
 0x51f   :  { %3682 = vsyncpa [#allocation14], 1 }
 0x520   :  { %3684 = vsyncpa [#allocation14 + $0x1], 1 }
 0x521   :  { %3685 = vsyncpa [#allocation17], 1 }
 0x522   :  { %3686 = vsyncpa [#allocation20], 1 }
 0x523   :  { %3687 = vsyncpa [#allocation6], 1 }
 0x524   :  { %3689 = vsyncpa [#allocation6 + $0x1], 1 }

</bundles_post_ra>
